<compile_context>
chip_gen: v5e
topology: v5e:2x2
jax: 0.10.0
libtpu: 0.0.40
codegen_flags: <defaults>
</compile_context>

<pallas_src>
import functools
import math

import jax
import jax.numpy as jnp
from jax.experimental import pallas as pl
from jax.experimental.pallas import tpu as pltpu

# ----------------------------- model config ---------------------------------
NTOKEN = 40
NINP = 32
NHID = 32
NHIDLAST = 32          # must be even (nhidlast / 2 is used)
NLAYERS = 2
N_CLASSES = 4
CLASS_COUNT = [0, 10, 20, 30]   # forward() appends NTOKEN -> [0,10,20,30,40]
SEQ = 8
BATCH = 2


# --------------------------- fused forward kernel ----------------------------
def _fused_forward_kernel(*refs, seq, batch, nlayers):
    f32 = jnp.float32
    bf16 = jnp.bfloat16

    idx = 0
    tok_ref = refs[idx]; idx += 1                      # (S*B, 1) int32
    enc_ref = refs[idx]; idx += 1                      # (V, ninp) bf16
    lstm = []
    for _ in range(nlayers):                           # (wih(4,in,H), whh(4,H,H), b(4,1,H), h0, c0)
        lstm.append(refs[idx:idx + 5])
        idx += 5
    (latw_ref, latb_ref, decw_ref, decb_ref,
     clsw_ref, oc_ref, ocT_ref) = refs[idx:idx + 7]
    idx += 7
    class_out_ref, prob_ref, tprob_ref = refs[idx:idx + 3]
    idx += 3
    state_refs = refs[idx:idx + 2 * nlayers]           # hN0, cN0, hN1, cN1, ...
    idx += 2 * nlayers
    out_s = refs[idx]                                  # VMEM scratch (S*B, H_last) f32

    SB = seq * batch
    ntoken = enc_ref.shape[0]
    n_classes = clsw_ref.shape[-1]

    # sigmoid via tanh: exactly one EUP push per call (never exp + reciprocal).
    def sig(v):
        return 0.5 * jnp.tanh(0.5 * v) + 0.5

    # ---- embedding as one-hot bf16 MXU matmul (dropoute/dropouti identity) --
    tok = tok_ref[...]                                              # (SB, 1)
    iota = jax.lax.broadcasted_iota(jnp.int32, (SB, ntoken), 1)
    onehot = (iota == tok).astype(bf16)                             # (SB, V) bf16
    x = jnp.dot(onehot, enc_ref[...], preferred_element_type=f32)   # (SB, ninp) f32

    # ---- hoist layer-0 input projection out of the recurrence (per gate) ----
    wih0_ref, whh0_ref, b0_ref, _, _ = lstm[0]
    x_bf = x.astype(bf16)
    gx0 = [jnp.dot(x_bf, wih0_ref[g], preferred_element_type=f32) + b0_ref[g]
           for g in range(4)]                                       # 4 x (SB, H0) f32

    # Hoist recurrent weights / biases (small, stay in vregs).
    whh_g = [[lstm[l][1][g] for g in range(4)] for l in range(nlayers)]
    bias_g = [[lstm[l][2][g] for g in range(4)] for l in range(nlayers)]

    h = [lstm[l][3][...] for l in range(nlayers)]                   # (B, H_l) f32
    c = [lstm[l][4][...] for l in range(nlayers)]

    # ---- wavefront-interleaved time recurrence ------------------------------
    # Layer l>0 at step t depends on layer l-1 at step t and layer l at t-1, so
    # layer-0 step t+1 is independent of layer-1 step t -> two overlapping
    # dependence chains in the fully unrolled trace.
    for t in range(seq):
        for l in range(nlayers):
            if l == 0:
                pre = [gx0[g][t * batch:(t + 1) * batch, :] for g in range(4)]
            else:
                wih_ref = lstm[l][0]
                x_in = h[l - 1].astype(bf16)                        # same-step input
                pre = [jnp.dot(x_in, wih_ref[g], preferred_element_type=f32)
                       + bias_g[l][g] for g in range(4)]
            h_bf = h[l].astype(bf16)
            # 4 independent small bf16 MXU dots; gate results already live at
            # lanes [0, H) -> no lane rotations in the c/h update.
            g_i = pre[0] + jnp.dot(h_bf, whh_g[l][0], preferred_element_type=f32)
            g_f = pre[1] + jnp.dot(h_bf, whh_g[l][1], preferred_element_type=f32)
            g_g = pre[2] + jnp.dot(h_bf, whh_g[l][2], preferred_element_type=f32)
            g_o = pre[3] + jnp.dot(h_bf, whh_g[l][3], preferred_element_type=f32)
            i_g = sig(g_i)
            f_g = sig(g_f)
            o_g = sig(g_o)
            g_c = jnp.tanh(g_g)
            c[l] = f_g * c[l] + i_g * g_c
            h[l] = o_g * jnp.tanh(c[l])
        # Only the LAST layer's per-step output is needed by the dense tail;
        # layer-0 outputs stay in registers.  These stores are off the
        # recurrence critical path.
        out_s[t * batch:(t + 1) * batch, :] = h[nlayers - 1]

    for l in range(nlayers):                                        # write once
        state_refs[2 * l][...] = h[l]
        state_refs[2 * l + 1][...] = c[l]

    out = out_s[...]                                                # (SB, nhidlast) f32
    out_bf = out.astype(bf16)

    # ---- latent = Tanh(Linear(out[:, half:])), logit = decoder(latent) ------
    # Weights are zero-padded on the host so `out` is never lane-sliced here.
    latent = jnp.tanh(
        jnp.dot(out_bf, latw_ref[...], preferred_element_type=f32) + latb_ref[...])
    logit = (jnp.dot(latent.astype(bf16), decw_ref[...], preferred_element_type=f32)
             + decb_ref[...])                                       # (SB, V)
    prior_logit = jnp.dot(out_bf, clsw_ref[...], preferred_element_type=f32)  # (SB, C)

    # ---- prior = softmax(prior_logit); class_output = log(prior + 1e-8) -----
    pm = prior_logit.max(-1, keepdims=True)
    pe = jnp.exp(prior_logit - pm)
    prior = pe * pl.reciprocal(pe.sum(-1, keepdims=True), approx=True)
    class_out_ref[...] = jnp.log(prior + 1e-8)

    # ---- class-partitioned softmax: one exp pass + f32 one-hot matmuls ------
    oc = oc_ref[...]                                                # (V, C) f32
    ocT = ocT_ref[...]                                              # (C, V) f32
    neg = jnp.float32(-1e30)
    # Independent per-class maxes broadcast back via disjoint one-hot rows
    # (tree sum; no serial where-chain over (SB, V)).
    terms = []
    for i in range(n_classes):
        row = ocT[i:i + 1, :]                                       # (1, V)
        m = row > 0.5
        mi = jnp.where(m, logit, neg).max(-1, keepdims=True)        # (SB, 1)
        terms.append(mi * row)                                      # (SB, V)
    while len(terms) > 1:                                           # pairwise tree
        terms = [terms[k] + terms[k + 1] for k in range(0, len(terms) - 1, 2)] \
                + ([terms[-1]] if len(terms) % 2 else [])
    max_tok = terms[0]                                              # (SB, V)

    e = jnp.exp(logit - max_tok)                                    # single exp pass
    cls_sum = jnp.dot(e, oc, preferred_element_type=f32)            # (SB, C)  (f32: exact sums)
    denom = jnp.dot(cls_sum, ocT, preferred_element_type=f32)       # (SB, V)
    pc = e * pl.reciprocal(denom, approx=True)                      # per-class softmax
    prob_ref[...] = jnp.log(pc + 1e-8)
    tprob_ref[...] = pc * jnp.dot(prior, ocT, preferred_element_type=f32)


# ------------------------------ parameters ----------------------------------
def init_params(key):
    ks = jax.random.split(key, 10)
    p = {}
    # init_weights(): encoder / decoder uniform(-0.1, 0.1), decoder bias 0.
    p["enc_w"] = jax.random.uniform(ks[0], (NTOKEN, NINP), jnp.float32, -0.1, 0.1)
    p["dec_w"] = jax.random.uniform(ks[1], (NTOKEN, NINP), jnp.float32, -0.1, 0.1)
    p["dec_b"] = jnp.zeros((NTOKEN,), jnp.float32)

    lstm = []
    for l in range(NLAYERS):
        in_sz = NINP if l == 0 else NHID
        hid = NHID if l != NLAYERS - 1 else NHIDLAST
        k = 1.0 / math.sqrt(hid)
        kk = jax.random.split(ks[2 + l], 4)
        lstm.append((
            jax.random.uniform(kk[0], (4 * hid, in_sz), jnp.float32, -k, k),  # w_ih
            jax.random.uniform(kk[1], (4 * hid, hid), jnp.float32, -k, k),    # w_hh
            jax.random.uniform(kk[2], (4 * hid,), jnp.float32, -k, k),        # b_ih
            jax.random.uniform(kk[3], (4 * hid,), jnp.float32, -k, k),        # b_hh
        ))
    p["lstm"] = lstm

    half = NHIDLAST // 2
    kb = 1.0 / math.sqrt(half)
    p["class_w"] = jax.random.uniform(ks[6], (N_CLASSES, half), jnp.float32, -kb, kb)
    p["latent_w"] = jax.random.uniform(ks[7], (NINP, half), jnp.float32, -kb, kb)
    p["latent_b"] = jax.random.uniform(ks[8], (NINP,), jnp.float32, -kb, kb)
    return p


def build_class_onehot():
    bounds = CLASS_COUNT + [NTOKEN]        # forward() appends ntoken
    cid = []
    for i in range(N_CLASSES):
        cid += [i] * (bounds[i + 1] - bounds[i])
    cid = jnp.asarray(cid, jnp.int32)
    oc = (cid[:, None] == jnp.arange(N_CLASSES, dtype=jnp.int32)[None, :])
    return oc.astype(jnp.float32)          # (NTOKEN, N_CLASSES)


def pack_params(p):
    """One-time host-side packing: per-gate transposed bf16 LSTM weights,
    combined biases, zero-padded dense weights, class one-hot matrices."""
    f32, bf16 = jnp.float32, jnp.bfloat16
    pp = {"enc_w": p["enc_w"].astype(bf16)}

    lstm = []
    for (w_ih, w_hh, b_ih, b_hh) in p["lstm"]:
        hid = w_hh.shape[1]
        wih_g = jnp.stack([w_ih[g * hid:(g + 1) * hid, :].T for g in range(4)])
        whh_g = jnp.stack([w_hh[g * hid:(g + 1) * hid, :].T for g in range(4)])
        b_g = jnp.stack([(b_ih[g * hid:(g + 1) * hid]
                          + b_hh[g * hid:(g + 1) * hid]).reshape(1, -1)
                         for g in range(4)])
        lstm.append((wih_g.astype(bf16),      # (4, in, H)
                     whh_g.astype(bf16),      # (4, H,  H)
                     b_g.astype(f32)))        # (4, 1,  H)
    pp["lstm"] = lstm

    half = NHIDLAST // 2
    # latent consumes out[:, half:]  -> zero-pad the LOW rows.
    latw_pad = jnp.concatenate(
        [jnp.zeros((half, NINP), f32), p["latent_w"].T], axis=0)        # (nhidlast, ninp)
    # word_class consumes out[:, :half] -> zero-pad the HIGH rows.
    clsw_pad = jnp.concatenate(
        [p["class_w"].T, jnp.zeros((NHIDLAST - half, N_CLASSES), f32)], axis=0)

    pp["latent_w_pad"] = latw_pad.astype(bf16)
    pp["latent_b"] = p["latent_b"].reshape(1, -1).astype(f32)
    pp["dec_w_t"] = p["dec_w"].T.astype(bf16)
    pp["dec_b"] = p["dec_b"].reshape(1, -1).astype(f32)
    pp["class_w_pad"] = clsw_pad.astype(bf16)
    oc = build_class_onehot()
    pp["class_onehot"] = oc                 # (V, C) f32 (kept f32 for exact sums)
    pp["class_onehot_t"] = oc.T             # (C, V) f32
    return pp


def init_hidden(bsz):
    return [(jnp.zeros((1, bsz, NHID if l != NLAYERS - 1 else NHIDLAST), jnp.float32),
             jnp.zeros((1, bsz, NHID if l != NLAYERS - 1 else NHIDLAST), jnp.float32))
            for l in range(NLAYERS)]


# ------------------------------- forward -------------------------------------
def rnn_model_forward(pp, tokens, hidden):
    """tokens: (S, B) int32; hidden: list of (h, c) each (1, B, H).
    Returns (class_output, prob, true_prob, new_hidden) like the PyTorch module
    (eval mode, return_prob=False, return_h=False)."""
    S, B = tokens.shape
    SB = S * B
    nlayers = len(pp["lstm"])
    ntoken = pp["enc_w"].shape[0]
    n_classes = pp["class_w_pad"].shape[-1]

    inputs = [tokens.reshape(SB, 1).astype(jnp.int32), pp["enc_w"]]
    hsz = []
    for l in range(nlayers):
        wih_g, whh_g, b_g = pp["lstm"][l]
        h0 = hidden[l][0][0]     # (B, H)
        c0 = hidden[l][1][0]
        hsz.append(h0.shape[-1])
        inputs += [wih_g, whh_g, b_g, h0, c0]
    inputs += [pp["latent_w_pad"], pp["latent_b"], pp["dec_w_t"], pp["dec_b"],
               pp["class_w_pad"], pp["class_onehot"], pp["class_onehot_t"]]

    out_shape = tuple(
        [jax.ShapeDtypeStruct((SB, n_classes), jnp.float32),
         jax.ShapeDtypeStruct((SB, ntoken), jnp.float32),
         jax.ShapeDtypeStruct((SB, ntoken), jnp.float32)]
        + [jax.ShapeDtypeStruct((B, hsz[l]), jnp.float32)
           for l in range(nlayers) for _ in range(2)])

    kernel = functools.partial(_fused_forward_kernel,
                               seq=S, batch=B, nlayers=nlayers)
    outs = pl.pallas_call(
        kernel,
        out_shape=out_shape,
        scratch_shapes=[pltpu.VMEM((SB, hsz[-1]), jnp.float32)],
    )(*inputs)

    class_out, prob, true_prob = outs[0], outs[1], outs[2]
    new_hidden = [(outs[3 + 2 * l][None], outs[4 + 2 * l][None])
                  for l in range(nlayers)]
    class_output = class_out.reshape(S, B, n_classes)
    return class_output, prob, true_prob, new_hidden


# --------------------------------- main --------------------------------------
if __name__ == "__main__":
    key = jax.random.PRNGKey(0)
    k_params, k_tok = jax.random.split(key)

    params = init_params(k_params)
    packed = pack_params(params)
    tokens = jax.random.randint(k_tok, (SEQ, BATCH), 0, NTOKEN, dtype=jnp.int32)
    hidden = init_hidden(BATCH)

    fwd = jax.jit(rnn_model_forward)
    class_output, prob, true_prob, new_hidden = fwd(packed, tokens, hidden)
    jax.block_until_ready((class_output, prob, true_prob, new_hidden))

    assert class_output.shape == (SEQ, BATCH, N_CLASSES)
    assert prob.shape == (SEQ * BATCH, NTOKEN)
    assert true_prob.shape == (SEQ * BATCH, NTOKEN)
    assert len(new_hidden) == NLAYERS
    assert new_hidden[0][0].shape == (1, BATCH, NHID)
    # true_prob rows should sum to 1 (sum over classes of class-softmax * prior).
    # Tolerance relaxed vs the pure-f32 version: bf16 MXU operands + approx
    # reciprocals introduce ~1e-4..1e-3 relative error, which is expected.
    assert bool(jnp.allclose(true_prob.sum(-1), 1.0, atol=5e-3))
    assert bool(jnp.all(jnp.isfinite(prob)))
    assert bool(jnp.all(jnp.isfinite(class_output)))
    print("KERNEL_OK")
</pallas_src>

<mosaic_0001>
module attributes {stable_mosaic.version = 11 : i64} {
  func.func @_fused_forward_kernel(%arg0: memref<16x1xi32, #tpu.memory_space<vmem>>, %arg1: memref<40x32xbf16, #tpu.memory_space<vmem>>, %arg2: memref<4x32x32xbf16, #tpu.memory_space<vmem>>, %arg3: memref<4x32x32xbf16, #tpu.memory_space<vmem>>, %arg4: memref<4x1x32xf32, #tpu.memory_space<vmem>>, %arg5: memref<2x32xf32, #tpu.memory_space<vmem>>, %arg6: memref<2x32xf32, #tpu.memory_space<vmem>>, %arg7: memref<4x32x32xbf16, #tpu.memory_space<vmem>>, %arg8: memref<4x32x32xbf16, #tpu.memory_space<vmem>>, %arg9: memref<4x1x32xf32, #tpu.memory_space<vmem>>, %arg10: memref<2x32xf32, #tpu.memory_space<vmem>>, %arg11: memref<2x32xf32, #tpu.memory_space<vmem>>, %arg12: memref<32x32xbf16, #tpu.memory_space<vmem>>, %arg13: memref<1x32xf32, #tpu.memory_space<vmem>>, %arg14: memref<32x40xbf16, #tpu.memory_space<vmem>>, %arg15: memref<1x40xf32, #tpu.memory_space<vmem>>, %arg16: memref<32x4xbf16, #tpu.memory_space<vmem>>, %arg17: memref<40x4xf32, #tpu.memory_space<vmem>>, %arg18: memref<4x40xf32, #tpu.memory_space<vmem>>, %arg19: memref<16x4xf32, #tpu.memory_space<vmem>>, %arg20: memref<16x40xf32, #tpu.memory_space<vmem>>, %arg21: memref<16x40xf32, #tpu.memory_space<vmem>>, %arg22: memref<2x32xf32, #tpu.memory_space<vmem>>, %arg23: memref<2x32xf32, #tpu.memory_space<vmem>>, %arg24: memref<2x32xf32, #tpu.memory_space<vmem>>, %arg25: memref<2x32xf32, #tpu.memory_space<vmem>>, %arg26: memref<16x32xf32, #tpu.memory_space<vmem>>) attributes {dimension_semantics = [], scalar_prefetch = 0 : i64, scratch_operands = 1 : i64, tpu.core_type = #tpu.core_type<tc>} {
    %c0 = arith.constant 0 : index
    %c0_0 = arith.constant 0 : index
    %0 = vector.load %arg0[%c0, %c0_0] : memref<16x1xi32, #tpu.memory_space<vmem>>, vector<16x1xi32>
    %1 = tpu.iota {dimensions = array<i32: 1>} : vector<16x40xi32>
    %2 = vector.broadcast %0 : vector<16x1xi32> to vector<16x40xi32>
    %3 = arith.cmpi eq, %1, %2 : vector<16x40xi32>
    %4 = arith.extui %3 : vector<16x40xi1> to vector<16x40xi32>
    %5 = arith.sitofp %4 : vector<16x40xi32> to vector<16x40xf32>
    %6 = arith.truncf %5 : vector<16x40xf32> to vector<16x40xbf16>
    %c0_1 = arith.constant 0 : index
    %c0_2 = arith.constant 0 : index
    %7 = vector.load %arg1[%c0_1, %c0_2] : memref<40x32xbf16, #tpu.memory_space<vmem>>, vector<40x32xbf16>
    %cst = arith.constant dense<0.000000e+00> : vector<16x32xf32>
    %8 = tpu.matmul %6, %7, %cst {dimension_numbers = #tpu.dot_dimension_numbers<[1], [0], [0], [1], [0, 0, 1, 1], [], []>} : vector<16x40xbf16>, vector<40x32xbf16>, vector<16x32xf32> -> vector<16x32xf32>
    %9 = arith.truncf %8 : vector<16x32xf32> to vector<16x32xbf16>
    %c0_3 = arith.constant 0 : index
    %c0_4 = arith.constant 0 : index
    %c0_5 = arith.constant 0 : index
    %10 = vector.load %arg2[%c0_3, %c0_4, %c0_5] : memref<4x32x32xbf16, #tpu.memory_space<vmem>>, vector<1x32x32xbf16>
    %11 = vector.shape_cast %10 : vector<1x32x32xbf16> to vector<32x32xbf16>
    %cst_6 = arith.constant dense<0.000000e+00> : vector<16x32xf32>
    %12 = tpu.matmul %9, %11, %cst_6 {dimension_numbers = #tpu.dot_dimension_numbers<[1], [0], [0], [1], [0, 0, 1, 1], [], []>} : vector<16x32xbf16>, vector<32x32xbf16>, vector<16x32xf32> -> vector<16x32xf32>
    %c0_7 = arith.constant 0 : index
    %c0_8 = arith.constant 0 : index
    %c0_9 = arith.constant 0 : index
    %13 = vector.load %arg4[%c0_7, %c0_8, %c0_9] : memref<4x1x32xf32, #tpu.memory_space<vmem>>, vector<1x1x32xf32>
    %14 = vector.shape_cast %13 : vector<1x1x32xf32> to vector<1x32xf32>
    %15 = vector.broadcast %14 : vector<1x32xf32> to vector<16x32xf32>
    %16 = arith.addf %12, %15 : vector<16x32xf32>
    %c1 = arith.constant 1 : index
    %c0_10 = arith.constant 0 : index
    %c0_11 = arith.constant 0 : index
    %17 = vector.load %arg2[%c1, %c0_10, %c0_11] : memref<4x32x32xbf16, #tpu.memory_space<vmem>>, vector<1x32x32xbf16>
    %18 = vector.shape_cast %17 : vector<1x32x32xbf16> to vector<32x32xbf16>
    %cst_12 = arith.constant dense<0.000000e+00> : vector<16x32xf32>
    %19 = tpu.matmul %9, %18, %cst_12 {dimension_numbers = #tpu.dot_dimension_numbers<[1], [0], [0], [1], [0, 0, 1, 1], [], []>} : vector<16x32xbf16>, vector<32x32xbf16>, vector<16x32xf32> -> vector<16x32xf32>
    %c1_13 = arith.constant 1 : index
    %c0_14 = arith.constant 0 : index
    %c0_15 = arith.constant 0 : index
    %20 = vector.load %arg4[%c1_13, %c0_14, %c0_15] : memref<4x1x32xf32, #tpu.memory_space<vmem>>, vector<1x1x32xf32>
    %21 = vector.shape_cast %20 : vector<1x1x32xf32> to vector<1x32xf32>
    %22 = vector.broadcast %21 : vector<1x32xf32> to vector<16x32xf32>
    %23 = arith.addf %19, %22 : vector<16x32xf32>
    %c2 = arith.constant 2 : index
    %c0_16 = arith.constant 0 : index
    %c0_17 = arith.constant 0 : index
    %24 = vector.load %arg2[%c2, %c0_16, %c0_17] : memref<4x32x32xbf16, #tpu.memory_space<vmem>>, vector<1x32x32xbf16>
    %25 = vector.shape_cast %24 : vector<1x32x32xbf16> to vector<32x32xbf16>
    %cst_18 = arith.constant dense<0.000000e+00> : vector<16x32xf32>
    %26 = tpu.matmul %9, %25, %cst_18 {dimension_numbers = #tpu.dot_dimension_numbers<[1], [0], [0], [1], [0, 0, 1, 1], [], []>} : vector<16x32xbf16>, vector<32x32xbf16>, vector<16x32xf32> -> vector<16x32xf32>
    %c2_19 = arith.constant 2 : index
    %c0_20 = arith.constant 0 : index
    %c0_21 = arith.constant 0 : index
    %27 = vector.load %arg4[%c2_19, %c0_20, %c0_21] : memref<4x1x32xf32, #tpu.memory_space<vmem>>, vector<1x1x32xf32>
    %28 = vector.shape_cast %27 : vector<1x1x32xf32> to vector<1x32xf32>
    %29 = vector.broadcast %28 : vector<1x32xf32> to vector<16x32xf32>
    %30 = arith.addf %26, %29 : vector<16x32xf32>
    %c3 = arith.constant 3 : index
    %c0_22 = arith.constant 0 : index
    %c0_23 = arith.constant 0 : index
    %31 = vector.load %arg2[%c3, %c0_22, %c0_23] : memref<4x32x32xbf16, #tpu.memory_space<vmem>>, vector<1x32x32xbf16>
    %32 = vector.shape_cast %31 : vector<1x32x32xbf16> to vector<32x32xbf16>
    %cst_24 = arith.constant dense<0.000000e+00> : vector<16x32xf32>
    %33 = tpu.matmul %9, %32, %cst_24 {dimension_numbers = #tpu.dot_dimension_numbers<[1], [0], [0], [1], [0, 0, 1, 1], [], []>} : vector<16x32xbf16>, vector<32x32xbf16>, vector<16x32xf32> -> vector<16x32xf32>
    %c3_25 = arith.constant 3 : index
    %c0_26 = arith.constant 0 : index
    %c0_27 = arith.constant 0 : index
    %34 = vector.load %arg4[%c3_25, %c0_26, %c0_27] : memref<4x1x32xf32, #tpu.memory_space<vmem>>, vector<1x1x32xf32>
    %35 = vector.shape_cast %34 : vector<1x1x32xf32> to vector<1x32xf32>
    %36 = vector.broadcast %35 : vector<1x32xf32> to vector<16x32xf32>
    %37 = arith.addf %33, %36 : vector<16x32xf32>
    %c0_28 = arith.constant 0 : index
    %c0_29 = arith.constant 0 : index
    %c0_30 = arith.constant 0 : index
    %38 = vector.load %arg3[%c0_28, %c0_29, %c0_30] : memref<4x32x32xbf16, #tpu.memory_space<vmem>>, vector<1x32x32xbf16>
    %39 = vector.shape_cast %38 : vector<1x32x32xbf16> to vector<32x32xbf16>
    %c1_31 = arith.constant 1 : index
    %c0_32 = arith.constant 0 : index
    %c0_33 = arith.constant 0 : index
    %40 = vector.load %arg3[%c1_31, %c0_32, %c0_33] : memref<4x32x32xbf16, #tpu.memory_space<vmem>>, vector<1x32x32xbf16>
    %41 = vector.shape_cast %40 : vector<1x32x32xbf16> to vector<32x32xbf16>
    %c2_34 = arith.constant 2 : index
    %c0_35 = arith.constant 0 : index
    %c0_36 = arith.constant 0 : index
    %42 = vector.load %arg3[%c2_34, %c0_35, %c0_36] : memref<4x32x32xbf16, #tpu.memory_space<vmem>>, vector<1x32x32xbf16>
    %43 = vector.shape_cast %42 : vector<1x32x32xbf16> to vector<32x32xbf16>
    %c3_37 = arith.constant 3 : index
    %c0_38 = arith.constant 0 : index
    %c0_39 = arith.constant 0 : index
    %44 = vector.load %arg3[%c3_37, %c0_38, %c0_39] : memref<4x32x32xbf16, #tpu.memory_space<vmem>>, vector<1x32x32xbf16>
    %45 = vector.shape_cast %44 : vector<1x32x32xbf16> to vector<32x32xbf16>
    %c0_40 = arith.constant 0 : index
    %c0_41 = arith.constant 0 : index
    %c0_42 = arith.constant 0 : index
    %46 = vector.load %arg8[%c0_40, %c0_41, %c0_42] : memref<4x32x32xbf16, #tpu.memory_space<vmem>>, vector<1x32x32xbf16>
    %47 = vector.shape_cast %46 : vector<1x32x32xbf16> to vector<32x32xbf16>
    %c1_43 = arith.constant 1 : index
    %c0_44 = arith.constant 0 : index
    %c0_45 = arith.constant 0 : index
    %48 = vector.load %arg8[%c1_43, %c0_44, %c0_45] : memref<4x32x32xbf16, #tpu.memory_space<vmem>>, vector<1x32x32xbf16>
    %49 = vector.shape_cast %48 : vector<1x32x32xbf16> to vector<32x32xbf16>
    %c2_46 = arith.constant 2 : index
    %c0_47 = arith.constant 0 : index
    %c0_48 = arith.constant 0 : index
    %50 = vector.load %arg8[%c2_46, %c0_47, %c0_48] : memref<4x32x32xbf16, #tpu.memory_space<vmem>>, vector<1x32x32xbf16>
    %51 = vector.shape_cast %50 : vector<1x32x32xbf16> to vector<32x32xbf16>
    %c3_49 = arith.constant 3 : index
    %c0_50 = arith.constant 0 : index
    %c0_51 = arith.constant 0 : index
    %52 = vector.load %arg8[%c3_49, %c0_50, %c0_51] : memref<4x32x32xbf16, #tpu.memory_space<vmem>>, vector<1x32x32xbf16>
    %53 = vector.shape_cast %52 : vector<1x32x32xbf16> to vector<32x32xbf16>
    %c0_52 = arith.constant 0 : index
    %c0_53 = arith.constant 0 : index
    %c0_54 = arith.constant 0 : index
    %54 = vector.load %arg9[%c0_52, %c0_53, %c0_54] : memref<4x1x32xf32, #tpu.memory_space<vmem>>, vector<1x1x32xf32>
    %55 = vector.shape_cast %54 : vector<1x1x32xf32> to vector<1x32xf32>
    %c1_55 = arith.constant 1 : index
    %c0_56 = arith.constant 0 : index
    %c0_57 = arith.constant 0 : index
    %56 = vector.load %arg9[%c1_55, %c0_56, %c0_57] : memref<4x1x32xf32, #tpu.memory_space<vmem>>, vector<1x1x32xf32>
    %57 = vector.shape_cast %56 : vector<1x1x32xf32> to vector<1x32xf32>
    %c2_58 = arith.constant 2 : index
    %c0_59 = arith.constant 0 : index
    %c0_60 = arith.constant 0 : index
    %58 = vector.load %arg9[%c2_58, %c0_59, %c0_60] : memref<4x1x32xf32, #tpu.memory_space<vmem>>, vector<1x1x32xf32>
    %59 = vector.shape_cast %58 : vector<1x1x32xf32> to vector<1x32xf32>
    %c3_61 = arith.constant 3 : index
    %c0_62 = arith.constant 0 : index
    %c0_63 = arith.constant 0 : index
    %60 = vector.load %arg9[%c3_61, %c0_62, %c0_63] : memref<4x1x32xf32, #tpu.memory_space<vmem>>, vector<1x1x32xf32>
    %61 = vector.shape_cast %60 : vector<1x1x32xf32> to vector<1x32xf32>
    %c0_64 = arith.constant 0 : index
    %c0_65 = arith.constant 0 : index
    %62 = vector.load %arg5[%c0_64, %c0_65] : memref<2x32xf32, #tpu.memory_space<vmem>>, vector<2x32xf32>
    %c0_66 = arith.constant 0 : index
    %c0_67 = arith.constant 0 : index
    %63 = vector.load %arg10[%c0_66, %c0_67] : memref<2x32xf32, #tpu.memory_space<vmem>>, vector<2x32xf32>
    %c0_68 = arith.constant 0 : index
    %c0_69 = arith.constant 0 : index
    %64 = vector.load %arg6[%c0_68, %c0_69] : memref<2x32xf32, #tpu.memory_space<vmem>>, vector<2x32xf32>
    %c0_70 = arith.constant 0 : index
    %c0_71 = arith.constant 0 : index
    %65 = vector.load %arg11[%c0_70, %c0_71] : memref<2x32xf32, #tpu.memory_space<vmem>>, vector<2x32xf32>
    %66 = vector.extract_strided_slice %16 {offsets = [0, 0], sizes = [2, 32], strides = [1, 1]} : vector<16x32xf32> to vector<2x32xf32>
    %67 = vector.extract_strided_slice %23 {offsets = [0, 0], sizes = [2, 32], strides = [1, 1]} : vector<16x32xf32> to vector<2x32xf32>
    %68 = vector.extract_strided_slice %30 {offsets = [0, 0], sizes = [2, 32], strides = [1, 1]} : vector<16x32xf32> to vector<2x32xf32>
    %69 = vector.extract_strided_slice %37 {offsets = [0, 0], sizes = [2, 32], strides = [1, 1]} : vector<16x32xf32> to vector<2x32xf32>
    %70 = arith.truncf %62 : vector<2x32xf32> to vector<2x32xbf16>
    %cst_72 = arith.constant dense<0.000000e+00> : vector<2x32xf32>
    %71 = tpu.matmul %70, %39, %cst_72 {dimension_numbers = #tpu.dot_dimension_numbers<[1], [0], [0], [1], [0, 0, 1, 1], [], []>} : vector<2x32xbf16>, vector<32x32xbf16>, vector<2x32xf32> -> vector<2x32xf32>
    %72 = arith.addf %66, %71 : vector<2x32xf32>
    %cst_73 = arith.constant dense<0.000000e+00> : vector<2x32xf32>
    %73 = tpu.matmul %70, %41, %cst_73 {dimension_numbers = #tpu.dot_dimension_numbers<[1], [0], [0], [1], [0, 0, 1, 1], [], []>} : vector<2x32xbf16>, vector<32x32xbf16>, vector<2x32xf32> -> vector<2x32xf32>
    %74 = arith.addf %67, %73 : vector<2x32xf32>
    %cst_74 = arith.constant dense<0.000000e+00> : vector<2x32xf32>
    %75 = tpu.matmul %70, %43, %cst_74 {dimension_numbers = #tpu.dot_dimension_numbers<[1], [0], [0], [1], [0, 0, 1, 1], [], []>} : vector<2x32xbf16>, vector<32x32xbf16>, vector<2x32xf32> -> vector<2x32xf32>
    %76 = arith.addf %68, %75 : vector<2x32xf32>
    %cst_75 = arith.constant dense<0.000000e+00> : vector<2x32xf32>
    %77 = tpu.matmul %70, %45, %cst_75 {dimension_numbers = #tpu.dot_dimension_numbers<[1], [0], [0], [1], [0, 0, 1, 1], [], []>} : vector<2x32xbf16>, vector<32x32xbf16>, vector<2x32xf32> -> vector<2x32xf32>
    %78 = arith.addf %69, %77 : vector<2x32xf32>
    %cst_76 = arith.constant 5.000000e-01 : f32
    %79 = vector.broadcast %cst_76 : f32 to vector<2x32xf32>
    %80 = arith.mulf %79, %72 : vector<2x32xf32>
    %81 = math.tanh %80 : vector<2x32xf32>
    %cst_77 = arith.constant 5.000000e-01 : f32
    %82 = vector.broadcast %cst_77 : f32 to vector<2x32xf32>
    %83 = arith.mulf %82, %81 : vector<2x32xf32>
    %cst_78 = arith.constant 5.000000e-01 : f32
    %84 = vector.broadcast %cst_78 : f32 to vector<2x32xf32>
    %85 = arith.addf %83, %84 : vector<2x32xf32>
    %cst_79 = arith.constant 5.000000e-01 : f32
    %86 = vector.broadcast %cst_79 : f32 to vector<2x32xf32>
    %87 = arith.mulf %86, %74 : vector<2x32xf32>
    %88 = math.tanh %87 : vector<2x32xf32>
    %cst_80 = arith.constant 5.000000e-01 : f32
    %89 = vector.broadcast %cst_80 : f32 to vector<2x32xf32>
    %90 = arith.mulf %89, %88 : vector<2x32xf32>
    %cst_81 = arith.constant 5.000000e-01 : f32
    %91 = vector.broadcast %cst_81 : f32 to vector<2x32xf32>
    %92 = arith.addf %90, %91 : vector<2x32xf32>
    %cst_82 = arith.constant 5.000000e-01 : f32
    %93 = vector.broadcast %cst_82 : f32 to vector<2x32xf32>
    %94 = arith.mulf %93, %78 : vector<2x32xf32>
    %95 = math.tanh %94 : vector<2x32xf32>
    %cst_83 = arith.constant 5.000000e-01 : f32
    %96 = vector.broadcast %cst_83 : f32 to vector<2x32xf32>
    %97 = arith.mulf %96, %95 : vector<2x32xf32>
    %cst_84 = arith.constant 5.000000e-01 : f32
    %98 = vector.broadcast %cst_84 : f32 to vector<2x32xf32>
    %99 = arith.addf %97, %98 : vector<2x32xf32>
    %100 = math.tanh %76 : vector<2x32xf32>
    %101 = arith.mulf %92, %64 : vector<2x32xf32>
    %102 = arith.mulf %85, %100 : vector<2x32xf32>
    %103 = arith.addf %101, %102 : vector<2x32xf32>
    %104 = math.tanh %103 : vector<2x32xf32>
    %105 = arith.mulf %99, %104 : vector<2x32xf32>
    %106 = arith.truncf %105 : vector<2x32xf32> to vector<2x32xbf16>
    %c0_85 = arith.constant 0 : index
    %c0_86 = arith.constant 0 : index
    %c0_87 = arith.constant 0 : index
    %107 = vector.load %arg7[%c0_85, %c0_86, %c0_87] : memref<4x32x32xbf16, #tpu.memory_space<vmem>>, vector<1x32x32xbf16>
    %108 = vector.shape_cast %107 : vector<1x32x32xbf16> to vector<32x32xbf16>
    %cst_88 = arith.constant dense<0.000000e+00> : vector<2x32xf32>
    %109 = tpu.matmul %106, %108, %cst_88 {dimension_numbers = #tpu.dot_dimension_numbers<[1], [0], [0], [1], [0, 0, 1, 1], [], []>} : vector<2x32xbf16>, vector<32x32xbf16>, vector<2x32xf32> -> vector<2x32xf32>
    %110 = vector.broadcast %55 : vector<1x32xf32> to vector<2x32xf32>
    %111 = arith.addf %109, %110 : vector<2x32xf32>
    %c1_89 = arith.constant 1 : index
    %c0_90 = arith.constant 0 : index
    %c0_91 = arith.constant 0 : index
    %112 = vector.load %arg7[%c1_89, %c0_90, %c0_91] : memref<4x32x32xbf16, #tpu.memory_space<vmem>>, vector<1x32x32xbf16>
    %113 = vector.shape_cast %112 : vector<1x32x32xbf16> to vector<32x32xbf16>
    %cst_92 = arith.constant dense<0.000000e+00> : vector<2x32xf32>
    %114 = tpu.matmul %106, %113, %cst_92 {dimension_numbers = #tpu.dot_dimension_numbers<[1], [0], [0], [1], [0, 0, 1, 1], [], []>} : vector<2x32xbf16>, vector<32x32xbf16>, vector<2x32xf32> -> vector<2x32xf32>
    %115 = vector.broadcast %57 : vector<1x32xf32> to vector<2x32xf32>
    %116 = arith.addf %114, %115 : vector<2x32xf32>
    %c2_93 = arith.constant 2 : index
    %c0_94 = arith.constant 0 : index
    %c0_95 = arith.constant 0 : index
    %117 = vector.load %arg7[%c2_93, %c0_94, %c0_95] : memref<4x32x32xbf16, #tpu.memory_space<vmem>>, vector<1x32x32xbf16>
    %118 = vector.shape_cast %117 : vector<1x32x32xbf16> to vector<32x32xbf16>
    %cst_96 = arith.constant dense<0.000000e+00> : vector<2x32xf32>
    %119 = tpu.matmul %106, %118, %cst_96 {dimension_numbers = #tpu.dot_dimension_numbers<[1], [0], [0], [1], [0, 0, 1, 1], [], []>} : vector<2x32xbf16>, vector<32x32xbf16>, vector<2x32xf32> -> vector<2x32xf32>
    %120 = vector.broadcast %59 : vector<1x32xf32> to vector<2x32xf32>
    %121 = arith.addf %119, %120 : vector<2x32xf32>
    %c3_97 = arith.constant 3 : index
    %c0_98 = arith.constant 0 : index
    %c0_99 = arith.constant 0 : index
    %122 = vector.load %arg7[%c3_97, %c0_98, %c0_99] : memref<4x32x32xbf16, #tpu.memory_space<vmem>>, vector<1x32x32xbf16>
    %123 = vector.shape_cast %122 : vector<1x32x32xbf16> to vector<32x32xbf16>
    %cst_100 = arith.constant dense<0.000000e+00> : vector<2x32xf32>
    %124 = tpu.matmul %106, %123, %cst_100 {dimension_numbers = #tpu.dot_dimension_numbers<[1], [0], [0], [1], [0, 0, 1, 1], [], []>} : vector<2x32xbf16>, vector<32x32xbf16>, vector<2x32xf32> -> vector<2x32xf32>
    %125 = vector.broadcast %61 : vector<1x32xf32> to vector<2x32xf32>
    %126 = arith.addf %124, %125 : vector<2x32xf32>
    %127 = arith.truncf %63 : vector<2x32xf32> to vector<2x32xbf16>
    %cst_101 = arith.constant dense<0.000000e+00> : vector<2x32xf32>
    %128 = tpu.matmul %127, %47, %cst_101 {dimension_numbers = #tpu.dot_dimension_numbers<[1], [0], [0], [1], [0, 0, 1, 1], [], []>} : vector<2x32xbf16>, vector<32x32xbf16>, vector<2x32xf32> -> vector<2x32xf32>
    %129 = arith.addf %111, %128 : vector<2x32xf32>
    %cst_102 = arith.constant dense<0.000000e+00> : vector<2x32xf32>
    %130 = tpu.matmul %127, %49, %cst_102 {dimension_numbers = #tpu.dot_dimension_numbers<[1], [0], [0], [1], [0, 0, 1, 1], [], []>} : vector<2x32xbf16>, vector<32x32xbf16>, vector<2x32xf32> -> vector<2x32xf32>
    %131 = arith.addf %116, %130 : vector<2x32xf32>
    %cst_103 = arith.constant dense<0.000000e+00> : vector<2x32xf32>
    %132 = tpu.matmul %127, %51, %cst_103 {dimension_numbers = #tpu.dot_dimension_numbers<[1], [0], [0], [1], [0, 0, 1, 1], [], []>} : vector<2x32xbf16>, vector<32x32xbf16>, vector<2x32xf32> -> vector<2x32xf32>
    %133 = arith.addf %121, %132 : vector<2x32xf32>
    %cst_104 = arith.constant dense<0.000000e+00> : vector<2x32xf32>
    %134 = tpu.matmul %127, %53, %cst_104 {dimension_numbers = #tpu.dot_dimension_numbers<[1], [0], [0], [1], [0, 0, 1, 1], [], []>} : vector<2x32xbf16>, vector<32x32xbf16>, vector<2x32xf32> -> vector<2x32xf32>
    %135 = arith.addf %126, %134 : vector<2x32xf32>
    %cst_105 = arith.constant 5.000000e-01 : f32
    %136 = vector.broadcast %cst_105 : f32 to vector<2x32xf32>
    %137 = arith.mulf %136, %129 : vector<2x32xf32>
    %138 = math.tanh %137 : vector<2x32xf32>
    %cst_106 = arith.constant 5.000000e-01 : f32
    %139 = vector.broadcast %cst_106 : f32 to vector<2x32xf32>
    %140 = arith.mulf %139, %138 : vector<2x32xf32>
    %cst_107 = arith.constant 5.000000e-01 : f32
    %141 = vector.broadcast %cst_107 : f32 to vector<2x32xf32>
    %142 = arith.addf %140, %141 : vector<2x32xf32>
    %cst_108 = arith.constant 5.000000e-01 : f32
    %143 = vector.broadcast %cst_108 : f32 to vector<2x32xf32>
    %144 = arith.mulf %143, %131 : vector<2x32xf32>
    %145 = math.tanh %144 : vector<2x32xf32>
    %cst_109 = arith.constant 5.000000e-01 : f32
    %146 = vector.broadcast %cst_109 : f32 to vector<2x32xf32>
    %147 = arith.mulf %146, %145 : vector<2x32xf32>
    %cst_110 = arith.constant 5.000000e-01 : f32
    %148 = vector.broadcast %cst_110 : f32 to vector<2x32xf32>
    %149 = arith.addf %147, %148 : vector<2x32xf32>
    %cst_111 = arith.constant 5.000000e-01 : f32
    %150 = vector.broadcast %cst_111 : f32 to vector<2x32xf32>
    %151 = arith.mulf %150, %135 : vector<2x32xf32>
    %152 = math.tanh %151 : vector<2x32xf32>
    %cst_112 = arith.constant 5.000000e-01 : f32
    %153 = vector.broadcast %cst_112 : f32 to vector<2x32xf32>
    %154 = arith.mulf %153, %152 : vector<2x32xf32>
    %cst_113 = arith.constant 5.000000e-01 : f32
    %155 = vector.broadcast %cst_113 : f32 to vector<2x32xf32>
    %156 = arith.addf %154, %155 : vector<2x32xf32>
    %157 = math.tanh %133 : vector<2x32xf32>
    %158 = arith.mulf %149, %65 : vector<2x32xf32>
    %159 = arith.mulf %142, %157 : vector<2x32xf32>
    %160 = arith.addf %158, %159 : vector<2x32xf32>
    %161 = math.tanh %160 : vector<2x32xf32>
    %162 = arith.mulf %156, %161 : vector<2x32xf32>
    %c0_114 = arith.constant 0 : index
    %c0_115 = arith.constant 0 : index
    %163 = vector.load %arg26[%c0_114, %c0_115] : memref<16x32xf32, #tpu.memory_space<vmem>>, vector<2x32xf32>
    tpu.vector_store %arg26[%c0_114, %c0_115], %162 {strides = array<i32>} : memref<16x32xf32, #tpu.memory_space<vmem>>, vector<2x32xf32>,
    %164 = vector.extract_strided_slice %16 {offsets = [2, 0], sizes = [2, 32], strides = [1, 1]} : vector<16x32xf32> to vector<2x32xf32>
    %165 = vector.extract_strided_slice %23 {offsets = [2, 0], sizes = [2, 32], strides = [1, 1]} : vector<16x32xf32> to vector<2x32xf32>
    %166 = vector.extract_strided_slice %30 {offsets = [2, 0], sizes = [2, 32], strides = [1, 1]} : vector<16x32xf32> to vector<2x32xf32>
    %167 = vector.extract_strided_slice %37 {offsets = [2, 0], sizes = [2, 32], strides = [1, 1]} : vector<16x32xf32> to vector<2x32xf32>
    %168 = arith.truncf %105 : vector<2x32xf32> to vector<2x32xbf16>
    %cst_116 = arith.constant dense<0.000000e+00> : vector<2x32xf32>
    %169 = tpu.matmul %168, %39, %cst_116 {dimension_numbers = #tpu.dot_dimension_numbers<[1], [0], [0], [1], [0, 0, 1, 1], [], []>} : vector<2x32xbf16>, vector<32x32xbf16>, vector<2x32xf32> -> vector<2x32xf32>
    %170 = arith.addf %164, %169 : vector<2x32xf32>
    %cst_117 = arith.constant dense<0.000000e+00> : vector<2x32xf32>
    %171 = tpu.matmul %168, %41, %cst_117 {dimension_numbers = #tpu.dot_dimension_numbers<[1], [0], [0], [1], [0, 0, 1, 1], [], []>} : vector<2x32xbf16>, vector<32x32xbf16>, vector<2x32xf32> -> vector<2x32xf32>
    %172 = arith.addf %165, %171 : vector<2x32xf32>
    %cst_118 = arith.constant dense<0.000000e+00> : vector<2x32xf32>
    %173 = tpu.matmul %168, %43, %cst_118 {dimension_numbers = #tpu.dot_dimension_numbers<[1], [0], [0], [1], [0, 0, 1, 1], [], []>} : vector<2x32xbf16>, vector<32x32xbf16>, vector<2x32xf32> -> vector<2x32xf32>
    %174 = arith.addf %166, %173 : vector<2x32xf32>
    %cst_119 = arith.constant dense<0.000000e+00> : vector<2x32xf32>
    %175 = tpu.matmul %168, %45, %cst_119 {dimension_numbers = #tpu.dot_dimension_numbers<[1], [0], [0], [1], [0, 0, 1, 1], [], []>} : vector<2x32xbf16>, vector<32x32xbf16>, vector<2x32xf32> -> vector<2x32xf32>
    %176 = arith.addf %167, %175 : vector<2x32xf32>
    %cst_120 = arith.constant 5.000000e-01 : f32
    %177 = vector.broadcast %cst_120 : f32 to vector<2x32xf32>
    %178 = arith.mulf %177, %170 : vector<2x32xf32>
    %179 = math.tanh %178 : vector<2x32xf32>
    %cst_121 = arith.constant 5.000000e-01 : f32
    %180 = vector.broadcast %cst_121 : f32 to vector<2x32xf32>
    %181 = arith.mulf %180, %179 : vector<2x32xf32>
    %cst_122 = arith.constant 5.000000e-01 : f32
    %182 = vector.broadcast %cst_122 : f32 to vector<2x32xf32>
    %183 = arith.addf %181, %182 : vector<2x32xf32>
    %cst_123 = arith.constant 5.000000e-01 : f32
    %184 = vector.broadcast %cst_123 : f32 to vector<2x32xf32>
    %185 = arith.mulf %184, %172 : vector<2x32xf32>
    %186 = math.tanh %185 : vector<2x32xf32>
    %cst_124 = arith.constant 5.000000e-01 : f32
    %187 = vector.broadcast %cst_124 : f32 to vector<2x32xf32>
    %188 = arith.mulf %187, %186 : vector<2x32xf32>
    %cst_125 = arith.constant 5.000000e-01 : f32
    %189 = vector.broadcast %cst_125 : f32 to vector<2x32xf32>
    %190 = arith.addf %188, %189 : vector<2x32xf32>
    %cst_126 = arith.constant 5.000000e-01 : f32
    %191 = vector.broadcast %cst_126 : f32 to vector<2x32xf32>
    %192 = arith.mulf %191, %176 : vector<2x32xf32>
    %193 = math.tanh %192 : vector<2x32xf32>
    %cst_127 = arith.constant 5.000000e-01 : f32
    %194 = vector.broadcast %cst_127 : f32 to vector<2x32xf32>
    %195 = arith.mulf %194, %193 : vector<2x32xf32>
    %cst_128 = arith.constant 5.000000e-01 : f32
    %196 = vector.broadcast %cst_128 : f32 to vector<2x32xf32>
    %197 = arith.addf %195, %196 : vector<2x32xf32>
    %198 = math.tanh %174 : vector<2x32xf32>
    %199 = arith.mulf %190, %103 : vector<2x32xf32>
    %200 = arith.mulf %183, %198 : vector<2x32xf32>
    %201 = arith.addf %199, %200 : vector<2x32xf32>
    %202 = math.tanh %201 : vector<2x32xf32>
    %203 = arith.mulf %197, %202 : vector<2x32xf32>
    %204 = arith.truncf %203 : vector<2x32xf32> to vector<2x32xbf16>
    %c0_129 = arith.constant 0 : index
    %c0_130 = arith.constant 0 : index
    %c0_131 = arith.constant 0 : index
    %205 = vector.load %arg7[%c0_129, %c0_130, %c0_131] : memref<4x32x32xbf16, #tpu.memory_space<vmem>>, vector<1x32x32xbf16>
    %206 = vector.shape_cast %205 : vector<1x32x32xbf16> to vector<32x32xbf16>
    %cst_132 = arith.constant dense<0.000000e+00> : vector<2x32xf32>
    %207 = tpu.matmul %204, %206, %cst_132 {dimension_numbers = #tpu.dot_dimension_numbers<[1], [0], [0], [1], [0, 0, 1, 1], [], []>} : vector<2x32xbf16>, vector<32x32xbf16>, vector<2x32xf32> -> vector<2x32xf32>
    %208 = vector.broadcast %55 : vector<1x32xf32> to vector<2x32xf32>
    %209 = arith.addf %207, %208 : vector<2x32xf32>
    %c1_133 = arith.constant 1 : index
    %c0_134 = arith.constant 0 : index
    %c0_135 = arith.constant 0 : index
    %210 = vector.load %arg7[%c1_133, %c0_134, %c0_135] : memref<4x32x32xbf16, #tpu.memory_space<vmem>>, vector<1x32x32xbf16>
    %211 = vector.shape_cast %210 : vector<1x32x32xbf16> to vector<32x32xbf16>
    %cst_136 = arith.constant dense<0.000000e+00> : vector<2x32xf32>
    %212 = tpu.matmul %204, %211, %cst_136 {dimension_numbers = #tpu.dot_dimension_numbers<[1], [0], [0], [1], [0, 0, 1, 1], [], []>} : vector<2x32xbf16>, vector<32x32xbf16>, vector<2x32xf32> -> vector<2x32xf32>
    %213 = vector.broadcast %57 : vector<1x32xf32> to vector<2x32xf32>
    %214 = arith.addf %212, %213 : vector<2x32xf32>
    %c2_137 = arith.constant 2 : index
    %c0_138 = arith.constant 0 : index
    %c0_139 = arith.constant 0 : index
    %215 = vector.load %arg7[%c2_137, %c0_138, %c0_139] : memref<4x32x32xbf16, #tpu.memory_space<vmem>>, vector<1x32x32xbf16>
    %216 = vector.shape_cast %215 : vector<1x32x32xbf16> to vector<32x32xbf16>
    %cst_140 = arith.constant dense<0.000000e+00> : vector<2x32xf32>
    %217 = tpu.matmul %204, %216, %cst_140 {dimension_numbers = #tpu.dot_dimension_numbers<[1], [0], [0], [1], [0, 0, 1, 1], [], []>} : vector<2x32xbf16>, vector<32x32xbf16>, vector<2x32xf32> -> vector<2x32xf32>
    %218 = vector.broadcast %59 : vector<1x32xf32> to vector<2x32xf32>
    %219 = arith.addf %217, %218 : vector<2x32xf32>
    %c3_141 = arith.constant 3 : index
    %c0_142 = arith.constant 0 : index
    %c0_143 = arith.constant 0 : index
    %220 = vector.load %arg7[%c3_141, %c0_142, %c0_143] : memref<4x32x32xbf16, #tpu.memory_space<vmem>>, vector<1x32x32xbf16>
    %221 = vector.shape_cast %220 : vector<1x32x32xbf16> to vector<32x32xbf16>
    %cst_144 = arith.constant dense<0.000000e+00> : vector<2x32xf32>
    %222 = tpu.matmul %204, %221, %cst_144 {dimension_numbers = #tpu.dot_dimension_numbers<[1], [0], [0], [1], [0, 0, 1, 1], [], []>} : vector<2x32xbf16>, vector<32x32xbf16>, vector<2x32xf32> -> vector<2x32xf32>
    %223 = vector.broadcast %61 : vector<1x32xf32> to vector<2x32xf32>
    %224 = arith.addf %222, %223 : vector<2x32xf32>
    %225 = arith.truncf %162 : vector<2x32xf32> to vector<2x32xbf16>
    %cst_145 = arith.constant dense<0.000000e+00> : vector<2x32xf32>
    %226 = tpu.matmul %225, %47, %cst_145 {dimension_numbers = #tpu.dot_dimension_numbers<[1], [0], [0], [1], [0, 0, 1, 1], [], []>} : vector<2x32xbf16>, vector<32x32xbf16>, vector<2x32xf32> -> vector<2x32xf32>
    %227 = arith.addf %209, %226 : vector<2x32xf32>
    %cst_146 = arith.constant dense<0.000000e+00> : vector<2x32xf32>
    %228 = tpu.matmul %225, %49, %cst_146 {dimension_numbers = #tpu.dot_dimension_numbers<[1], [0], [0], [1], [0, 0, 1, 1], [], []>} : vector<2x32xbf16>, vector<32x32xbf16>, vector<2x32xf32> -> vector<2x32xf32>
    %229 = arith.addf %214, %228 : vector<2x32xf32>
    %cst_147 = arith.constant dense<0.000000e+00> : vector<2x32xf32>
    %230 = tpu.matmul %225, %51, %cst_147 {dimension_numbers = #tpu.dot_dimension_numbers<[1], [0], [0], [1], [0, 0, 1, 1], [], []>} : vector<2x32xbf16>, vector<32x32xbf16>, vector<2x32xf32> -> vector<2x32xf32>
    %231 = arith.addf %219, %230 : vector<2x32xf32>
    %cst_148 = arith.constant dense<0.000000e+00> : vector<2x32xf32>
    %232 = tpu.matmul %225, %53, %cst_148 {dimension_numbers = #tpu.dot_dimension_numbers<[1], [0], [0], [1], [0, 0, 1, 1], [], []>} : vector<2x32xbf16>, vector<32x32xbf16>, vector<2x32xf32> -> vector<2x32xf32>
    %233 = arith.addf %224, %232 : vector<2x32xf32>
    %cst_149 = arith.constant 5.000000e-01 : f32
    %234 = vector.broadcast %cst_149 : f32 to vector<2x32xf32>
    %235 = arith.mulf %234, %227 : vector<2x32xf32>
    %236 = math.tanh %235 : vector<2x32xf32>
    %cst_150 = arith.constant 5.000000e-01 : f32
    %237 = vector.broadcast %cst_150 : f32 to vector<2x32xf32>
    %238 = arith.mulf %237, %236 : vector<2x32xf32>
    %cst_151 = arith.constant 5.000000e-01 : f32
    %239 = vector.broadcast %cst_151 : f32 to vector<2x32xf32>
    %240 = arith.addf %238, %239 : vector<2x32xf32>
    %cst_152 = arith.constant 5.000000e-01 : f32
    %241 = vector.broadcast %cst_152 : f32 to vector<2x32xf32>
    %242 = arith.mulf %241, %229 : vector<2x32xf32>
    %243 = math.tanh %242 : vector<2x32xf32>
    %cst_153 = arith.constant 5.000000e-01 : f32
    %244 = vector.broadcast %cst_153 : f32 to vector<2x32xf32>
    %245 = arith.mulf %244, %243 : vector<2x32xf32>
    %cst_154 = arith.constant 5.000000e-01 : f32
    %246 = vector.broadcast %cst_154 : f32 to vector<2x32xf32>
    %247 = arith.addf %245, %246 : vector<2x32xf32>
    %cst_155 = arith.constant 5.000000e-01 : f32
    %248 = vector.broadcast %cst_155 : f32 to vector<2x32xf32>
    %249 = arith.mulf %248, %233 : vector<2x32xf32>
    %250 = math.tanh %249 : vector<2x32xf32>
    %cst_156 = arith.constant 5.000000e-01 : f32
    %251 = vector.broadcast %cst_156 : f32 to vector<2x32xf32>
    %252 = arith.mulf %251, %250 : vector<2x32xf32>
    %cst_157 = arith.constant 5.000000e-01 : f32
    %253 = vector.broadcast %cst_157 : f32 to vector<2x32xf32>
    %254 = arith.addf %252, %253 : vector<2x32xf32>
    %255 = math.tanh %231 : vector<2x32xf32>
    %256 = arith.mulf %247, %160 : vector<2x32xf32>
    %257 = arith.mulf %240, %255 : vector<2x32xf32>
    %258 = arith.addf %256, %257 : vector<2x32xf32>
    %259 = math.tanh %258 : vector<2x32xf32>
    %260 = arith.mulf %254, %259 : vector<2x32xf32>
    %c2_158 = arith.constant 2 : index
    %c0_159 = arith.constant 0 : index
    %261 = vector.load %arg26[%c2_158, %c0_159] : memref<16x32xf32, #tpu.memory_space<vmem>>, vector<2x32xf32>
    tpu.vector_store %arg26[%c2_158, %c0_159], %260 {strides = array<i32>} : memref<16x32xf32, #tpu.memory_space<vmem>>, vector<2x32xf32>,
    %262 = vector.extract_strided_slice %16 {offsets = [4, 0], sizes = [2, 32], strides = [1, 1]} : vector<16x32xf32> to vector<2x32xf32>
    %263 = vector.extract_strided_slice %23 {offsets = [4, 0], sizes = [2, 32], strides = [1, 1]} : vector<16x32xf32> to vector<2x32xf32>
    %264 = vector.extract_strided_slice %30 {offsets = [4, 0], sizes = [2, 32], strides = [1, 1]} : vector<16x32xf32> to vector<2x32xf32>
    %265 = vector.extract_strided_slice %37 {offsets = [4, 0], sizes = [2, 32], strides = [1, 1]} : vector<16x32xf32> to vector<2x32xf32>
    %266 = arith.truncf %203 : vector<2x32xf32> to vector<2x32xbf16>
    %cst_160 = arith.constant dense<0.000000e+00> : vector<2x32xf32>
    %267 = tpu.matmul %266, %39, %cst_160 {dimension_numbers = #tpu.dot_dimension_numbers<[1], [0], [0], [1], [0, 0, 1, 1], [], []>} : vector<2x32xbf16>, vector<32x32xbf16>, vector<2x32xf32> -> vector<2x32xf32>
    %268 = arith.addf %262, %267 : vector<2x32xf32>
    %cst_161 = arith.constant dense<0.000000e+00> : vector<2x32xf32>
    %269 = tpu.matmul %266, %41, %cst_161 {dimension_numbers = #tpu.dot_dimension_numbers<[1], [0], [0], [1], [0, 0, 1, 1], [], []>} : vector<2x32xbf16>, vector<32x32xbf16>, vector<2x32xf32> -> vector<2x32xf32>
    %270 = arith.addf %263, %269 : vector<2x32xf32>
    %cst_162 = arith.constant dense<0.000000e+00> : vector<2x32xf32>
    %271 = tpu.matmul %266, %43, %cst_162 {dimension_numbers = #tpu.dot_dimension_numbers<[1], [0], [0], [1], [0, 0, 1, 1], [], []>} : vector<2x32xbf16>, vector<32x32xbf16>, vector<2x32xf32> -> vector<2x32xf32>
    %272 = arith.addf %264, %271 : vector<2x32xf32>
    %cst_163 = arith.constant dense<0.000000e+00> : vector<2x32xf32>
    %273 = tpu.matmul %266, %45, %cst_163 {dimension_numbers = #tpu.dot_dimension_numbers<[1], [0], [0], [1], [0, 0, 1, 1], [], []>} : vector<2x32xbf16>, vector<32x32xbf16>, vector<2x32xf32> -> vector<2x32xf32>
    %274 = arith.addf %265, %273 : vector<2x32xf32>
    %cst_164 = arith.constant 5.000000e-01 : f32
    %275 = vector.broadcast %cst_164 : f32 to vector<2x32xf32>
    %276 = arith.mulf %275, %268 : vector<2x32xf32>
    %277 = math.tanh %276 : vector<2x32xf32>
    %cst_165 = arith.constant 5.000000e-01 : f32
    %278 = vector.broadcast %cst_165 : f32 to vector<2x32xf32>
    %279 = arith.mulf %278, %277 : vector<2x32xf32>
    %cst_166 = arith.constant 5.000000e-01 : f32
    %280 = vector.broadcast %cst_166 : f32 to vector<2x32xf32>
    %281 = arith.addf %279, %280 : vector<2x32xf32>
    %cst_167 = arith.constant 5.000000e-01 : f32
    %282 = vector.broadcast %cst_167 : f32 to vector<2x32xf32>
    %283 = arith.mulf %282, %270 : vector<2x32xf32>
    %284 = math.tanh %283 : vector<2x32xf32>
    %cst_168 = arith.constant 5.000000e-01 : f32
    %285 = vector.broadcast %cst_168 : f32 to vector<2x32xf32>
    %286 = arith.mulf %285, %284 : vector<2x32xf32>
    %cst_169 = arith.constant 5.000000e-01 : f32
    %287 = vector.broadcast %cst_169 : f32 to vector<2x32xf32>
    %288 = arith.addf %286, %287 : vector<2x32xf32>
    %cst_170 = arith.constant 5.000000e-01 : f32
    %289 = vector.broadcast %cst_170 : f32 to vector<2x32xf32>
    %290 = arith.mulf %289, %274 : vector<2x32xf32>
    %291 = math.tanh %290 : vector<2x32xf32>
    %cst_171 = arith.constant 5.000000e-01 : f32
    %292 = vector.broadcast %cst_171 : f32 to vector<2x32xf32>
    %293 = arith.mulf %292, %291 : vector<2x32xf32>
    %cst_172 = arith.constant 5.000000e-01 : f32
    %294 = vector.broadcast %cst_172 : f32 to vector<2x32xf32>
    %295 = arith.addf %293, %294 : vector<2x32xf32>
    %296 = math.tanh %272 : vector<2x32xf32>
    %297 = arith.mulf %288, %201 : vector<2x32xf32>
    %298 = arith.mulf %281, %296 : vector<2x32xf32>
    %299 = arith.addf %297, %298 : vector<2x32xf32>
    %300 = math.tanh %299 : vector<2x32xf32>
    %301 = arith.mulf %295, %300 : vector<2x32xf32>
    %302 = arith.truncf %301 : vector<2x32xf32> to vector<2x32xbf16>
    %c0_173 = arith.constant 0 : index
    %c0_174 = arith.constant 0 : index
    %c0_175 = arith.constant 0 : index
    %303 = vector.load %arg7[%c0_173, %c0_174, %c0_175] : memref<4x32x32xbf16, #tpu.memory_space<vmem>>, vector<1x32x32xbf16>
    %304 = vector.shape_cast %303 : vector<1x32x32xbf16> to vector<32x32xbf16>
    %cst_176 = arith.constant dense<0.000000e+00> : vector<2x32xf32>
    %305 = tpu.matmul %302, %304, %cst_176 {dimension_numbers = #tpu.dot_dimension_numbers<[1], [0], [0], [1], [0, 0, 1, 1], [], []>} : vector<2x32xbf16>, vector<32x32xbf16>, vector<2x32xf32> -> vector<2x32xf32>
    %306 = vector.broadcast %55 : vector<1x32xf32> to vector<2x32xf32>
    %307 = arith.addf %305, %306 : vector<2x32xf32>
    %c1_177 = arith.constant 1 : index
    %c0_178 = arith.constant 0 : index
    %c0_179 = arith.constant 0 : index
    %308 = vector.load %arg7[%c1_177, %c0_178, %c0_179] : memref<4x32x32xbf16, #tpu.memory_space<vmem>>, vector<1x32x32xbf16>
    %309 = vector.shape_cast %308 : vector<1x32x32xbf16> to vector<32x32xbf16>
    %cst_180 = arith.constant dense<0.000000e+00> : vector<2x32xf32>
    %310 = tpu.matmul %302, %309, %cst_180 {dimension_numbers = #tpu.dot_dimension_numbers<[1], [0], [0], [1], [0, 0, 1, 1], [], []>} : vector<2x32xbf16>, vector<32x32xbf16>, vector<2x32xf32> -> vector<2x32xf32>
    %311 = vector.broadcast %57 : vector<1x32xf32> to vector<2x32xf32>
    %312 = arith.addf %310, %311 : vector<2x32xf32>
    %c2_181 = arith.constant 2 : index
    %c0_182 = arith.constant 0 : index
    %c0_183 = arith.constant 0 : index
    %313 = vector.load %arg7[%c2_181, %c0_182, %c0_183] : memref<4x32x32xbf16, #tpu.memory_space<vmem>>, vector<1x32x32xbf16>
    %314 = vector.shape_cast %313 : vector<1x32x32xbf16> to vector<32x32xbf16>
    %cst_184 = arith.constant dense<0.000000e+00> : vector<2x32xf32>
    %315 = tpu.matmul %302, %314, %cst_184 {dimension_numbers = #tpu.dot_dimension_numbers<[1], [0], [0], [1], [0, 0, 1, 1], [], []>} : vector<2x32xbf16>, vector<32x32xbf16>, vector<2x32xf32> -> vector<2x32xf32>
    %316 = vector.broadcast %59 : vector<1x32xf32> to vector<2x32xf32>
    %317 = arith.addf %315, %316 : vector<2x32xf32>
    %c3_185 = arith.constant 3 : index
    %c0_186 = arith.constant 0 : index
    %c0_187 = arith.constant 0 : index
    %318 = vector.load %arg7[%c3_185, %c0_186, %c0_187] : memref<4x32x32xbf16, #tpu.memory_space<vmem>>, vector<1x32x32xbf16>
    %319 = vector.shape_cast %318 : vector<1x32x32xbf16> to vector<32x32xbf16>
    %cst_188 = arith.constant dense<0.000000e+00> : vector<2x32xf32>
    %320 = tpu.matmul %302, %319, %cst_188 {dimension_numbers = #tpu.dot_dimension_numbers<[1], [0], [0], [1], [0, 0, 1, 1], [], []>} : vector<2x32xbf16>, vector<32x32xbf16>, vector<2x32xf32> -> vector<2x32xf32>
    %321 = vector.broadcast %61 : vector<1x32xf32> to vector<2x32xf32>
    %322 = arith.addf %320, %321 : vector<2x32xf32>
    %323 = arith.truncf %260 : vector<2x32xf32> to vector<2x32xbf16>
    %cst_189 = arith.constant dense<0.000000e+00> : vector<2x32xf32>
    %324 = tpu.matmul %323, %47, %cst_189 {dimension_numbers = #tpu.dot_dimension_numbers<[1], [0], [0], [1], [0, 0, 1, 1], [], []>} : vector<2x32xbf16>, vector<32x32xbf16>, vector<2x32xf32> -> vector<2x32xf32>
    %325 = arith.addf %307, %324 : vector<2x32xf32>
    %cst_190 = arith.constant dense<0.000000e+00> : vector<2x32xf32>
    %326 = tpu.matmul %323, %49, %cst_190 {dimension_numbers = #tpu.dot_dimension_numbers<[1], [0], [0], [1], [0, 0, 1, 1], [], []>} : vector<2x32xbf16>, vector<32x32xbf16>, vector<2x32xf32> -> vector<2x32xf32>
    %327 = arith.addf %312, %326 : vector<2x32xf32>
    %cst_191 = arith.constant dense<0.000000e+00> : vector<2x32xf32>
    %328 = tpu.matmul %323, %51, %cst_191 {dimension_numbers = #tpu.dot_dimension_numbers<[1], [0], [0], [1], [0, 0, 1, 1], [], []>} : vector<2x32xbf16>, vector<32x32xbf16>, vector<2x32xf32> -> vector<2x32xf32>
    %329 = arith.addf %317, %328 : vector<2x32xf32>
    %cst_192 = arith.constant dense<0.000000e+00> : vector<2x32xf32>
    %330 = tpu.matmul %323, %53, %cst_192 {dimension_numbers = #tpu.dot_dimension_numbers<[1], [0], [0], [1], [0, 0, 1, 1], [], []>} : vector<2x32xbf16>, vector<32x32xbf16>, vector<2x32xf32> -> vector<2x32xf32>
    %331 = arith.addf %322, %330 : vector<2x32xf32>
    %cst_193 = arith.constant 5.000000e-01 : f32
    %332 = vector.broadcast %cst_193 : f32 to vector<2x32xf32>
    %333 = arith.mulf %332, %325 : vector<2x32xf32>
    %334 = math.tanh %333 : vector<2x32xf32>
    %cst_194 = arith.constant 5.000000e-01 : f32
    %335 = vector.broadcast %cst_194 : f32 to vector<2x32xf32>
    %336 = arith.mulf %335, %334 : vector<2x32xf32>
    %cst_195 = arith.constant 5.000000e-01 : f32
    %337 = vector.broadcast %cst_195 : f32 to vector<2x32xf32>
    %338 = arith.addf %336, %337 : vector<2x32xf32>
    %cst_196 = arith.constant 5.000000e-01 : f32
    %339 = vector.broadcast %cst_196 : f32 to vector<2x32xf32>
    %340 = arith.mulf %339, %327 : vector<2x32xf32>
    %341 = math.tanh %340 : vector<2x32xf32>
    %cst_197 = arith.constant 5.000000e-01 : f32
    %342 = vector.broadcast %cst_197 : f32 to vector<2x32xf32>
    %343 = arith.mulf %342, %341 : vector<2x32xf32>
    %cst_198 = arith.constant 5.000000e-01 : f32
    %344 = vector.broadcast %cst_198 : f32 to vector<2x32xf32>
    %345 = arith.addf %343, %344 : vector<2x32xf32>
    %cst_199 = arith.constant 5.000000e-01 : f32
    %346 = vector.broadcast %cst_199 : f32 to vector<2x32xf32>
    %347 = arith.mulf %346, %331 : vector<2x32xf32>
    %348 = math.tanh %347 : vector<2x32xf32>
    %cst_200 = arith.constant 5.000000e-01 : f32
    %349 = vector.broadcast %cst_200 : f32 to vector<2x32xf32>
    %350 = arith.mulf %349, %348 : vector<2x32xf32>
    %cst_201 = arith.constant 5.000000e-01 : f32
    %351 = vector.broadcast %cst_201 : f32 to vector<2x32xf32>
    %352 = arith.addf %350, %351 : vector<2x32xf32>
    %353 = math.tanh %329 : vector<2x32xf32>
    %354 = arith.mulf %345, %258 : vector<2x32xf32>
    %355 = arith.mulf %338, %353 : vector<2x32xf32>
    %356 = arith.addf %354, %355 : vector<2x32xf32>
    %357 = math.tanh %356 : vector<2x32xf32>
    %358 = arith.mulf %352, %357 : vector<2x32xf32>
    %c4 = arith.constant 4 : index
    %c0_202 = arith.constant 0 : index
    %359 = vector.load %arg26[%c4, %c0_202] : memref<16x32xf32, #tpu.memory_space<vmem>>, vector<2x32xf32>
    tpu.vector_store %arg26[%c4, %c0_202], %358 {strides = array<i32>} : memref<16x32xf32, #tpu.memory_space<vmem>>, vector<2x32xf32>,
    %360 = vector.extract_strided_slice %16 {offsets = [6, 0], sizes = [2, 32], strides = [1, 1]} : vector<16x32xf32> to vector<2x32xf32>
    %361 = vector.extract_strided_slice %23 {offsets = [6, 0], sizes = [2, 32], strides = [1, 1]} : vector<16x32xf32> to vector<2x32xf32>
    %362 = vector.extract_strided_slice %30 {offsets = [6, 0], sizes = [2, 32], strides = [1, 1]} : vector<16x32xf32> to vector<2x32xf32>
    %363 = vector.extract_strided_slice %37 {offsets = [6, 0], sizes = [2, 32], strides = [1, 1]} : vector<16x32xf32> to vector<2x32xf32>
    %364 = arith.truncf %301 : vector<2x32xf32> to vector<2x32xbf16>
    %cst_203 = arith.constant dense<0.000000e+00> : vector<2x32xf32>
    %365 = tpu.matmul %364, %39, %cst_203 {dimension_numbers = #tpu.dot_dimension_numbers<[1], [0], [0], [1], [0, 0, 1, 1], [], []>} : vector<2x32xbf16>, vector<32x32xbf16>, vector<2x32xf32> -> vector<2x32xf32>
    %366 = arith.addf %360, %365 : vector<2x32xf32>
    %cst_204 = arith.constant dense<0.000000e+00> : vector<2x32xf32>
    %367 = tpu.matmul %364, %41, %cst_204 {dimension_numbers = #tpu.dot_dimension_numbers<[1], [0], [0], [1], [0, 0, 1, 1], [], []>} : vector<2x32xbf16>, vector<32x32xbf16>, vector<2x32xf32> -> vector<2x32xf32>
    %368 = arith.addf %361, %367 : vector<2x32xf32>
    %cst_205 = arith.constant dense<0.000000e+00> : vector<2x32xf32>
    %369 = tpu.matmul %364, %43, %cst_205 {dimension_numbers = #tpu.dot_dimension_numbers<[1], [0], [0], [1], [0, 0, 1, 1], [], []>} : vector<2x32xbf16>, vector<32x32xbf16>, vector<2x32xf32> -> vector<2x32xf32>
    %370 = arith.addf %362, %369 : vector<2x32xf32>
    %cst_206 = arith.constant dense<0.000000e+00> : vector<2x32xf32>
    %371 = tpu.matmul %364, %45, %cst_206 {dimension_numbers = #tpu.dot_dimension_numbers<[1], [0], [0], [1], [0, 0, 1, 1], [], []>} : vector<2x32xbf16>, vector<32x32xbf16>, vector<2x32xf32> -> vector<2x32xf32>
    %372 = arith.addf %363, %371 : vector<2x32xf32>
    %cst_207 = arith.constant 5.000000e-01 : f32
    %373 = vector.broadcast %cst_207 : f32 to vector<2x32xf32>
    %374 = arith.mulf %373, %366 : vector<2x32xf32>
    %375 = math.tanh %374 : vector<2x32xf32>
    %cst_208 = arith.constant 5.000000e-01 : f32
    %376 = vector.broadcast %cst_208 : f32 to vector<2x32xf32>
    %377 = arith.mulf %376, %375 : vector<2x32xf32>
    %cst_209 = arith.constant 5.000000e-01 : f32
    %378 = vector.broadcast %cst_209 : f32 to vector<2x32xf32>
    %379 = arith.addf %377, %378 : vector<2x32xf32>
    %cst_210 = arith.constant 5.000000e-01 : f32
    %380 = vector.broadcast %cst_210 : f32 to vector<2x32xf32>
    %381 = arith.mulf %380, %368 : vector<2x32xf32>
    %382 = math.tanh %381 : vector<2x32xf32>
    %cst_211 = arith.constant 5.000000e-01 : f32
    %383 = vector.broadcast %cst_211 : f32 to vector<2x32xf32>
    %384 = arith.mulf %383, %382 : vector<2x32xf32>
    %cst_212 = arith.constant 5.000000e-01 : f32
    %385 = vector.broadcast %cst_212 : f32 to vector<2x32xf32>
    %386 = arith.addf %384, %385 : vector<2x32xf32>
    %cst_213 = arith.constant 5.000000e-01 : f32
    %387 = vector.broadcast %cst_213 : f32 to vector<2x32xf32>
    %388 = arith.mulf %387, %372 : vector<2x32xf32>
    %389 = math.tanh %388 : vector<2x32xf32>
    %cst_214 = arith.constant 5.000000e-01 : f32
    %390 = vector.broadcast %cst_214 : f32 to vector<2x32xf32>
    %391 = arith.mulf %390, %389 : vector<2x32xf32>
    %cst_215 = arith.constant 5.000000e-01 : f32
    %392 = vector.broadcast %cst_215 : f32 to vector<2x32xf32>
    %393 = arith.addf %391, %392 : vector<2x32xf32>
    %394 = math.tanh %370 : vector<2x32xf32>
    %395 = arith.mulf %386, %299 : vector<2x32xf32>
    %396 = arith.mulf %379, %394 : vector<2x32xf32>
    %397 = arith.addf %395, %396 : vector<2x32xf32>
    %398 = math.tanh %397 : vector<2x32xf32>
    %399 = arith.mulf %393, %398 : vector<2x32xf32>
    %400 = arith.truncf %399 : vector<2x32xf32> to vector<2x32xbf16>
    %c0_216 = arith.constant 0 : index
    %c0_217 = arith.constant 0 : index
    %c0_218 = arith.constant 0 : index
    %401 = vector.load %arg7[%c0_216, %c0_217, %c0_218] : memref<4x32x32xbf16, #tpu.memory_space<vmem>>, vector<1x32x32xbf16>
    %402 = vector.shape_cast %401 : vector<1x32x32xbf16> to vector<32x32xbf16>
    %cst_219 = arith.constant dense<0.000000e+00> : vector<2x32xf32>
    %403 = tpu.matmul %400, %402, %cst_219 {dimension_numbers = #tpu.dot_dimension_numbers<[1], [0], [0], [1], [0, 0, 1, 1], [], []>} : vector<2x32xbf16>, vector<32x32xbf16>, vector<2x32xf32> -> vector<2x32xf32>
    %404 = vector.broadcast %55 : vector<1x32xf32> to vector<2x32xf32>
    %405 = arith.addf %403, %404 : vector<2x32xf32>
    %c1_220 = arith.constant 1 : index
    %c0_221 = arith.constant 0 : index
    %c0_222 = arith.constant 0 : index
    %406 = vector.load %arg7[%c1_220, %c0_221, %c0_222] : memref<4x32x32xbf16, #tpu.memory_space<vmem>>, vector<1x32x32xbf16>
    %407 = vector.shape_cast %406 : vector<1x32x32xbf16> to vector<32x32xbf16>
    %cst_223 = arith.constant dense<0.000000e+00> : vector<2x32xf32>
    %408 = tpu.matmul %400, %407, %cst_223 {dimension_numbers = #tpu.dot_dimension_numbers<[1], [0], [0], [1], [0, 0, 1, 1], [], []>} : vector<2x32xbf16>, vector<32x32xbf16>, vector<2x32xf32> -> vector<2x32xf32>
    %409 = vector.broadcast %57 : vector<1x32xf32> to vector<2x32xf32>
    %410 = arith.addf %408, %409 : vector<2x32xf32>
    %c2_224 = arith.constant 2 : index
    %c0_225 = arith.constant 0 : index
    %c0_226 = arith.constant 0 : index
    %411 = vector.load %arg7[%c2_224, %c0_225, %c0_226] : memref<4x32x32xbf16, #tpu.memory_space<vmem>>, vector<1x32x32xbf16>
    %412 = vector.shape_cast %411 : vector<1x32x32xbf16> to vector<32x32xbf16>
    %cst_227 = arith.constant dense<0.000000e+00> : vector<2x32xf32>
    %413 = tpu.matmul %400, %412, %cst_227 {dimension_numbers = #tpu.dot_dimension_numbers<[1], [0], [0], [1], [0, 0, 1, 1], [], []>} : vector<2x32xbf16>, vector<32x32xbf16>, vector<2x32xf32> -> vector<2x32xf32>
    %414 = vector.broadcast %59 : vector<1x32xf32> to vector<2x32xf32>
    %415 = arith.addf %413, %414 : vector<2x32xf32>
    %c3_228 = arith.constant 3 : index
    %c0_229 = arith.constant 0 : index
    %c0_230 = arith.constant 0 : index
    %416 = vector.load %arg7[%c3_228, %c0_229, %c0_230] : memref<4x32x32xbf16, #tpu.memory_space<vmem>>, vector<1x32x32xbf16>
    %417 = vector.shape_cast %416 : vector<1x32x32xbf16> to vector<32x32xbf16>
    %cst_231 = arith.constant dense<0.000000e+00> : vector<2x32xf32>
    %418 = tpu.matmul %400, %417, %cst_231 {dimension_numbers = #tpu.dot_dimension_numbers<[1], [0], [0], [1], [0, 0, 1, 1], [], []>} : vector<2x32xbf16>, vector<32x32xbf16>, vector<2x32xf32> -> vector<2x32xf32>
    %419 = vector.broadcast %61 : vector<1x32xf32> to vector<2x32xf32>
    %420 = arith.addf %418, %419 : vector<2x32xf32>
    %421 = arith.truncf %358 : vector<2x32xf32> to vector<2x32xbf16>
    %cst_232 = arith.constant dense<0.000000e+00> : vector<2x32xf32>
    %422 = tpu.matmul %421, %47, %cst_232 {dimension_numbers = #tpu.dot_dimension_numbers<[1], [0], [0], [1], [0, 0, 1, 1], [], []>} : vector<2x32xbf16>, vector<32x32xbf16>, vector<2x32xf32> -> vector<2x32xf32>
    %423 = arith.addf %405, %422 : vector<2x32xf32>
    %cst_233 = arith.constant dense<0.000000e+00> : vector<2x32xf32>
    %424 = tpu.matmul %421, %49, %cst_233 {dimension_numbers = #tpu.dot_dimension_numbers<[1], [0], [0], [1], [0, 0, 1, 1], [], []>} : vector<2x32xbf16>, vector<32x32xbf16>, vector<2x32xf32> -> vector<2x32xf32>
    %425 = arith.addf %410, %424 : vector<2x32xf32>
    %cst_234 = arith.constant dense<0.000000e+00> : vector<2x32xf32>
    %426 = tpu.matmul %421, %51, %cst_234 {dimension_numbers = #tpu.dot_dimension_numbers<[1], [0], [0], [1], [0, 0, 1, 1], [], []>} : vector<2x32xbf16>, vector<32x32xbf16>, vector<2x32xf32> -> vector<2x32xf32>
    %427 = arith.addf %415, %426 : vector<2x32xf32>
    %cst_235 = arith.constant dense<0.000000e+00> : vector<2x32xf32>
    %428 = tpu.matmul %421, %53, %cst_235 {dimension_numbers = #tpu.dot_dimension_numbers<[1], [0], [0], [1], [0, 0, 1, 1], [], []>} : vector<2x32xbf16>, vector<32x32xbf16>, vector<2x32xf32> -> vector<2x32xf32>
    %429 = arith.addf %420, %428 : vector<2x32xf32>
    %cst_236 = arith.constant 5.000000e-01 : f32
    %430 = vector.broadcast %cst_236 : f32 to vector<2x32xf32>
    %431 = arith.mulf %430, %423 : vector<2x32xf32>
    %432 = math.tanh %431 : vector<2x32xf32>
    %cst_237 = arith.constant 5.000000e-01 : f32
    %433 = vector.broadcast %cst_237 : f32 to vector<2x32xf32>
    %434 = arith.mulf %433, %432 : vector<2x32xf32>
    %cst_238 = arith.constant 5.000000e-01 : f32
    %435 = vector.broadcast %cst_238 : f32 to vector<2x32xf32>
    %436 = arith.addf %434, %435 : vector<2x32xf32>
    %cst_239 = arith.constant 5.000000e-01 : f32
    %437 = vector.broadcast %cst_239 : f32 to vector<2x32xf32>
    %438 = arith.mulf %437, %425 : vector<2x32xf32>
    %439 = math.tanh %438 : vector<2x32xf32>
    %cst_240 = arith.constant 5.000000e-01 : f32
    %440 = vector.broadcast %cst_240 : f32 to vector<2x32xf32>
    %441 = arith.mulf %440, %439 : vector<2x32xf32>
    %cst_241 = arith.constant 5.000000e-01 : f32
    %442 = vector.broadcast %cst_241 : f32 to vector<2x32xf32>
    %443 = arith.addf %441, %442 : vector<2x32xf32>
    %cst_242 = arith.constant 5.000000e-01 : f32
    %444 = vector.broadcast %cst_242 : f32 to vector<2x32xf32>
    %445 = arith.mulf %444, %429 : vector<2x32xf32>
    %446 = math.tanh %445 : vector<2x32xf32>
    %cst_243 = arith.constant 5.000000e-01 : f32
    %447 = vector.broadcast %cst_243 : f32 to vector<2x32xf32>
    %448 = arith.mulf %447, %446 : vector<2x32xf32>
    %cst_244 = arith.constant 5.000000e-01 : f32
    %449 = vector.broadcast %cst_244 : f32 to vector<2x32xf32>
    %450 = arith.addf %448, %449 : vector<2x32xf32>
    %451 = math.tanh %427 : vector<2x32xf32>
    %452 = arith.mulf %443, %356 : vector<2x32xf32>
    %453 = arith.mulf %436, %451 : vector<2x32xf32>
    %454 = arith.addf %452, %453 : vector<2x32xf32>
    %455 = math.tanh %454 : vector<2x32xf32>
    %456 = arith.mulf %450, %455 : vector<2x32xf32>
    %c6 = arith.constant 6 : index
    %c0_245 = arith.constant 0 : index
    %457 = vector.load %arg26[%c6, %c0_245] : memref<16x32xf32, #tpu.memory_space<vmem>>, vector<2x32xf32>
    tpu.vector_store %arg26[%c6, %c0_245], %456 {strides = array<i32>} : memref<16x32xf32, #tpu.memory_space<vmem>>, vector<2x32xf32>,
    %458 = vector.extract_strided_slice %16 {offsets = [8, 0], sizes = [2, 32], strides = [1, 1]} : vector<16x32xf32> to vector<2x32xf32>
    %459 = vector.extract_strided_slice %23 {offsets = [8, 0], sizes = [2, 32], strides = [1, 1]} : vector<16x32xf32> to vector<2x32xf32>
    %460 = vector.extract_strided_slice %30 {offsets = [8, 0], sizes = [2, 32], strides = [1, 1]} : vector<16x32xf32> to vector<2x32xf32>
    %461 = vector.extract_strided_slice %37 {offsets = [8, 0], sizes = [2, 32], strides = [1, 1]} : vector<16x32xf32> to vector<2x32xf32>
    %462 = arith.truncf %399 : vector<2x32xf32> to vector<2x32xbf16>
    %cst_246 = arith.constant dense<0.000000e+00> : vector<2x32xf32>
    %463 = tpu.matmul %462, %39, %cst_246 {dimension_numbers = #tpu.dot_dimension_numbers<[1], [0], [0], [1], [0, 0, 1, 1], [], []>} : vector<2x32xbf16>, vector<32x32xbf16>, vector<2x32xf32> -> vector<2x32xf32>
    %464 = arith.addf %458, %463 : vector<2x32xf32>
    %cst_247 = arith.constant dense<0.000000e+00> : vector<2x32xf32>
    %465 = tpu.matmul %462, %41, %cst_247 {dimension_numbers = #tpu.dot_dimension_numbers<[1], [0], [0], [1], [0, 0, 1, 1], [], []>} : vector<2x32xbf16>, vector<32x32xbf16>, vector<2x32xf32> -> vector<2x32xf32>
    %466 = arith.addf %459, %465 : vector<2x32xf32>
    %cst_248 = arith.constant dense<0.000000e+00> : vector<2x32xf32>
    %467 = tpu.matmul %462, %43, %cst_248 {dimension_numbers = #tpu.dot_dimension_numbers<[1], [0], [0], [1], [0, 0, 1, 1], [], []>} : vector<2x32xbf16>, vector<32x32xbf16>, vector<2x32xf32> -> vector<2x32xf32>
    %468 = arith.addf %460, %467 : vector<2x32xf32>
    %cst_249 = arith.constant dense<0.000000e+00> : vector<2x32xf32>
    %469 = tpu.matmul %462, %45, %cst_249 {dimension_numbers = #tpu.dot_dimension_numbers<[1], [0], [0], [1], [0, 0, 1, 1], [], []>} : vector<2x32xbf16>, vector<32x32xbf16>, vector<2x32xf32> -> vector<2x32xf32>
    %470 = arith.addf %461, %469 : vector<2x32xf32>
    %cst_250 = arith.constant 5.000000e-01 : f32
    %471 = vector.broadcast %cst_250 : f32 to vector<2x32xf32>
    %472 = arith.mulf %471, %464 : vector<2x32xf32>
    %473 = math.tanh %472 : vector<2x32xf32>
    %cst_251 = arith.constant 5.000000e-01 : f32
    %474 = vector.broadcast %cst_251 : f32 to vector<2x32xf32>
    %475 = arith.mulf %474, %473 : vector<2x32xf32>
    %cst_252 = arith.constant 5.000000e-01 : f32
    %476 = vector.broadcast %cst_252 : f32 to vector<2x32xf32>
    %477 = arith.addf %475, %476 : vector<2x32xf32>
    %cst_253 = arith.constant 5.000000e-01 : f32
    %478 = vector.broadcast %cst_253 : f32 to vector<2x32xf32>
    %479 = arith.mulf %478, %466 : vector<2x32xf32>
    %480 = math.tanh %479 : vector<2x32xf32>
    %cst_254 = arith.constant 5.000000e-01 : f32
    %481 = vector.broadcast %cst_254 : f32 to vector<2x32xf32>
    %482 = arith.mulf %481, %480 : vector<2x32xf32>
    %cst_255 = arith.constant 5.000000e-01 : f32
    %483 = vector.broadcast %cst_255 : f32 to vector<2x32xf32>
    %484 = arith.addf %482, %483 : vector<2x32xf32>
    %cst_256 = arith.constant 5.000000e-01 : f32
    %485 = vector.broadcast %cst_256 : f32 to vector<2x32xf32>
    %486 = arith.mulf %485, %470 : vector<2x32xf32>
    %487 = math.tanh %486 : vector<2x32xf32>
    %cst_257 = arith.constant 5.000000e-01 : f32
    %488 = vector.broadcast %cst_257 : f32 to vector<2x32xf32>
    %489 = arith.mulf %488, %487 : vector<2x32xf32>
    %cst_258 = arith.constant 5.000000e-01 : f32
    %490 = vector.broadcast %cst_258 : f32 to vector<2x32xf32>
    %491 = arith.addf %489, %490 : vector<2x32xf32>
    %492 = math.tanh %468 : vector<2x32xf32>
    %493 = arith.mulf %484, %397 : vector<2x32xf32>
    %494 = arith.mulf %477, %492 : vector<2x32xf32>
    %495 = arith.addf %493, %494 : vector<2x32xf32>
    %496 = math.tanh %495 : vector<2x32xf32>
    %497 = arith.mulf %491, %496 : vector<2x32xf32>
    %498 = arith.truncf %497 : vector<2x32xf32> to vector<2x32xbf16>
    %c0_259 = arith.constant 0 : index
    %c0_260 = arith.constant 0 : index
    %c0_261 = arith.constant 0 : index
    %499 = vector.load %arg7[%c0_259, %c0_260, %c0_261] : memref<4x32x32xbf16, #tpu.memory_space<vmem>>, vector<1x32x32xbf16>
    %500 = vector.shape_cast %499 : vector<1x32x32xbf16> to vector<32x32xbf16>
    %cst_262 = arith.constant dense<0.000000e+00> : vector<2x32xf32>
    %501 = tpu.matmul %498, %500, %cst_262 {dimension_numbers = #tpu.dot_dimension_numbers<[1], [0], [0], [1], [0, 0, 1, 1], [], []>} : vector<2x32xbf16>, vector<32x32xbf16>, vector<2x32xf32> -> vector<2x32xf32>
    %502 = vector.broadcast %55 : vector<1x32xf32> to vector<2x32xf32>
    %503 = arith.addf %501, %502 : vector<2x32xf32>
    %c1_263 = arith.constant 1 : index
    %c0_264 = arith.constant 0 : index
    %c0_265 = arith.constant 0 : index
    %504 = vector.load %arg7[%c1_263, %c0_264, %c0_265] : memref<4x32x32xbf16, #tpu.memory_space<vmem>>, vector<1x32x32xbf16>
    %505 = vector.shape_cast %504 : vector<1x32x32xbf16> to vector<32x32xbf16>
    %cst_266 = arith.constant dense<0.000000e+00> : vector<2x32xf32>
    %506 = tpu.matmul %498, %505, %cst_266 {dimension_numbers = #tpu.dot_dimension_numbers<[1], [0], [0], [1], [0, 0, 1, 1], [], []>} : vector<2x32xbf16>, vector<32x32xbf16>, vector<2x32xf32> -> vector<2x32xf32>
    %507 = vector.broadcast %57 : vector<1x32xf32> to vector<2x32xf32>
    %508 = arith.addf %506, %507 : vector<2x32xf32>
    %c2_267 = arith.constant 2 : index
    %c0_268 = arith.constant 0 : index
    %c0_269 = arith.constant 0 : index
    %509 = vector.load %arg7[%c2_267, %c0_268, %c0_269] : memref<4x32x32xbf16, #tpu.memory_space<vmem>>, vector<1x32x32xbf16>
    %510 = vector.shape_cast %509 : vector<1x32x32xbf16> to vector<32x32xbf16>
    %cst_270 = arith.constant dense<0.000000e+00> : vector<2x32xf32>
    %511 = tpu.matmul %498, %510, %cst_270 {dimension_numbers = #tpu.dot_dimension_numbers<[1], [0], [0], [1], [0, 0, 1, 1], [], []>} : vector<2x32xbf16>, vector<32x32xbf16>, vector<2x32xf32> -> vector<2x32xf32>
    %512 = vector.broadcast %59 : vector<1x32xf32> to vector<2x32xf32>
    %513 = arith.addf %511, %512 : vector<2x32xf32>
    %c3_271 = arith.constant 3 : index
    %c0_272 = arith.constant 0 : index
    %c0_273 = arith.constant 0 : index
    %514 = vector.load %arg7[%c3_271, %c0_272, %c0_273] : memref<4x32x32xbf16, #tpu.memory_space<vmem>>, vector<1x32x32xbf16>
    %515 = vector.shape_cast %514 : vector<1x32x32xbf16> to vector<32x32xbf16>
    %cst_274 = arith.constant dense<0.000000e+00> : vector<2x32xf32>
    %516 = tpu.matmul %498, %515, %cst_274 {dimension_numbers = #tpu.dot_dimension_numbers<[1], [0], [0], [1], [0, 0, 1, 1], [], []>} : vector<2x32xbf16>, vector<32x32xbf16>, vector<2x32xf32> -> vector<2x32xf32>
    %517 = vector.broadcast %61 : vector<1x32xf32> to vector<2x32xf32>
    %518 = arith.addf %516, %517 : vector<2x32xf32>
    %519 = arith.truncf %456 : vector<2x32xf32> to vector<2x32xbf16>
    %cst_275 = arith.constant dense<0.000000e+00> : vector<2x32xf32>
    %520 = tpu.matmul %519, %47, %cst_275 {dimension_numbers = #tpu.dot_dimension_numbers<[1], [0], [0], [1], [0, 0, 1, 1], [], []>} : vector<2x32xbf16>, vector<32x32xbf16>, vector<2x32xf32> -> vector<2x32xf32>
    %521 = arith.addf %503, %520 : vector<2x32xf32>
    %cst_276 = arith.constant dense<0.000000e+00> : vector<2x32xf32>
    %522 = tpu.matmul %519, %49, %cst_276 {dimension_numbers = #tpu.dot_dimension_numbers<[1], [0], [0], [1], [0, 0, 1, 1], [], []>} : vector<2x32xbf16>, vector<32x32xbf16>, vector<2x32xf32> -> vector<2x32xf32>
    %523 = arith.addf %508, %522 : vector<2x32xf32>
    %cst_277 = arith.constant dense<0.000000e+00> : vector<2x32xf32>
    %524 = tpu.matmul %519, %51, %cst_277 {dimension_numbers = #tpu.dot_dimension_numbers<[1], [0], [0], [1], [0, 0, 1, 1], [], []>} : vector<2x32xbf16>, vector<32x32xbf16>, vector<2x32xf32> -> vector<2x32xf32>
    %525 = arith.addf %513, %524 : vector<2x32xf32>
    %cst_278 = arith.constant dense<0.000000e+00> : vector<2x32xf32>
    %526 = tpu.matmul %519, %53, %cst_278 {dimension_numbers = #tpu.dot_dimension_numbers<[1], [0], [0], [1], [0, 0, 1, 1], [], []>} : vector<2x32xbf16>, vector<32x32xbf16>, vector<2x32xf32> -> vector<2x32xf32>
    %527 = arith.addf %518, %526 : vector<2x32xf32>
    %cst_279 = arith.constant 5.000000e-01 : f32
    %528 = vector.broadcast %cst_279 : f32 to vector<2x32xf32>
    %529 = arith.mulf %528, %521 : vector<2x32xf32>
    %530 = math.tanh %529 : vector<2x32xf32>
    %cst_280 = arith.constant 5.000000e-01 : f32
    %531 = vector.broadcast %cst_280 : f32 to vector<2x32xf32>
    %532 = arith.mulf %531, %530 : vector<2x32xf32>
    %cst_281 = arith.constant 5.000000e-01 : f32
    %533 = vector.broadcast %cst_281 : f32 to vector<2x32xf32>
    %534 = arith.addf %532, %533 : vector<2x32xf32>
    %cst_282 = arith.constant 5.000000e-01 : f32
    %535 = vector.broadcast %cst_282 : f32 to vector<2x32xf32>
    %536 = arith.mulf %535, %523 : vector<2x32xf32>
    %537 = math.tanh %536 : vector<2x32xf32>
    %cst_283 = arith.constant 5.000000e-01 : f32
    %538 = vector.broadcast %cst_283 : f32 to vector<2x32xf32>
    %539 = arith.mulf %538, %537 : vector<2x32xf32>
    %cst_284 = arith.constant 5.000000e-01 : f32
    %540 = vector.broadcast %cst_284 : f32 to vector<2x32xf32>
    %541 = arith.addf %539, %540 : vector<2x32xf32>
    %cst_285 = arith.constant 5.000000e-01 : f32
    %542 = vector.broadcast %cst_285 : f32 to vector<2x32xf32>
    %543 = arith.mulf %542, %527 : vector<2x32xf32>
    %544 = math.tanh %543 : vector<2x32xf32>
    %cst_286 = arith.constant 5.000000e-01 : f32
    %545 = vector.broadcast %cst_286 : f32 to vector<2x32xf32>
    %546 = arith.mulf %545, %544 : vector<2x32xf32>
    %cst_287 = arith.constant 5.000000e-01 : f32
    %547 = vector.broadcast %cst_287 : f32 to vector<2x32xf32>
    %548 = arith.addf %546, %547 : vector<2x32xf32>
    %549 = math.tanh %525 : vector<2x32xf32>
    %550 = arith.mulf %541, %454 : vector<2x32xf32>
    %551 = arith.mulf %534, %549 : vector<2x32xf32>
    %552 = arith.addf %550, %551 : vector<2x32xf32>
    %553 = math.tanh %552 : vector<2x32xf32>
    %554 = arith.mulf %548, %553 : vector<2x32xf32>
    %c8 = arith.constant 8 : index
    %c0_288 = arith.constant 0 : index
    %555 = vector.load %arg26[%c8, %c0_288] : memref<16x32xf32, #tpu.memory_space<vmem>>, vector<2x32xf32>
    tpu.vector_store %arg26[%c8, %c0_288], %554 {strides = array<i32>} : memref<16x32xf32, #tpu.memory_space<vmem>>, vector<2x32xf32>,
    %556 = vector.extract_strided_slice %16 {offsets = [10, 0], sizes = [2, 32], strides = [1, 1]} : vector<16x32xf32> to vector<2x32xf32>
    %557 = vector.extract_strided_slice %23 {offsets = [10, 0], sizes = [2, 32], strides = [1, 1]} : vector<16x32xf32> to vector<2x32xf32>
    %558 = vector.extract_strided_slice %30 {offsets = [10, 0], sizes = [2, 32], strides = [1, 1]} : vector<16x32xf32> to vector<2x32xf32>
    %559 = vector.extract_strided_slice %37 {offsets = [10, 0], sizes = [2, 32], strides = [1, 1]} : vector<16x32xf32> to vector<2x32xf32>
    %560 = arith.truncf %497 : vector<2x32xf32> to vector<2x32xbf16>
    %cst_289 = arith.constant dense<0.000000e+00> : vector<2x32xf32>
    %561 = tpu.matmul %560, %39, %cst_289 {dimension_numbers = #tpu.dot_dimension_numbers<[1], [0], [0], [1], [0, 0, 1, 1], [], []>} : vector<2x32xbf16>, vector<32x32xbf16>, vector<2x32xf32> -> vector<2x32xf32>
    %562 = arith.addf %556, %561 : vector<2x32xf32>
    %cst_290 = arith.constant dense<0.000000e+00> : vector<2x32xf32>
    %563 = tpu.matmul %560, %41, %cst_290 {dimension_numbers = #tpu.dot_dimension_numbers<[1], [0], [0], [1], [0, 0, 1, 1], [], []>} : vector<2x32xbf16>, vector<32x32xbf16>, vector<2x32xf32> -> vector<2x32xf32>
    %564 = arith.addf %557, %563 : vector<2x32xf32>
    %cst_291 = arith.constant dense<0.000000e+00> : vector<2x32xf32>
    %565 = tpu.matmul %560, %43, %cst_291 {dimension_numbers = #tpu.dot_dimension_numbers<[1], [0], [0], [1], [0, 0, 1, 1], [], []>} : vector<2x32xbf16>, vector<32x32xbf16>, vector<2x32xf32> -> vector<2x32xf32>
    %566 = arith.addf %558, %565 : vector<2x32xf32>
    %cst_292 = arith.constant dense<0.000000e+00> : vector<2x32xf32>
    %567 = tpu.matmul %560, %45, %cst_292 {dimension_numbers = #tpu.dot_dimension_numbers<[1], [0], [0], [1], [0, 0, 1, 1], [], []>} : vector<2x32xbf16>, vector<32x32xbf16>, vector<2x32xf32> -> vector<2x32xf32>
    %568 = arith.addf %559, %567 : vector<2x32xf32>
    %cst_293 = arith.constant 5.000000e-01 : f32
    %569 = vector.broadcast %cst_293 : f32 to vector<2x32xf32>
    %570 = arith.mulf %569, %562 : vector<2x32xf32>
    %571 = math.tanh %570 : vector<2x32xf32>
    %cst_294 = arith.constant 5.000000e-01 : f32
    %572 = vector.broadcast %cst_294 : f32 to vector<2x32xf32>
    %573 = arith.mulf %572, %571 : vector<2x32xf32>
    %cst_295 = arith.constant 5.000000e-01 : f32
    %574 = vector.broadcast %cst_295 : f32 to vector<2x32xf32>
    %575 = arith.addf %573, %574 : vector<2x32xf32>
    %cst_296 = arith.constant 5.000000e-01 : f32
    %576 = vector.broadcast %cst_296 : f32 to vector<2x32xf32>
    %577 = arith.mulf %576, %564 : vector<2x32xf32>
    %578 = math.tanh %577 : vector<2x32xf32>
    %cst_297 = arith.constant 5.000000e-01 : f32
    %579 = vector.broadcast %cst_297 : f32 to vector<2x32xf32>
    %580 = arith.mulf %579, %578 : vector<2x32xf32>
    %cst_298 = arith.constant 5.000000e-01 : f32
    %581 = vector.broadcast %cst_298 : f32 to vector<2x32xf32>
    %582 = arith.addf %580, %581 : vector<2x32xf32>
    %cst_299 = arith.constant 5.000000e-01 : f32
    %583 = vector.broadcast %cst_299 : f32 to vector<2x32xf32>
    %584 = arith.mulf %583, %568 : vector<2x32xf32>
    %585 = math.tanh %584 : vector<2x32xf32>
    %cst_300 = arith.constant 5.000000e-01 : f32
    %586 = vector.broadcast %cst_300 : f32 to vector<2x32xf32>
    %587 = arith.mulf %586, %585 : vector<2x32xf32>
    %cst_301 = arith.constant 5.000000e-01 : f32
    %588 = vector.broadcast %cst_301 : f32 to vector<2x32xf32>
    %589 = arith.addf %587, %588 : vector<2x32xf32>
    %590 = math.tanh %566 : vector<2x32xf32>
    %591 = arith.mulf %582, %495 : vector<2x32xf32>
    %592 = arith.mulf %575, %590 : vector<2x32xf32>
    %593 = arith.addf %591, %592 : vector<2x32xf32>
    %594 = math.tanh %593 : vector<2x32xf32>
    %595 = arith.mulf %589, %594 : vector<2x32xf32>
    %596 = arith.truncf %595 : vector<2x32xf32> to vector<2x32xbf16>
    %c0_302 = arith.constant 0 : index
    %c0_303 = arith.constant 0 : index
    %c0_304 = arith.constant 0 : index
    %597 = vector.load %arg7[%c0_302, %c0_303, %c0_304] : memref<4x32x32xbf16, #tpu.memory_space<vmem>>, vector<1x32x32xbf16>
    %598 = vector.shape_cast %597 : vector<1x32x32xbf16> to vector<32x32xbf16>
    %cst_305 = arith.constant dense<0.000000e+00> : vector<2x32xf32>
    %599 = tpu.matmul %596, %598, %cst_305 {dimension_numbers = #tpu.dot_dimension_numbers<[1], [0], [0], [1], [0, 0, 1, 1], [], []>} : vector<2x32xbf16>, vector<32x32xbf16>, vector<2x32xf32> -> vector<2x32xf32>
    %600 = vector.broadcast %55 : vector<1x32xf32> to vector<2x32xf32>
    %601 = arith.addf %599, %600 : vector<2x32xf32>
    %c1_306 = arith.constant 1 : index
    %c0_307 = arith.constant 0 : index
    %c0_308 = arith.constant 0 : index
    %602 = vector.load %arg7[%c1_306, %c0_307, %c0_308] : memref<4x32x32xbf16, #tpu.memory_space<vmem>>, vector<1x32x32xbf16>
    %603 = vector.shape_cast %602 : vector<1x32x32xbf16> to vector<32x32xbf16>
    %cst_309 = arith.constant dense<0.000000e+00> : vector<2x32xf32>
    %604 = tpu.matmul %596, %603, %cst_309 {dimension_numbers = #tpu.dot_dimension_numbers<[1], [0], [0], [1], [0, 0, 1, 1], [], []>} : vector<2x32xbf16>, vector<32x32xbf16>, vector<2x32xf32> -> vector<2x32xf32>
    %605 = vector.broadcast %57 : vector<1x32xf32> to vector<2x32xf32>
    %606 = arith.addf %604, %605 : vector<2x32xf32>
    %c2_310 = arith.constant 2 : index
    %c0_311 = arith.constant 0 : index
    %c0_312 = arith.constant 0 : index
    %607 = vector.load %arg7[%c2_310, %c0_311, %c0_312] : memref<4x32x32xbf16, #tpu.memory_space<vmem>>, vector<1x32x32xbf16>
    %608 = vector.shape_cast %607 : vector<1x32x32xbf16> to vector<32x32xbf16>
    %cst_313 = arith.constant dense<0.000000e+00> : vector<2x32xf32>
    %609 = tpu.matmul %596, %608, %cst_313 {dimension_numbers = #tpu.dot_dimension_numbers<[1], [0], [0], [1], [0, 0, 1, 1], [], []>} : vector<2x32xbf16>, vector<32x32xbf16>, vector<2x32xf32> -> vector<2x32xf32>
    %610 = vector.broadcast %59 : vector<1x32xf32> to vector<2x32xf32>
    %611 = arith.addf %609, %610 : vector<2x32xf32>
    %c3_314 = arith.constant 3 : index
    %c0_315 = arith.constant 0 : index
    %c0_316 = arith.constant 0 : index
    %612 = vector.load %arg7[%c3_314, %c0_315, %c0_316] : memref<4x32x32xbf16, #tpu.memory_space<vmem>>, vector<1x32x32xbf16>
    %613 = vector.shape_cast %612 : vector<1x32x32xbf16> to vector<32x32xbf16>
    %cst_317 = arith.constant dense<0.000000e+00> : vector<2x32xf32>
    %614 = tpu.matmul %596, %613, %cst_317 {dimension_numbers = #tpu.dot_dimension_numbers<[1], [0], [0], [1], [0, 0, 1, 1], [], []>} : vector<2x32xbf16>, vector<32x32xbf16>, vector<2x32xf32> -> vector<2x32xf32>
    %615 = vector.broadcast %61 : vector<1x32xf32> to vector<2x32xf32>
    %616 = arith.addf %614, %615 : vector<2x32xf32>
    %617 = arith.truncf %554 : vector<2x32xf32> to vector<2x32xbf16>
    %cst_318 = arith.constant dense<0.000000e+00> : vector<2x32xf32>
    %618 = tpu.matmul %617, %47, %cst_318 {dimension_numbers = #tpu.dot_dimension_numbers<[1], [0], [0], [1], [0, 0, 1, 1], [], []>} : vector<2x32xbf16>, vector<32x32xbf16>, vector<2x32xf32> -> vector<2x32xf32>
    %619 = arith.addf %601, %618 : vector<2x32xf32>
    %cst_319 = arith.constant dense<0.000000e+00> : vector<2x32xf32>
    %620 = tpu.matmul %617, %49, %cst_319 {dimension_numbers = #tpu.dot_dimension_numbers<[1], [0], [0], [1], [0, 0, 1, 1], [], []>} : vector<2x32xbf16>, vector<32x32xbf16>, vector<2x32xf32> -> vector<2x32xf32>
    %621 = arith.addf %606, %620 : vector<2x32xf32>
    %cst_320 = arith.constant dense<0.000000e+00> : vector<2x32xf32>
    %622 = tpu.matmul %617, %51, %cst_320 {dimension_numbers = #tpu.dot_dimension_numbers<[1], [0], [0], [1], [0, 0, 1, 1], [], []>} : vector<2x32xbf16>, vector<32x32xbf16>, vector<2x32xf32> -> vector<2x32xf32>
    %623 = arith.addf %611, %622 : vector<2x32xf32>
    %cst_321 = arith.constant dense<0.000000e+00> : vector<2x32xf32>
    %624 = tpu.matmul %617, %53, %cst_321 {dimension_numbers = #tpu.dot_dimension_numbers<[1], [0], [0], [1], [0, 0, 1, 1], [], []>} : vector<2x32xbf16>, vector<32x32xbf16>, vector<2x32xf32> -> vector<2x32xf32>
    %625 = arith.addf %616, %624 : vector<2x32xf32>
    %cst_322 = arith.constant 5.000000e-01 : f32
    %626 = vector.broadcast %cst_322 : f32 to vector<2x32xf32>
    %627 = arith.mulf %626, %619 : vector<2x32xf32>
    %628 = math.tanh %627 : vector<2x32xf32>
    %cst_323 = arith.constant 5.000000e-01 : f32
    %629 = vector.broadcast %cst_323 : f32 to vector<2x32xf32>
    %630 = arith.mulf %629, %628 : vector<2x32xf32>
    %cst_324 = arith.constant 5.000000e-01 : f32
    %631 = vector.broadcast %cst_324 : f32 to vector<2x32xf32>
    %632 = arith.addf %630, %631 : vector<2x32xf32>
    %cst_325 = arith.constant 5.000000e-01 : f32
    %633 = vector.broadcast %cst_325 : f32 to vector<2x32xf32>
    %634 = arith.mulf %633, %621 : vector<2x32xf32>
    %635 = math.tanh %634 : vector<2x32xf32>
    %cst_326 = arith.constant 5.000000e-01 : f32
    %636 = vector.broadcast %cst_326 : f32 to vector<2x32xf32>
    %637 = arith.mulf %636, %635 : vector<2x32xf32>
    %cst_327 = arith.constant 5.000000e-01 : f32
    %638 = vector.broadcast %cst_327 : f32 to vector<2x32xf32>
    %639 = arith.addf %637, %638 : vector<2x32xf32>
    %cst_328 = arith.constant 5.000000e-01 : f32
    %640 = vector.broadcast %cst_328 : f32 to vector<2x32xf32>
    %641 = arith.mulf %640, %625 : vector<2x32xf32>
    %642 = math.tanh %641 : vector<2x32xf32>
    %cst_329 = arith.constant 5.000000e-01 : f32
    %643 = vector.broadcast %cst_329 : f32 to vector<2x32xf32>
    %644 = arith.mulf %643, %642 : vector<2x32xf32>
    %cst_330 = arith.constant 5.000000e-01 : f32
    %645 = vector.broadcast %cst_330 : f32 to vector<2x32xf32>
    %646 = arith.addf %644, %645 : vector<2x32xf32>
    %647 = math.tanh %623 : vector<2x32xf32>
    %648 = arith.mulf %639, %552 : vector<2x32xf32>
    %649 = arith.mulf %632, %647 : vector<2x32xf32>
    %650 = arith.addf %648, %649 : vector<2x32xf32>
    %651 = math.tanh %650 : vector<2x32xf32>
    %652 = arith.mulf %646, %651 : vector<2x32xf32>
    %c10 = arith.constant 10 : index
    %c0_331 = arith.constant 0 : index
    %653 = vector.load %arg26[%c10, %c0_331] : memref<16x32xf32, #tpu.memory_space<vmem>>, vector<2x32xf32>
    tpu.vector_store %arg26[%c10, %c0_331], %652 {strides = array<i32>} : memref<16x32xf32, #tpu.memory_space<vmem>>, vector<2x32xf32>,
    %654 = vector.extract_strided_slice %16 {offsets = [12, 0], sizes = [2, 32], strides = [1, 1]} : vector<16x32xf32> to vector<2x32xf32>
    %655 = vector.extract_strided_slice %23 {offsets = [12, 0], sizes = [2, 32], strides = [1, 1]} : vector<16x32xf32> to vector<2x32xf32>
    %656 = vector.extract_strided_slice %30 {offsets = [12, 0], sizes = [2, 32], strides = [1, 1]} : vector<16x32xf32> to vector<2x32xf32>
    %657 = vector.extract_strided_slice %37 {offsets = [12, 0], sizes = [2, 32], strides = [1, 1]} : vector<16x32xf32> to vector<2x32xf32>
    %658 = arith.truncf %595 : vector<2x32xf32> to vector<2x32xbf16>
    %cst_332 = arith.constant dense<0.000000e+00> : vector<2x32xf32>
    %659 = tpu.matmul %658, %39, %cst_332 {dimension_numbers = #tpu.dot_dimension_numbers<[1], [0], [0], [1], [0, 0, 1, 1], [], []>} : vector<2x32xbf16>, vector<32x32xbf16>, vector<2x32xf32> -> vector<2x32xf32>
    %660 = arith.addf %654, %659 : vector<2x32xf32>
    %cst_333 = arith.constant dense<0.000000e+00> : vector<2x32xf32>
    %661 = tpu.matmul %658, %41, %cst_333 {dimension_numbers = #tpu.dot_dimension_numbers<[1], [0], [0], [1], [0, 0, 1, 1], [], []>} : vector<2x32xbf16>, vector<32x32xbf16>, vector<2x32xf32> -> vector<2x32xf32>
    %662 = arith.addf %655, %661 : vector<2x32xf32>
    %cst_334 = arith.constant dense<0.000000e+00> : vector<2x32xf32>
    %663 = tpu.matmul %658, %43, %cst_334 {dimension_numbers = #tpu.dot_dimension_numbers<[1], [0], [0], [1], [0, 0, 1, 1], [], []>} : vector<2x32xbf16>, vector<32x32xbf16>, vector<2x32xf32> -> vector<2x32xf32>
    %664 = arith.addf %656, %663 : vector<2x32xf32>
    %cst_335 = arith.constant dense<0.000000e+00> : vector<2x32xf32>
    %665 = tpu.matmul %658, %45, %cst_335 {dimension_numbers = #tpu.dot_dimension_numbers<[1], [0], [0], [1], [0, 0, 1, 1], [], []>} : vector<2x32xbf16>, vector<32x32xbf16>, vector<2x32xf32> -> vector<2x32xf32>
    %666 = arith.addf %657, %665 : vector<2x32xf32>
    %cst_336 = arith.constant 5.000000e-01 : f32
    %667 = vector.broadcast %cst_336 : f32 to vector<2x32xf32>
    %668 = arith.mulf %667, %660 : vector<2x32xf32>
    %669 = math.tanh %668 : vector<2x32xf32>
    %cst_337 = arith.constant 5.000000e-01 : f32
    %670 = vector.broadcast %cst_337 : f32 to vector<2x32xf32>
    %671 = arith.mulf %670, %669 : vector<2x32xf32>
    %cst_338 = arith.constant 5.000000e-01 : f32
    %672 = vector.broadcast %cst_338 : f32 to vector<2x32xf32>
    %673 = arith.addf %671, %672 : vector<2x32xf32>
    %cst_339 = arith.constant 5.000000e-01 : f32
    %674 = vector.broadcast %cst_339 : f32 to vector<2x32xf32>
    %675 = arith.mulf %674, %662 : vector<2x32xf32>
    %676 = math.tanh %675 : vector<2x32xf32>
    %cst_340 = arith.constant 5.000000e-01 : f32
    %677 = vector.broadcast %cst_340 : f32 to vector<2x32xf32>
    %678 = arith.mulf %677, %676 : vector<2x32xf32>
    %cst_341 = arith.constant 5.000000e-01 : f32
    %679 = vector.broadcast %cst_341 : f32 to vector<2x32xf32>
    %680 = arith.addf %678, %679 : vector<2x32xf32>
    %cst_342 = arith.constant 5.000000e-01 : f32
    %681 = vector.broadcast %cst_342 : f32 to vector<2x32xf32>
    %682 = arith.mulf %681, %666 : vector<2x32xf32>
    %683 = math.tanh %682 : vector<2x32xf32>
    %cst_343 = arith.constant 5.000000e-01 : f32
    %684 = vector.broadcast %cst_343 : f32 to vector<2x32xf32>
    %685 = arith.mulf %684, %683 : vector<2x32xf32>
    %cst_344 = arith.constant 5.000000e-01 : f32
    %686 = vector.broadcast %cst_344 : f32 to vector<2x32xf32>
    %687 = arith.addf %685, %686 : vector<2x32xf32>
    %688 = math.tanh %664 : vector<2x32xf32>
    %689 = arith.mulf %680, %593 : vector<2x32xf32>
    %690 = arith.mulf %673, %688 : vector<2x32xf32>
    %691 = arith.addf %689, %690 : vector<2x32xf32>
    %692 = math.tanh %691 : vector<2x32xf32>
    %693 = arith.mulf %687, %692 : vector<2x32xf32>
    %694 = arith.truncf %693 : vector<2x32xf32> to vector<2x32xbf16>
    %c0_345 = arith.constant 0 : index
    %c0_346 = arith.constant 0 : index
    %c0_347 = arith.constant 0 : index
    %695 = vector.load %arg7[%c0_345, %c0_346, %c0_347] : memref<4x32x32xbf16, #tpu.memory_space<vmem>>, vector<1x32x32xbf16>
    %696 = vector.shape_cast %695 : vector<1x32x32xbf16> to vector<32x32xbf16>
    %cst_348 = arith.constant dense<0.000000e+00> : vector<2x32xf32>
    %697 = tpu.matmul %694, %696, %cst_348 {dimension_numbers = #tpu.dot_dimension_numbers<[1], [0], [0], [1], [0, 0, 1, 1], [], []>} : vector<2x32xbf16>, vector<32x32xbf16>, vector<2x32xf32> -> vector<2x32xf32>
    %698 = vector.broadcast %55 : vector<1x32xf32> to vector<2x32xf32>
    %699 = arith.addf %697, %698 : vector<2x32xf32>
    %c1_349 = arith.constant 1 : index
    %c0_350 = arith.constant 0 : index
    %c0_351 = arith.constant 0 : index
    %700 = vector.load %arg7[%c1_349, %c0_350, %c0_351] : memref<4x32x32xbf16, #tpu.memory_space<vmem>>, vector<1x32x32xbf16>
    %701 = vector.shape_cast %700 : vector<1x32x32xbf16> to vector<32x32xbf16>
    %cst_352 = arith.constant dense<0.000000e+00> : vector<2x32xf32>
    %702 = tpu.matmul %694, %701, %cst_352 {dimension_numbers = #tpu.dot_dimension_numbers<[1], [0], [0], [1], [0, 0, 1, 1], [], []>} : vector<2x32xbf16>, vector<32x32xbf16>, vector<2x32xf32> -> vector<2x32xf32>
    %703 = vector.broadcast %57 : vector<1x32xf32> to vector<2x32xf32>
    %704 = arith.addf %702, %703 : vector<2x32xf32>
    %c2_353 = arith.constant 2 : index
    %c0_354 = arith.constant 0 : index
    %c0_355 = arith.constant 0 : index
    %705 = vector.load %arg7[%c2_353, %c0_354, %c0_355] : memref<4x32x32xbf16, #tpu.memory_space<vmem>>, vector<1x32x32xbf16>
    %706 = vector.shape_cast %705 : vector<1x32x32xbf16> to vector<32x32xbf16>
    %cst_356 = arith.constant dense<0.000000e+00> : vector<2x32xf32>
    %707 = tpu.matmul %694, %706, %cst_356 {dimension_numbers = #tpu.dot_dimension_numbers<[1], [0], [0], [1], [0, 0, 1, 1], [], []>} : vector<2x32xbf16>, vector<32x32xbf16>, vector<2x32xf32> -> vector<2x32xf32>
    %708 = vector.broadcast %59 : vector<1x32xf32> to vector<2x32xf32>
    %709 = arith.addf %707, %708 : vector<2x32xf32>
    %c3_357 = arith.constant 3 : index
    %c0_358 = arith.constant 0 : index
    %c0_359 = arith.constant 0 : index
    %710 = vector.load %arg7[%c3_357, %c0_358, %c0_359] : memref<4x32x32xbf16, #tpu.memory_space<vmem>>, vector<1x32x32xbf16>
    %711 = vector.shape_cast %710 : vector<1x32x32xbf16> to vector<32x32xbf16>
    %cst_360 = arith.constant dense<0.000000e+00> : vector<2x32xf32>
    %712 = tpu.matmul %694, %711, %cst_360 {dimension_numbers = #tpu.dot_dimension_numbers<[1], [0], [0], [1], [0, 0, 1, 1], [], []>} : vector<2x32xbf16>, vector<32x32xbf16>, vector<2x32xf32> -> vector<2x32xf32>
    %713 = vector.broadcast %61 : vector<1x32xf32> to vector<2x32xf32>
    %714 = arith.addf %712, %713 : vector<2x32xf32>
    %715 = arith.truncf %652 : vector<2x32xf32> to vector<2x32xbf16>
    %cst_361 = arith.constant dense<0.000000e+00> : vector<2x32xf32>
    %716 = tpu.matmul %715, %47, %cst_361 {dimension_numbers = #tpu.dot_dimension_numbers<[1], [0], [0], [1], [0, 0, 1, 1], [], []>} : vector<2x32xbf16>, vector<32x32xbf16>, vector<2x32xf32> -> vector<2x32xf32>
    %717 = arith.addf %699, %716 : vector<2x32xf32>
    %cst_362 = arith.constant dense<0.000000e+00> : vector<2x32xf32>
    %718 = tpu.matmul %715, %49, %cst_362 {dimension_numbers = #tpu.dot_dimension_numbers<[1], [0], [0], [1], [0, 0, 1, 1], [], []>} : vector<2x32xbf16>, vector<32x32xbf16>, vector<2x32xf32> -> vector<2x32xf32>
    %719 = arith.addf %704, %718 : vector<2x32xf32>
    %cst_363 = arith.constant dense<0.000000e+00> : vector<2x32xf32>
    %720 = tpu.matmul %715, %51, %cst_363 {dimension_numbers = #tpu.dot_dimension_numbers<[1], [0], [0], [1], [0, 0, 1, 1], [], []>} : vector<2x32xbf16>, vector<32x32xbf16>, vector<2x32xf32> -> vector<2x32xf32>
    %721 = arith.addf %709, %720 : vector<2x32xf32>
    %cst_364 = arith.constant dense<0.000000e+00> : vector<2x32xf32>
    %722 = tpu.matmul %715, %53, %cst_364 {dimension_numbers = #tpu.dot_dimension_numbers<[1], [0], [0], [1], [0, 0, 1, 1], [], []>} : vector<2x32xbf16>, vector<32x32xbf16>, vector<2x32xf32> -> vector<2x32xf32>
    %723 = arith.addf %714, %722 : vector<2x32xf32>
    %cst_365 = arith.constant 5.000000e-01 : f32
    %724 = vector.broadcast %cst_365 : f32 to vector<2x32xf32>
    %725 = arith.mulf %724, %717 : vector<2x32xf32>
    %726 = math.tanh %725 : vector<2x32xf32>
    %cst_366 = arith.constant 5.000000e-01 : f32
    %727 = vector.broadcast %cst_366 : f32 to vector<2x32xf32>
    %728 = arith.mulf %727, %726 : vector<2x32xf32>
    %cst_367 = arith.constant 5.000000e-01 : f32
    %729 = vector.broadcast %cst_367 : f32 to vector<2x32xf32>
    %730 = arith.addf %728, %729 : vector<2x32xf32>
    %cst_368 = arith.constant 5.000000e-01 : f32
    %731 = vector.broadcast %cst_368 : f32 to vector<2x32xf32>
    %732 = arith.mulf %731, %719 : vector<2x32xf32>
    %733 = math.tanh %732 : vector<2x32xf32>
    %cst_369 = arith.constant 5.000000e-01 : f32
    %734 = vector.broadcast %cst_369 : f32 to vector<2x32xf32>
    %735 = arith.mulf %734, %733 : vector<2x32xf32>
    %cst_370 = arith.constant 5.000000e-01 : f32
    %736 = vector.broadcast %cst_370 : f32 to vector<2x32xf32>
    %737 = arith.addf %735, %736 : vector<2x32xf32>
    %cst_371 = arith.constant 5.000000e-01 : f32
    %738 = vector.broadcast %cst_371 : f32 to vector<2x32xf32>
    %739 = arith.mulf %738, %723 : vector<2x32xf32>
    %740 = math.tanh %739 : vector<2x32xf32>
    %cst_372 = arith.constant 5.000000e-01 : f32
    %741 = vector.broadcast %cst_372 : f32 to vector<2x32xf32>
    %742 = arith.mulf %741, %740 : vector<2x32xf32>
    %cst_373 = arith.constant 5.000000e-01 : f32
    %743 = vector.broadcast %cst_373 : f32 to vector<2x32xf32>
    %744 = arith.addf %742, %743 : vector<2x32xf32>
    %745 = math.tanh %721 : vector<2x32xf32>
    %746 = arith.mulf %737, %650 : vector<2x32xf32>
    %747 = arith.mulf %730, %745 : vector<2x32xf32>
    %748 = arith.addf %746, %747 : vector<2x32xf32>
    %749 = math.tanh %748 : vector<2x32xf32>
    %750 = arith.mulf %744, %749 : vector<2x32xf32>
    %c12 = arith.constant 12 : index
    %c0_374 = arith.constant 0 : index
    %751 = vector.load %arg26[%c12, %c0_374] : memref<16x32xf32, #tpu.memory_space<vmem>>, vector<2x32xf32>
    tpu.vector_store %arg26[%c12, %c0_374], %750 {strides = array<i32>} : memref<16x32xf32, #tpu.memory_space<vmem>>, vector<2x32xf32>,
    %752 = vector.extract_strided_slice %16 {offsets = [14, 0], sizes = [2, 32], strides = [1, 1]} : vector<16x32xf32> to vector<2x32xf32>
    %753 = vector.extract_strided_slice %23 {offsets = [14, 0], sizes = [2, 32], strides = [1, 1]} : vector<16x32xf32> to vector<2x32xf32>
    %754 = vector.extract_strided_slice %30 {offsets = [14, 0], sizes = [2, 32], strides = [1, 1]} : vector<16x32xf32> to vector<2x32xf32>
    %755 = vector.extract_strided_slice %37 {offsets = [14, 0], sizes = [2, 32], strides = [1, 1]} : vector<16x32xf32> to vector<2x32xf32>
    %756 = arith.truncf %693 : vector<2x32xf32> to vector<2x32xbf16>
    %cst_375 = arith.constant dense<0.000000e+00> : vector<2x32xf32>
    %757 = tpu.matmul %756, %39, %cst_375 {dimension_numbers = #tpu.dot_dimension_numbers<[1], [0], [0], [1], [0, 0, 1, 1], [], []>} : vector<2x32xbf16>, vector<32x32xbf16>, vector<2x32xf32> -> vector<2x32xf32>
    %758 = arith.addf %752, %757 : vector<2x32xf32>
    %cst_376 = arith.constant dense<0.000000e+00> : vector<2x32xf32>
    %759 = tpu.matmul %756, %41, %cst_376 {dimension_numbers = #tpu.dot_dimension_numbers<[1], [0], [0], [1], [0, 0, 1, 1], [], []>} : vector<2x32xbf16>, vector<32x32xbf16>, vector<2x32xf32> -> vector<2x32xf32>
    %760 = arith.addf %753, %759 : vector<2x32xf32>
    %cst_377 = arith.constant dense<0.000000e+00> : vector<2x32xf32>
    %761 = tpu.matmul %756, %43, %cst_377 {dimension_numbers = #tpu.dot_dimension_numbers<[1], [0], [0], [1], [0, 0, 1, 1], [], []>} : vector<2x32xbf16>, vector<32x32xbf16>, vector<2x32xf32> -> vector<2x32xf32>
    %762 = arith.addf %754, %761 : vector<2x32xf32>
    %cst_378 = arith.constant dense<0.000000e+00> : vector<2x32xf32>
    %763 = tpu.matmul %756, %45, %cst_378 {dimension_numbers = #tpu.dot_dimension_numbers<[1], [0], [0], [1], [0, 0, 1, 1], [], []>} : vector<2x32xbf16>, vector<32x32xbf16>, vector<2x32xf32> -> vector<2x32xf32>
    %764 = arith.addf %755, %763 : vector<2x32xf32>
    %cst_379 = arith.constant 5.000000e-01 : f32
    %765 = vector.broadcast %cst_379 : f32 to vector<2x32xf32>
    %766 = arith.mulf %765, %758 : vector<2x32xf32>
    %767 = math.tanh %766 : vector<2x32xf32>
    %cst_380 = arith.constant 5.000000e-01 : f32
    %768 = vector.broadcast %cst_380 : f32 to vector<2x32xf32>
    %769 = arith.mulf %768, %767 : vector<2x32xf32>
    %cst_381 = arith.constant 5.000000e-01 : f32
    %770 = vector.broadcast %cst_381 : f32 to vector<2x32xf32>
    %771 = arith.addf %769, %770 : vector<2x32xf32>
    %cst_382 = arith.constant 5.000000e-01 : f32
    %772 = vector.broadcast %cst_382 : f32 to vector<2x32xf32>
    %773 = arith.mulf %772, %760 : vector<2x32xf32>
    %774 = math.tanh %773 : vector<2x32xf32>
    %cst_383 = arith.constant 5.000000e-01 : f32
    %775 = vector.broadcast %cst_383 : f32 to vector<2x32xf32>
    %776 = arith.mulf %775, %774 : vector<2x32xf32>
    %cst_384 = arith.constant 5.000000e-01 : f32
    %777 = vector.broadcast %cst_384 : f32 to vector<2x32xf32>
    %778 = arith.addf %776, %777 : vector<2x32xf32>
    %cst_385 = arith.constant 5.000000e-01 : f32
    %779 = vector.broadcast %cst_385 : f32 to vector<2x32xf32>
    %780 = arith.mulf %779, %764 : vector<2x32xf32>
    %781 = math.tanh %780 : vector<2x32xf32>
    %cst_386 = arith.constant 5.000000e-01 : f32
    %782 = vector.broadcast %cst_386 : f32 to vector<2x32xf32>
    %783 = arith.mulf %782, %781 : vector<2x32xf32>
    %cst_387 = arith.constant 5.000000e-01 : f32
    %784 = vector.broadcast %cst_387 : f32 to vector<2x32xf32>
    %785 = arith.addf %783, %784 : vector<2x32xf32>
    %786 = math.tanh %762 : vector<2x32xf32>
    %787 = arith.mulf %778, %691 : vector<2x32xf32>
    %788 = arith.mulf %771, %786 : vector<2x32xf32>
    %789 = arith.addf %787, %788 : vector<2x32xf32>
    %790 = math.tanh %789 : vector<2x32xf32>
    %791 = arith.mulf %785, %790 : vector<2x32xf32>
    %792 = arith.truncf %791 : vector<2x32xf32> to vector<2x32xbf16>
    %c0_388 = arith.constant 0 : index
    %c0_389 = arith.constant 0 : index
    %c0_390 = arith.constant 0 : index
    %793 = vector.load %arg7[%c0_388, %c0_389, %c0_390] : memref<4x32x32xbf16, #tpu.memory_space<vmem>>, vector<1x32x32xbf16>
    %794 = vector.shape_cast %793 : vector<1x32x32xbf16> to vector<32x32xbf16>
    %cst_391 = arith.constant dense<0.000000e+00> : vector<2x32xf32>
    %795 = tpu.matmul %792, %794, %cst_391 {dimension_numbers = #tpu.dot_dimension_numbers<[1], [0], [0], [1], [0, 0, 1, 1], [], []>} : vector<2x32xbf16>, vector<32x32xbf16>, vector<2x32xf32> -> vector<2x32xf32>
    %796 = vector.broadcast %55 : vector<1x32xf32> to vector<2x32xf32>
    %797 = arith.addf %795, %796 : vector<2x32xf32>
    %c1_392 = arith.constant 1 : index
    %c0_393 = arith.constant 0 : index
    %c0_394 = arith.constant 0 : index
    %798 = vector.load %arg7[%c1_392, %c0_393, %c0_394] : memref<4x32x32xbf16, #tpu.memory_space<vmem>>, vector<1x32x32xbf16>
    %799 = vector.shape_cast %798 : vector<1x32x32xbf16> to vector<32x32xbf16>
    %cst_395 = arith.constant dense<0.000000e+00> : vector<2x32xf32>
    %800 = tpu.matmul %792, %799, %cst_395 {dimension_numbers = #tpu.dot_dimension_numbers<[1], [0], [0], [1], [0, 0, 1, 1], [], []>} : vector<2x32xbf16>, vector<32x32xbf16>, vector<2x32xf32> -> vector<2x32xf32>
    %801 = vector.broadcast %57 : vector<1x32xf32> to vector<2x32xf32>
    %802 = arith.addf %800, %801 : vector<2x32xf32>
    %c2_396 = arith.constant 2 : index
    %c0_397 = arith.constant 0 : index
    %c0_398 = arith.constant 0 : index
    %803 = vector.load %arg7[%c2_396, %c0_397, %c0_398] : memref<4x32x32xbf16, #tpu.memory_space<vmem>>, vector<1x32x32xbf16>
    %804 = vector.shape_cast %803 : vector<1x32x32xbf16> to vector<32x32xbf16>
    %cst_399 = arith.constant dense<0.000000e+00> : vector<2x32xf32>
    %805 = tpu.matmul %792, %804, %cst_399 {dimension_numbers = #tpu.dot_dimension_numbers<[1], [0], [0], [1], [0, 0, 1, 1], [], []>} : vector<2x32xbf16>, vector<32x32xbf16>, vector<2x32xf32> -> vector<2x32xf32>
    %806 = vector.broadcast %59 : vector<1x32xf32> to vector<2x32xf32>
    %807 = arith.addf %805, %806 : vector<2x32xf32>
    %c3_400 = arith.constant 3 : index
    %c0_401 = arith.constant 0 : index
    %c0_402 = arith.constant 0 : index
    %808 = vector.load %arg7[%c3_400, %c0_401, %c0_402] : memref<4x32x32xbf16, #tpu.memory_space<vmem>>, vector<1x32x32xbf16>
    %809 = vector.shape_cast %808 : vector<1x32x32xbf16> to vector<32x32xbf16>
    %cst_403 = arith.constant dense<0.000000e+00> : vector<2x32xf32>
    %810 = tpu.matmul %792, %809, %cst_403 {dimension_numbers = #tpu.dot_dimension_numbers<[1], [0], [0], [1], [0, 0, 1, 1], [], []>} : vector<2x32xbf16>, vector<32x32xbf16>, vector<2x32xf32> -> vector<2x32xf32>
    %811 = vector.broadcast %61 : vector<1x32xf32> to vector<2x32xf32>
    %812 = arith.addf %810, %811 : vector<2x32xf32>
    %813 = arith.truncf %750 : vector<2x32xf32> to vector<2x32xbf16>
    %cst_404 = arith.constant dense<0.000000e+00> : vector<2x32xf32>
    %814 = tpu.matmul %813, %47, %cst_404 {dimension_numbers = #tpu.dot_dimension_numbers<[1], [0], [0], [1], [0, 0, 1, 1], [], []>} : vector<2x32xbf16>, vector<32x32xbf16>, vector<2x32xf32> -> vector<2x32xf32>
    %815 = arith.addf %797, %814 : vector<2x32xf32>
    %cst_405 = arith.constant dense<0.000000e+00> : vector<2x32xf32>
    %816 = tpu.matmul %813, %49, %cst_405 {dimension_numbers = #tpu.dot_dimension_numbers<[1], [0], [0], [1], [0, 0, 1, 1], [], []>} : vector<2x32xbf16>, vector<32x32xbf16>, vector<2x32xf32> -> vector<2x32xf32>
    %817 = arith.addf %802, %816 : vector<2x32xf32>
    %cst_406 = arith.constant dense<0.000000e+00> : vector<2x32xf32>
    %818 = tpu.matmul %813, %51, %cst_406 {dimension_numbers = #tpu.dot_dimension_numbers<[1], [0], [0], [1], [0, 0, 1, 1], [], []>} : vector<2x32xbf16>, vector<32x32xbf16>, vector<2x32xf32> -> vector<2x32xf32>
    %819 = arith.addf %807, %818 : vector<2x32xf32>
    %cst_407 = arith.constant dense<0.000000e+00> : vector<2x32xf32>
    %820 = tpu.matmul %813, %53, %cst_407 {dimension_numbers = #tpu.dot_dimension_numbers<[1], [0], [0], [1], [0, 0, 1, 1], [], []>} : vector<2x32xbf16>, vector<32x32xbf16>, vector<2x32xf32> -> vector<2x32xf32>
    %821 = arith.addf %812, %820 : vector<2x32xf32>
    %cst_408 = arith.constant 5.000000e-01 : f32
    %822 = vector.broadcast %cst_408 : f32 to vector<2x32xf32>
    %823 = arith.mulf %822, %815 : vector<2x32xf32>
    %824 = math.tanh %823 : vector<2x32xf32>
    %cst_409 = arith.constant 5.000000e-01 : f32
    %825 = vector.broadcast %cst_409 : f32 to vector<2x32xf32>
    %826 = arith.mulf %825, %824 : vector<2x32xf32>
    %cst_410 = arith.constant 5.000000e-01 : f32
    %827 = vector.broadcast %cst_410 : f32 to vector<2x32xf32>
    %828 = arith.addf %826, %827 : vector<2x32xf32>
    %cst_411 = arith.constant 5.000000e-01 : f32
    %829 = vector.broadcast %cst_411 : f32 to vector<2x32xf32>
    %830 = arith.mulf %829, %817 : vector<2x32xf32>
    %831 = math.tanh %830 : vector<2x32xf32>
    %cst_412 = arith.constant 5.000000e-01 : f32
    %832 = vector.broadcast %cst_412 : f32 to vector<2x32xf32>
    %833 = arith.mulf %832, %831 : vector<2x32xf32>
    %cst_413 = arith.constant 5.000000e-01 : f32
    %834 = vector.broadcast %cst_413 : f32 to vector<2x32xf32>
    %835 = arith.addf %833, %834 : vector<2x32xf32>
    %cst_414 = arith.constant 5.000000e-01 : f32
    %836 = vector.broadcast %cst_414 : f32 to vector<2x32xf32>
    %837 = arith.mulf %836, %821 : vector<2x32xf32>
    %838 = math.tanh %837 : vector<2x32xf32>
    %cst_415 = arith.constant 5.000000e-01 : f32
    %839 = vector.broadcast %cst_415 : f32 to vector<2x32xf32>
    %840 = arith.mulf %839, %838 : vector<2x32xf32>
    %cst_416 = arith.constant 5.000000e-01 : f32
    %841 = vector.broadcast %cst_416 : f32 to vector<2x32xf32>
    %842 = arith.addf %840, %841 : vector<2x32xf32>
    %843 = math.tanh %819 : vector<2x32xf32>
    %844 = arith.mulf %835, %748 : vector<2x32xf32>
    %845 = arith.mulf %828, %843 : vector<2x32xf32>
    %846 = arith.addf %844, %845 : vector<2x32xf32>
    %847 = math.tanh %846 : vector<2x32xf32>
    %848 = arith.mulf %842, %847 : vector<2x32xf32>
    %c14 = arith.constant 14 : index
    %c0_417 = arith.constant 0 : index
    %849 = vector.load %arg26[%c14, %c0_417] : memref<16x32xf32, #tpu.memory_space<vmem>>, vector<2x32xf32>
    tpu.vector_store %arg26[%c14, %c0_417], %848 {strides = array<i32>} : memref<16x32xf32, #tpu.memory_space<vmem>>, vector<2x32xf32>,
    %c0_418 = arith.constant 0 : index
    %c0_419 = arith.constant 0 : index
    %850 = vector.load %arg22[%c0_418, %c0_419] : memref<2x32xf32, #tpu.memory_space<vmem>>, vector<2x32xf32>
    tpu.vector_store %arg22[%c0_418, %c0_419], %791 {strides = array<i32>} : memref<2x32xf32, #tpu.memory_space<vmem>>, vector<2x32xf32>,
    %c0_420 = arith.constant 0 : index
    %c0_421 = arith.constant 0 : index
    %851 = vector.load %arg23[%c0_420, %c0_421] : memref<2x32xf32, #tpu.memory_space<vmem>>, vector<2x32xf32>
    tpu.vector_store %arg23[%c0_420, %c0_421], %789 {strides = array<i32>} : memref<2x32xf32, #tpu.memory_space<vmem>>, vector<2x32xf32>,
    %c0_422 = arith.constant 0 : index
    %c0_423 = arith.constant 0 : index
    %852 = vector.load %arg24[%c0_422, %c0_423] : memref<2x32xf32, #tpu.memory_space<vmem>>, vector<2x32xf32>
    tpu.vector_store %arg24[%c0_422, %c0_423], %848 {strides = array<i32>} : memref<2x32xf32, #tpu.memory_space<vmem>>, vector<2x32xf32>,
    %c0_424 = arith.constant 0 : index
    %c0_425 = arith.constant 0 : index
    %853 = vector.load %arg25[%c0_424, %c0_425] : memref<2x32xf32, #tpu.memory_space<vmem>>, vector<2x32xf32>
    tpu.vector_store %arg25[%c0_424, %c0_425], %846 {strides = array<i32>} : memref<2x32xf32, #tpu.memory_space<vmem>>, vector<2x32xf32>,
    %c0_426 = arith.constant 0 : index
    %c0_427 = arith.constant 0 : index
    %854 = vector.load %arg26[%c0_426, %c0_427] : memref<16x32xf32, #tpu.memory_space<vmem>>, vector<16x32xf32>
    %855 = arith.truncf %854 : vector<16x32xf32> to vector<16x32xbf16>
    %c0_428 = arith.constant 0 : index
    %c0_429 = arith.constant 0 : index
    %856 = vector.load %arg12[%c0_428, %c0_429] : memref<32x32xbf16, #tpu.memory_space<vmem>>, vector<32x32xbf16>
    %cst_430 = arith.constant dense<0.000000e+00> : vector<16x32xf32>
    %857 = tpu.matmul %855, %856, %cst_430 {dimension_numbers = #tpu.dot_dimension_numbers<[1], [0], [0], [1], [0, 0, 1, 1], [], []>} : vector<16x32xbf16>, vector<32x32xbf16>, vector<16x32xf32> -> vector<16x32xf32>
    %c0_431 = arith.constant 0 : index
    %c0_432 = arith.constant 0 : index
    %858 = vector.load %arg13[%c0_431, %c0_432] : memref<1x32xf32, #tpu.memory_space<vmem>>, vector<1x32xf32>
    %859 = vector.broadcast %858 : vector<1x32xf32> to vector<16x32xf32>
    %860 = arith.addf %857, %859 : vector<16x32xf32>
    %861 = math.tanh %860 : vector<16x32xf32>
    %862 = arith.truncf %861 : vector<16x32xf32> to vector<16x32xbf16>
    %c0_433 = arith.constant 0 : index
    %c0_434 = arith.constant 0 : index
    %863 = vector.load %arg14[%c0_433, %c0_434] : memref<32x40xbf16, #tpu.memory_space<vmem>>, vector<32x40xbf16>
    %cst_435 = arith.constant dense<0.000000e+00> : vector<16x40xf32>
    %864 = tpu.matmul %862, %863, %cst_435 {dimension_numbers = #tpu.dot_dimension_numbers<[1], [0], [0], [1], [0, 0, 1, 1], [], []>} : vector<16x32xbf16>, vector<32x40xbf16>, vector<16x40xf32> -> vector<16x40xf32>
    %c0_436 = arith.constant 0 : index
    %c0_437 = arith.constant 0 : index
    %865 = vector.load %arg15[%c0_436, %c0_437] : memref<1x40xf32, #tpu.memory_space<vmem>>, vector<1x40xf32>
    %866 = vector.broadcast %865 : vector<1x40xf32> to vector<16x40xf32>
    %867 = arith.addf %864, %866 : vector<16x40xf32>
    %c0_438 = arith.constant 0 : index
    %c0_439 = arith.constant 0 : index
    %868 = vector.load %arg16[%c0_438, %c0_439] : memref<32x4xbf16, #tpu.memory_space<vmem>>, vector<32x4xbf16>
    %cst_440 = arith.constant dense<0.000000e+00> : vector<16x4xf32>
    %869 = tpu.matmul %855, %868, %cst_440 {dimension_numbers = #tpu.dot_dimension_numbers<[1], [0], [0], [1], [0, 0, 1, 1], [], []>} : vector<16x32xbf16>, vector<32x4xbf16>, vector<16x4xf32> -> vector<16x4xf32>
    %cst_441 = arith.constant dense<0xFF800000> : vector<16xf32>
    %870 = vector.multi_reduction <maximumf>, %869, %cst_441 [1] : vector<16x4xf32> to vector<16xf32>
    %871 = vector.shape_cast %870 : vector<16xf32> to vector<16x1xf32>
    %872 = vector.broadcast %871 : vector<16x1xf32> to vector<16x4xf32>
    %873 = arith.subf %869, %872 : vector<16x4xf32>
    %874 = math.exp %873 : vector<16x4xf32>
    %cst_442 = arith.constant dense<0.000000e+00> : vector<16xf32>
    %875 = vector.multi_reduction <add>, %874, %cst_442 [1] : vector<16x4xf32> to vector<16xf32>
    %876 = vector.shape_cast %875 : vector<16xf32> to vector<16x1xf32>
    %877 = tpu.reciprocal %876 {approx = true} : vector<16x1xf32> -> vector<16x1xf32>
    %878 = vector.broadcast %877 : vector<16x1xf32> to vector<16x4xf32>
    %879 = arith.mulf %874, %878 : vector<16x4xf32>
    %cst_443 = arith.constant 9.99999993E-9 : f32
    %880 = vector.broadcast %cst_443 : f32 to vector<16x4xf32>
    %881 = arith.addf %879, %880 : vector<16x4xf32>
    %882 = math.log %881 : vector<16x4xf32>
    %c0_444 = arith.constant 0 : index
    %c0_445 = arith.constant 0 : index
    %883 = vector.load %arg19[%c0_444, %c0_445] : memref<16x4xf32, #tpu.memory_space<vmem>>, vector<16x4xf32>
    tpu.vector_store %arg19[%c0_444, %c0_445], %882 {strides = array<i32>} : memref<16x4xf32, #tpu.memory_space<vmem>>, vector<16x4xf32>,
    %c0_446 = arith.constant 0 : index
    %c0_447 = arith.constant 0 : index
    %884 = vector.load %arg17[%c0_446, %c0_447] : memref<40x4xf32, #tpu.memory_space<vmem>>, vector<40x4xf32>
    %c0_448 = arith.constant 0 : index
    %c0_449 = arith.constant 0 : index
    %885 = vector.load %arg18[%c0_448, %c0_449] : memref<4x40xf32, #tpu.memory_space<vmem>>, vector<4x40xf32>
    %886 = vector.extract_strided_slice %885 {offsets = [0, 0], sizes = [1, 40], strides = [1, 1]} : vector<4x40xf32> to vector<1x40xf32>
    %cst_450 = arith.constant 5.000000e-01 : f32
    %887 = vector.broadcast %cst_450 : f32 to vector<1x40xf32>
    %888 = arith.cmpf ogt, %886, %887 : vector<1x40xf32>
    %cst_451 = arith.constant -1.000000e+30 : f32
    %889 = vector.shape_cast %888 : vector<1x40xi1> to vector<1x40xi1>
    %890 = vector.broadcast %889 : vector<1x40xi1> to vector<16x40xi1>
    %891 = vector.broadcast %cst_451 : f32 to vector<16x40xf32>
    %892 = arith.select %890, %867, %891 : vector<16x40xi1>, vector<16x40xf32>
    %cst_452 = arith.constant dense<0xFF800000> : vector<16xf32>
    %893 = vector.multi_reduction <maximumf>, %892, %cst_452 [1] : vector<16x40xf32> to vector<16xf32>
    %894 = vector.shape_cast %893 : vector<16xf32> to vector<16x1xf32>
    %895 = vector.broadcast %894 : vector<16x1xf32> to vector<16x40xf32>
    %896 = vector.broadcast %886 : vector<1x40xf32> to vector<16x40xf32>
    %897 = arith.mulf %895, %896 : vector<16x40xf32>
    %898 = vector.extract_strided_slice %885 {offsets = [1, 0], sizes = [1, 40], strides = [1, 1]} : vector<4x40xf32> to vector<1x40xf32>
    %cst_453 = arith.constant 5.000000e-01 : f32
    %899 = vector.broadcast %cst_453 : f32 to vector<1x40xf32>
    %900 = arith.cmpf ogt, %898, %899 : vector<1x40xf32>
    %cst_454 = arith.constant -1.000000e+30 : f32
    %901 = vector.shape_cast %900 : vector<1x40xi1> to vector<1x40xi1>
    %902 = vector.broadcast %901 : vector<1x40xi1> to vector<16x40xi1>
    %903 = vector.broadcast %cst_454 : f32 to vector<16x40xf32>
    %904 = arith.select %902, %867, %903 : vector<16x40xi1>, vector<16x40xf32>
    %cst_455 = arith.constant dense<0xFF800000> : vector<16xf32>
    %905 = vector.multi_reduction <maximumf>, %904, %cst_455 [1] : vector<16x40xf32> to vector<16xf32>
    %906 = vector.shape_cast %905 : vector<16xf32> to vector<16x1xf32>
    %907 = vector.broadcast %906 : vector<16x1xf32> to vector<16x40xf32>
    %908 = vector.broadcast %898 : vector<1x40xf32> to vector<16x40xf32>
    %909 = arith.mulf %907, %908 : vector<16x40xf32>
    %910 = vector.extract_strided_slice %885 {offsets = [2, 0], sizes = [1, 40], strides = [1, 1]} : vector<4x40xf32> to vector<1x40xf32>
    %cst_456 = arith.constant 5.000000e-01 : f32
    %911 = vector.broadcast %cst_456 : f32 to vector<1x40xf32>
    %912 = arith.cmpf ogt, %910, %911 : vector<1x40xf32>
    %cst_457 = arith.constant -1.000000e+30 : f32
    %913 = vector.shape_cast %912 : vector<1x40xi1> to vector<1x40xi1>
    %914 = vector.broadcast %913 : vector<1x40xi1> to vector<16x40xi1>
    %915 = vector.broadcast %cst_457 : f32 to vector<16x40xf32>
    %916 = arith.select %914, %867, %915 : vector<16x40xi1>, vector<16x40xf32>
    %cst_458 = arith.constant dense<0xFF800000> : vector<16xf32>
    %917 = vector.multi_reduction <maximumf>, %916, %cst_458 [1] : vector<16x40xf32> to vector<16xf32>
    %918 = vector.shape_cast %917 : vector<16xf32> to vector<16x1xf32>
    %919 = vector.broadcast %918 : vector<16x1xf32> to vector<16x40xf32>
    %920 = vector.broadcast %910 : vector<1x40xf32> to vector<16x40xf32>
    %921 = arith.mulf %919, %920 : vector<16x40xf32>
    %922 = vector.extract_strided_slice %885 {offsets = [3, 0], sizes = [1, 40], strides = [1, 1]} : vector<4x40xf32> to vector<1x40xf32>
    %cst_459 = arith.constant 5.000000e-01 : f32
    %923 = vector.broadcast %cst_459 : f32 to vector<1x40xf32>
    %924 = arith.cmpf ogt, %922, %923 : vector<1x40xf32>
    %cst_460 = arith.constant -1.000000e+30 : f32
    %925 = vector.shape_cast %924 : vector<1x40xi1> to vector<1x40xi1>
    %926 = vector.broadcast %925 : vector<1x40xi1> to vector<16x40xi1>
    %927 = vector.broadcast %cst_460 : f32 to vector<16x40xf32>
    %928 = arith.select %926, %867, %927 : vector<16x40xi1>, vector<16x40xf32>
    %cst_461 = arith.constant dense<0xFF800000> : vector<16xf32>
    %929 = vector.multi_reduction <maximumf>, %928, %cst_461 [1] : vector<16x40xf32> to vector<16xf32>
    %930 = vector.shape_cast %929 : vector<16xf32> to vector<16x1xf32>
    %931 = vector.broadcast %930 : vector<16x1xf32> to vector<16x40xf32>
    %932 = vector.broadcast %922 : vector<1x40xf32> to vector<16x40xf32>
    %933 = arith.mulf %931, %932 : vector<16x40xf32>
    %934 = arith.addf %897, %909 : vector<16x40xf32>
    %935 = arith.addf %921, %933 : vector<16x40xf32>
    %936 = arith.addf %934, %935 : vector<16x40xf32>
    %937 = arith.subf %867, %936 : vector<16x40xf32>
    %938 = math.exp %937 : vector<16x40xf32>
    %cst_462 = arith.constant dense<0.000000e+00> : vector<16x4xf32>
    %939 = tpu.matmul %938, %884, %cst_462 {dimension_numbers = #tpu.dot_dimension_numbers<[1], [0], [0], [1], [0, 0, 1, 1], [], []>} : vector<16x40xf32>, vector<40x4xf32>, vector<16x4xf32> -> vector<16x4xf32>
    %cst_463 = arith.constant dense<0.000000e+00> : vector<16x40xf32>
    %940 = tpu.matmul %939, %885, %cst_463 {dimension_numbers = #tpu.dot_dimension_numbers<[1], [0], [0], [1], [0, 0, 1, 1], [], []>} : vector<16x4xf32>, vector<4x40xf32>, vector<16x40xf32> -> vector<16x40xf32>
    %941 = tpu.reciprocal %940 {approx = true} : vector<16x40xf32> -> vector<16x40xf32>
    %942 = arith.mulf %938, %941 : vector<16x40xf32>
    %cst_464 = arith.constant 9.99999993E-9 : f32
    %943 = vector.broadcast %cst_464 : f32 to vector<16x40xf32>
    %944 = arith.addf %942, %943 : vector<16x40xf32>
    %945 = math.log %944 : vector<16x40xf32>
    %c0_465 = arith.constant 0 : index
    %c0_466 = arith.constant 0 : index
    %946 = vector.load %arg20[%c0_465, %c0_466] : memref<16x40xf32, #tpu.memory_space<vmem>>, vector<16x40xf32>
    tpu.vector_store %arg20[%c0_465, %c0_466], %945 {strides = array<i32>} : memref<16x40xf32, #tpu.memory_space<vmem>>, vector<16x40xf32>,
    %cst_467 = arith.constant dense<0.000000e+00> : vector<16x40xf32>
    %947 = tpu.matmul %879, %885, %cst_467 {dimension_numbers = #tpu.dot_dimension_numbers<[1], [0], [0], [1], [0, 0, 1, 1], [], []>} : vector<16x4xf32>, vector<4x40xf32>, vector<16x40xf32> -> vector<16x40xf32>
    %948 = arith.mulf %942, %947 : vector<16x40xf32>
    %c0_468 = arith.constant 0 : index
    %c0_469 = arith.constant 0 : index
    %949 = vector.load %arg21[%c0_468, %c0_469] : memref<16x40xf32, #tpu.memory_space<vmem>>, vector<16x40xf32>
    tpu.vector_store %arg21[%c0_468, %c0_469], %948 {strides = array<i32>} : memref<16x40xf32, #tpu.memory_space<vmem>>, vector<16x40xf32>,
    return
  }
}

</mosaic_0001>

<bundles_post_ra>
// kernel: rnn_model_forward.1
= control target key start
LH: loop header
LB: loop body
LE: loop exit
PB: predicated region body
PF: predicated region fallthrough
CT: control target
= control target key end

     0   :  { %s5216_s0 = inlined_call_operand.vmem [shape: s32[16,1], index: 0, kind: input, shape index: {}]   ;;  %s5217_s1 = inlined_call_operand.vmem [shape: bf16[40,32], index: 1, kind: input, shape index: {}]   ;;  %s5218_s2 = inlined_call_operand.vmem [shape: bf16[4,32,32], index: 2, kind: input, shape index: {}]   ;;  %s5219_s3 = inlined_call_operand.hbm [shape: bf16[4,32,32], index: 3, kind: input, shape index: {}]   ;;  %s5220_s4 = inlined_call_operand.vmem [shape: f32[4,1,32], index: 4, kind: input, shape index: {}]   ;;  %s5221_s5 = inlined_call_operand.vmem [shape: f32[2,32], index: 5, kind: input, shape index: {}]   ;;  %s5222_s6 = inlined_call_operand.vmem [shape: f32[2,32], index: 6, kind: input, shape index: {}]   ;;  %s5223_s7 = inlined_call_operand.hbm [shape: bf16[4,32,32], index: 7, kind: input, shape index: {}]   ;;  %s5224_s8 = inlined_call_operand.hbm [shape: bf16[4,32,32], index: 8, kind: input, shape index: {}]   ;;  %s5225_s9 = inlined_call_operand.vmem [shape: f32[4,1,32], index: 9, kind: input, shape index: {}]   ;;  %s5226_s10 = inlined_call_operand.vmem [shape: f32[2,32], index: 10, kind: input, shape index: {}]   ;;  %s5227_s11 = inlined_call_operand.vmem [shape: f32[2,32], index: 11, kind: input, shape index: {}]   ;;  %s5228_s12 = inlined_call_operand.vmem [shape: bf16[32,32], index: 12, kind: input, shape index: {}]   ;;  %s5229_s13 = inlined_call_operand.vmem [shape: f32[1,32], index: 13, kind: input, shape index: {}]   ;;  %s5230_s14 = inlined_call_operand.vmem [shape: bf16[32,40], index: 14, kind: input, shape index: {}]   ;;  %s5231_s15 = inlined_call_operand.hbm [shape: f32[1,40], index: 15, kind: input, shape index: {}]   ;;  %s5232_s16 = inlined_call_operand.vmem [shape: bf16[32,4], index: 16, kind: input, shape index: {}]   ;;  %s5233_s17 = inlined_call_operand.vmem [shape: f32[40,4], index: 17, kind: input, shape index: {}]   ;;  %s5234_s18 = inlined_call_operand.vmem [shape: f32[4,40], index: 18, kind: input, shape index: {}]   ;;  %s5235_s19 = inlined_call_operand.vmem [shape: f32[16,4], index: 19, kind: output, shape index: {0}]   ;;  %s5236_s20 = inlined_call_operand.hbm [shape: f32[16,40], index: 20, kind: output, shape index: {1}]   ;;  %s5237_s21 = inlined_call_operand.hbm [shape: f32[16,40], index: 21, kind: output, shape index: {2}]   ;;  %s5238_s22 = inlined_call_operand.hbm [shape: f32[2,32], index: 22, kind: output, shape index: {3}]   ;;  %s5239_s23 = inlined_call_operand.hbm [shape: f32[2,32], index: 23, kind: output, shape index: {4}]   ;;  %s5240_s24 = inlined_call_operand.hbm [shape: f32[2,32], index: 24, kind: output, shape index: {5}]   ;;  %s5241_s25 = inlined_call_operand.hbm [shape: f32[2,32], index: 25, kind: output, shape index: {6}]  }
   0x1   :  { %5247 = sst [smem:[#allocation27_spill]] %s5216_s0 }
   0x2   :  { %5248 = sst [smem:[#allocation28_spill]] %s5217_s1 }
   0x3   :  { %5249 = sst [smem:[#allocation29_spill]] %s5218_s2 }
   0x4   :  { %5250 = sst [smem:[#allocation30_spill]] %s5219_s3 }
   0x5   :  { %5251 = sst [smem:[#allocation31_spill]] %s5220_s4 }
   0x6   :  { %5252 = sst [smem:[#allocation32_spill]] %s5221_s5 }
   0x7   :  { %5253 = sst [smem:[#allocation33_spill]] %s5222_s6 }
   0x8   :  { %5254 = sst [smem:[#allocation34_spill]] %s5223_s7 }
   0x9   :  { %5255 = sst [smem:[#allocation35_spill]] %s5224_s8 }
   0xa   :  { %5256 = sst [smem:[#allocation36_spill]] %s5225_s9 }
   0xb   :  { %5257 = sst [smem:[#allocation37_spill]] %s5236_s20 }
   0xc   :  { %5258 = sst [smem:[#allocation38_spill]] %s5237_s21 }
   0xd   :  { %5259 = sst [smem:[#allocation39_spill]] %s5238_s22 }
   0xe   :  { %31 = vsyncpa [#allocation4], 0 }
   0xf   :  { %32 = vsyncpa [#allocation7], 0 }
  0x10   :  { %33 = vsyncpa [#allocation10], 0 }
  0x11   :  { %34 = vsyncpa [#allocation5], 0 }
  0x12   :  { %35 = vsyncpa [#allocation13], 0 }
  0x13   :  { %36 = vsyncpa [#allocation16], 0 }
  0x14   :  { %37 = vsyncpa [#allocation19], 0  ;;  %s5260_s6 = sld [smem:[#allocation34_spill]]  ;;  %s4334_s7 = smov [#allocation6]  }
  0x15   :  { %s69_s3 = sshll.u32 %s4334_s7, 4  ;;  %s5261_s8 = sld [smem:[#allocation30_spill]]  ;;  %s70_s3 = int_to_ptr.vmem [resolvable:$true] %s69_s3 }
  0x16   :  { %s4335_s4 = smov 64   ;;  %s4336_s28 = smov 4  }
  0x17   :  { %s4337_s9 = smov [#allocation3]   ;;  %s5262_s22 = sld [smem:[#allocation35_spill]] }
  0x18   :  { %s50_s5 = sshll.u32 %s4337_s9, 4  ;;  %s4338_s7 = smov [#allocation8]   ;;  %s51_s5 = int_to_ptr.vmem [resolvable:$true] %s50_s5 }
  0x19   :  { %s82_s26 = sshll.u32 %s4338_s7, 4  ;;  %s83_s26 = int_to_ptr.vmem [resolvable:$true] %s82_s26 }
  0x1a   :  { %s67_s30 = sshll.u32 %s5260_s6, 4  ;;  %s106_s6 = sshll.u32 %s5231_s15, 4  ;;  %s68_s30 = int_to_ptr.hbm [resolvable:$true] %s67_s30  ;;  %s107_s6 = int_to_ptr.hbm [resolvable:$true] %s106_s6 }
  0x1b   :  { %s48_s27 = sshll.u32 %s5261_s8, 4  ;;  %s49_s27 = int_to_ptr.hbm [resolvable:$true] %s48_s27 }
  0x1c   :  { %75 = dma.hbm_to_vmem [thread:$0]  %s68_s30, 1024, %s70_s3, [#allocation7], %s4335_s4, %s4335_s4, %s4336_s28  }
  0x1d   :  { %s80_s21 = sshll.u32 %s5262_s22, 4  ;;  %s4339_s30 = smov [#allocation9]   ;;  %s81_s21 = int_to_ptr.hbm [resolvable:$true] %s80_s21 }
  0x1e   :  { %56 = dma.hbm_to_vmem [thread:$0]  %s49_s27, 1024, %s51_s5, [#allocation4], %s4335_s4, %s4335_s4, %s4336_s28  }
  0x1f   :  { %88 = dma.hbm_to_vmem [thread:$0]  %s81_s21, 1024, %s83_s26, [#allocation7], %s4335_s4, %s4335_s4, %s4336_s28  }
  0x20   :  { %s108_s3 = sshll.u32 %s4339_s30, 4  ;;  %s109_s3 = int_to_ptr.vmem [resolvable:$true] %s108_s3 }
  0x21   :  { %111 = dma.hbm_to_vmem [thread:$0]  %s107_s6, 16, %s109_s3, [#allocation10]  }
  0x22   :  { %4320 = dma.done.wait [#allocation4], 1024  }
  0x23   :  { %4321 = vsyncadd [#allocation4], 4294966272 }
  0x24   :  { %4322 = dma.done.wait [#allocation7], 2048  }
  0x25   :  { %4323 = vsyncadd [#allocation7], 4294965248 }
  0x26   :  { %4324 = dma.done.wait [#allocation10], 16  }
  0x27   :  { %4325 = vsyncadd [#allocation10], 4294967280  ;;  %v4340_v0 = vmov 0   ;;  %s5263_s22 = sld [smem:[#allocation27_spill]]  ;;  %vm176_vm0 = vcmask 1043456   ;;  %v137_v9 = vlaneseq  ;;  %v4341_v13 = vmov 0.0  }
  0x28   :  { %3857 = vset.pattern.permute.xlu0 %v4340_v0  ;;  %s5264_s4 = sld [smem:[#allocation28_spill]]  ;;  %vm172_vm3 = vcmask 326656   ;;  %v4528_v23 = vld [vmem:[#allocation3 + $0x28] sm:$0xff]  ;;  %v4532_v25 = vld [vmem:[#allocation3 + $0x18] sm:$0xff]  ;;  %v4538_v27 = vld [vmem:[#allocation3 + $0x20] sm:$0xff]  ;;  %vm215_vm4 = vcmask 261120  }
  0x29   :  { %v138_v11 = vand.u32 127, %v137_v9  ;;  %s5265_s6 = sld [smem:[#allocation29_spill]]  ;;  %v4530_v24 = vld [vmem:[#allocation3 + $0x8] sm:$0xff]  ;;  %v4542_v28 = vld [vmem:[#allocation3] sm:$0xff]  ;;  %v4544_v29 = vld [vmem:[#allocation3 + $0x10] sm:$0xff]  ;;  %vm777_vm5 = vcmask 254976  }
  0x2a   :  { %s5266_s5 = sld [smem:[#allocation32_spill]]  ;;  %v4556_v35 = vld [vmem:[#allocation3 + $0x38] sm:$0xff]  ;;  %v4562_v37 = vld [vmem:[#allocation3 + $0x30] sm:$0xff]  ;;  %v3767_v44 = vld [vmem:[#allocation6 + $0x8] sm:$0xff]  ;;  %vm2795_vm6 = vcmask 261126   ;;  %vm2910_vm12 = vcmask 31744  }
  0x2b   :  { %v3769_v45 = vld [vmem:[#allocation6 + $0x18] sm:$0xff]  ;;  %v3771_v46 = vld [vmem:[#allocation6 + $0x28] sm:$0xff]  ;;  %s5267_s7 = sld [smem:[#allocation31_spill]]  ;;  %v3766_v52 = vld [vmem:[#allocation6] sm:$0xff]  ;;  %s4342_s30 = smov [#allocation15]  }
  0x2c   :  { %v3773_v48 = vld [vmem:[#allocation6 + $0x38] sm:$0xff]  ;;  %v3768_v53 = vld [vmem:[#allocation6 + $0x10] sm:$0xff]  ;;  %v3770_v54 = vld [vmem:[#allocation6 + $0x20] sm:$0xff]  ;;  %s5268_s8 = sld [smem:[#allocation33_spill]]  ;;  %s3163_s3 = sshll.u32 %s4342_s30, 4  ;;  %s3164_s3 = int_to_ptr.vmem [resolvable:$true] %s3163_s3 }
  0x2d   :  { %v135_v1 = vld [vmem:[%s5263_s22] sm:$0xff]  ;;  %v136_v2 = vld [vmem:[%s5263_s22 + $0x8] sm:$0xff]  ;;  %s5269_s9 = sld [smem:[#allocation36_spill]]  ;;  %s3165_s15 = sshll.u32 %s5239_s23, 4  ;;  %s3166_s15 = int_to_ptr.hbm [resolvable:$true] %s3165_s15 }
  0x2e   :  { %140 = vperm.xlu0 %3857, %v135_v1   ;;  %v156_v3 = vld [vmem:[%s5264_s4 + $0x10] sm:$0xf]  ;;  %v3741_v7 = vld [vmem:[%s5264_s4 + $0x8] sm:$0xff]  ;;  %v3740_v8 = vld [vmem:[%s5264_s4] sm:$0xff]  ;;  %s4344_s21 = smov [#allocation18]   ;;  %s4345_s23 = smov [#allocation12]  }
  0x2f   :  { %v166_v4 = vunpack.c.l.b16 %v156_v3  ;;  %v3743_v17 = vld [vmem:[%s5265_s6 + $0x8] sm:$0xff]  ;;  %v3745_v18 = vld [vmem:[%s5265_s6 + $0x18] sm:$0xff]  ;;  %v3742_v20 = vld [vmem:[%s5265_s6] sm:$0xff]  ;;  %s5279_s29 = sld [smem:[#allocation39_spill]] }
  0x30   :  { %v3747_v19 = vld [vmem:[%s5265_s6 + $0x28] sm:$0xff]  ;;  %225 = vmatpush.bf16.msra.mxu1 %v3743_v17  ;;  %261 = vmatpush.bf16.msra.mxu2 %v3745_v18  ;;  %v3744_v21 = vld [vmem:[%s5265_s6 + $0x10] sm:$0xff]  ;;  %v3746_v22 = vld [vmem:[%s5265_s6 + $0x20] sm:$0xff] }
  0x31   :  { %v169_v5 = vpack.c.b16 %v166_v4, %v166_v4  ;;  %297 = vmatpush.bf16.msra.mxu3 %v3747_v19  ;;  %v3749_v26 = vld [vmem:[%s5265_s6 + $0x38] sm:$0xff]  ;;  %v386_v30 = vld [vmem:[%s5266_s5] sm:$0x3]  ;;  %v3748_v31 = vld [vmem:[%s5265_s6 + $0x30] sm:$0xff]  ;;  %s4349_s6 = smov [#allocation11]  }
  0x32   :  { %v390_v32 = vpack.c.bf16 %v386_v30, %v386_v30  ;;  %v3858_v50 = vld [vmem:[%s5267_s7] ss:$0 sm:$0xff]  ;;  %v3859_v55 = vld [vmem:[%s5267_s7 + $0x1] ss:$0 sm:$0xff]  ;;  %v3860_v57 = vld [vmem:[%s5267_s7 + $0x2] ss:$0 sm:$0xff] }
  0x33   :  { %v178_v6 = vsel %vm176_vm0, %v169_v5, 0  ;;  %v3772_v56 = vld [vmem:[#allocation6 + $0x30] sm:$0xff]  ;;  %v4591_v1 = vld [vmem:[#allocation8 + $0x8] sm:$0xff]  ;;  %s3125_s26 = sshll.u32 %s4349_s6, 4  ;;  %s3126_s26 = int_to_ptr.vmem [resolvable:$true] %s3125_s26 }
  0x34   :  { %185 = vmatpush.bf16.msra.mxu0 %v178_v6  ;;  %226 = vmatpush.bf16.msra.mxu1 %v3742_v20  ;;  %v4598_v5 = vld [vmem:[#allocation8 + $0x28] sm:$0xff]  ;;  %v4600_v6 = vld [vmem:[#allocation8 + $0x38] sm:$0xff]  ;;  %v4606_v9 = vld [vmem:[#allocation8 + $0x10] sm:$0xff] }
  0x35   :  { %262 = vmatpush.bf16.msra.mxu2 %v3744_v21  ;;  %298 = vmatpush.bf16.msra.mxu3 %v3746_v22  ;;  %s3154_s2 = sshll.u32 %s5279_s29, 4  ;;  %s3155_s2 = int_to_ptr.hbm [resolvable:$true] %s3154_s2 }
  0x36   :  { %143 = vperm.xlu0 %3857, %v136_v2   ;;  %v4593_v2 = vld [vmem:[#allocation8 + $0x18] sm:$0xff] }
  0x38   :  { %186 = vmatpush.bf16.msra.mxu0 %v3741_v7  ;;  %333 = vmatpush.bf16.msrb.mxu1 %v3749_v26 }
  0x39   :  { %412 = vmatpush.bf16.msrb.mxu2 %v4530_v24  ;;  %438 = vmatpush.bf16.msrb.mxu3 %v4532_v25 }
  0x3c   :  { %187 = vmatpush.bf16.msra.mxu0 %v3740_v8  ;;  %334 = vmatpush.bf16.msrb.mxu1 %v3748_v31  ;;  %v4604_v8 = vld [vmem:[#allocation8] sm:$0xff] }
  0x3d   :  { %413 = vmatpush.bf16.msrb.mxu2 %v4542_v28  ;;  %439 = vmatpush.bf16.msrb.mxu3 %v4544_v29 }
  0x40   :  { %464 = vmatpush.bf16.msrb.mxu0 %v4528_v23 }
  0x44   :  { %465 = vmatpush.bf16.msrb.mxu0 %v4538_v27 }
  0xa0   :  { %v141_v10 = vpop.permute.xlu0 %140 }
  0xa1   :  { %vm145_vm1 = vcmp.eq.s32.totalorder %v138_v11, %v141_v10 }
  0xa2   :  { %v3224_v14 = vsel %vm145_vm1, 1.0, %v4341_v13 }
  0xa8   :  { %v144_v12 = vpop.permute.xlu0 %143 }
  0xa9   :  { %vm146_vm2 = vcmp.eq.s32.totalorder %v138_v11, %v144_v12  ;;  %v4610_v11 = vld [vmem:[#allocation8 + $0x20] sm:$0xff]  ;;  %v4612_v12 = vld [vmem:[#allocation8 + $0x30] sm:$0xff] }
  0xaa   :  { %v3225_v15 = vsel %vm146_vm2, 1.0, %v4341_v13 }
  0xab   :  { %v151_v16 = vpack.c.bf16 %v3225_v15, %v3224_v14  ;;  %v3861_v14 = vld [vmem:[%s5267_s7 + $0x3] ss:$0 sm:$0xff] }
  0xad   :  { %3234 = vmatmul.msk.bf16.vlgmr.msra.gmra.mxu0 %vm172_vm3, %v151_v16 }
  0xae   :  { %611 = vmatpush.bf16.msra.mxu0 %v3771_v46 }
  0xb2   :  { %612 = vmatpush.bf16.msra.mxu0 %v3770_v54 }
  0xbd   :  { %3315 = vmatmul.msk.bf16.vlgmr.msrb.gmra.mxu0 %vm215_vm4, %v390_v32 }
  0xbe   :  { %725 = vmatpush.bf16.msrb.mxu0 %v4598_v5 }
  0xc2   :  { %726 = vmatpush.bf16.msrb.mxu0 %v4610_v11 }
 0x12a   :  { %v189_v33 = vpop.f32.mrf.mxu0 }
 0x132   :  { %v191_v34 = vpop.f32.mrf.mxu0 }
 0x133   :  { %v194_v36 = vpack.c.bf16 %v191_v34, %v189_v33 }
 0x135   :  { %3243 = vmatmul.msk.bf16.vlgmr.msra.gmra.mxu1 %vm215_vm4, %v194_v36  ;;  %3257 = vmatmul.msk.bf16.vlgmr.msra.gmra.mxu2 %vm215_vm4, %v194_v36 }
 0x136   :  { %3271 = vmatmul.msk.bf16.vlgmr.msra.gmra.mxu3 %vm215_vm4, %v194_v36  ;;  %490 = vmatpush.bf16.msra.mxu1 %v4556_v35 }
 0x137   :  { %545 = vmatpush.bf16.msra.mxu2 %v3767_v44  ;;  %578 = vmatpush.bf16.msra.mxu3 %v3769_v45 }
 0x13a   :  { %491 = vmatpush.bf16.msra.mxu1 %v4562_v37  ;;  %v467_v38 = vpop.f32.mrf.mxu0 }
 0x13b   :  { %546 = vmatpush.bf16.msra.mxu2 %v3766_v52  ;;  %579 = vmatpush.bf16.msra.mxu3 %v3768_v53 }
 0x142   :  { %v469_v39 = vpop.f32.mrf.mxu0 }
 0x145   :  { %3285 = vmatmul.msk.bf16.vlgmr.msrb.gmra.mxu1 %vm215_vm4, %v194_v36  ;;  %3297 = vmatmul.msk.bf16.vlgmr.msrb.gmra.mxu2 %vm215_vm4, %v390_v32 }
 0x146   :  { %3306 = vmatmul.msk.bf16.vlgmr.msrb.gmra.mxu3 %vm215_vm4, %v390_v32  ;;  %644 = vmatpush.bf16.msrb.mxu1 %v3773_v48 }
 0x147   :  { %673 = vmatpush.bf16.msrb.mxu2 %v4591_v1  ;;  %699 = vmatpush.bf16.msrb.mxu3 %v4593_v2 }
 0x14a   :  { %645 = vmatpush.bf16.msrb.mxu1 %v3772_v56 }
 0x14b   :  { %674 = vmatpush.bf16.msrb.mxu2 %v4604_v8  ;;  %700 = vmatpush.bf16.msrb.mxu3 %v4606_v9 }
 0x155   :  { %3324 = vmatmul.msk.bf16.vlgmr.msra.gmra.mxu1 %vm215_vm4, %v390_v32  ;;  %v388_v32 = vld [vmem:[%s5268_s8] sm:$0x3] }
 0x156   :  { %751 = vmatpush.bf16.msra.mxu1 %v4600_v6 }
 0x15a   :  { %752 = vmatpush.bf16.msra.mxu1 %v4612_v12 }
 0x1b2   :  { %v228_v40 = vpop.f32.mrf.mxu1 }
 0x1b3   :  { %v4584_v58 = vadd.f32 %v3858_v50, %v228_v40  ;;  %v387_v50 = vld [vmem:[%s5226_s10] sm:$0x3]  ;;  %s4346_s10 = smov [#allocation14]  }
 0x1b4   :  { %s3152_s28 = sshll.u32 %s4346_s10, 4  ;;  %s3153_s28 = int_to_ptr.vmem [resolvable:$true] %s3152_s28 }
 0x1b8   :  { %v264_v41 = vpop.f32.mrf.mxu2 }
 0x1b9   :  { %v300_v42 = vpop.f32.mrf.mxu3  ;;  %v4586_v59 = vadd.f32 %v3859_v55, %v264_v41 }
 0x1ba   :  { %v4569_v43 = vpop.f32.mrf.mxu1  ;;  %v4588_v61 = vadd.f32 %v3860_v57, %v300_v42 }
 0x1bc   :  { %v471_v13 = vadd.f32 %v467_v38, %v4588_v61 }
 0x1c0   :  { %v4571_v47 = vpop.f32.mrf.mxu2 }
 0x1c1   :  { %v4573_v49 = vpop.f32.mrf.mxu3 }
 0x1c2   :  { %v336_v51 = vpop.f32.mrf.mxu1 }
 0x1c3   :  { %v4622_v16 = vadd.f32 %v3861_v14, %v336_v51  ;;  %v651_v51 = vpack.c.bf16 %v387_v50, %v387_v50  ;;  %v4672_v14 = vld [vmem:[%s5269_s9 + $0x3] ss:$0 sm:$0xff]  ;;  %v3779_v50 = vld [vmem:[#allocation6 + $0x28] sm:$0xff] }
 0x1c8   :  { %v415_v60 = vpop.f32.mrf.mxu2 }
 0x1c9   :  { %v419_v62 = vadd.f32 %v415_v60, %v4584_v58  ;;  %v441_v63 = vpop.f32.mrf.mxu3 }
 0x1ca   :  { %v445_v3 = vadd.f32 %v441_v63, %v4586_v59  ;;  %v4596_v4 = vpop.f32.mrf.mxu1  ;;  %v4657_v63 = vld [vmem:[%s5269_s9] ss:$0 sm:$0xff] }
 0x1cb   :  { %v498_v7 = vmul.f32 0.5, %v419_v62 }
 0x1cc   :  { %v502_v10 = vmul.f32 0.5, %v445_v3  ;;  %v4662_v3 = vld [vmem:[%s5269_s9 + $0x1] ss:$0 sm:$0xff] }
 0x1cd   :  { %3868 = vtanh.f32 %v498_v7 }
 0x1ce   :  { %3870 = vtanh.f32 %v502_v10 }
 0x1cf   :  { %3872 = vtanh.f32 %v471_v13  ;;  %v4667_v13 = vld [vmem:[%s5269_s9 + $0x2] ss:$0 sm:$0xff] }
 0x1d0   :  { %v417_v15 = vpop.f32.mrf.mxu2 }
 0x1d1   :  { %v443_v17 = vpop.f32.mrf.mxu3 }
 0x1d2   :  { %v493_v18 = vpop.f32.mrf.mxu1 }
 0x1d3   :  { %v3869_v19 = vpop.eup %3868  ;;  %v497_v20 = vadd.f32 %v493_v18, %v4622_v16 }
 0x1d4   :  { %v3871_v21 = vpop.eup %3870  ;;  %v500_v22 = vmul.f32 0.5, %v3869_v19 }
 0x1d5   :  { %v504_v26 = vmul.f32 0.5, %v3871_v21  ;;  %v506_v30 = vmul.f32 0.5, %v497_v20  ;;  %v3873_v33 = vpop.eup %3872 }
 0x1d6   :  { %v501_v31 = vadd.f32 0.5, %v500_v22 }
 0x1d7   :  { %v505_v34 = vadd.f32 0.5, %v504_v26  ;;  %3874 = vtanh.f32 %v506_v30 }
 0x1d8   :  { %v512_v36 = vmul.f32 %v3873_v33, %v501_v31 }
 0x1d9   :  { %v511_v38 = vmul.f32 %v505_v34, %v388_v32 }
 0x1da   :  { %v495_v39 = vpop.f32.mrf.mxu1 }
 0x1db   :  { %v4628_v40 = vadd.f32 %v512_v36, %v511_v38 }
 0x1dd   :  { %v3875_v41 = vpop.eup %3874  ;;  %3876 = vtanh.f32 %v4628_v40 }
 0x1de   :  { %v508_v42 = vmul.f32 0.5, %v3875_v41 }
 0x1e0   :  { %v509_v44 = vadd.f32 0.5, %v508_v42 }
 0x1e3   :  { %v3877_v45 = vpop.eup %3876 }
 0x1e4   :  { %v515_v46 = vmul.f32 %v3877_v45, %v509_v44 }
 0x1e6   :  { %v516_v48 = vpack.c.bf16 %v515_v46, %v515_v46  ;;  %v3775_v46 = vld [vmem:[#allocation6 + $0x8] sm:$0xff] }
 0x1e8   :  { %3333 = vmatmul.msk.bf16.vlgmr.msra.gmra.mxu2 %vm215_vm4, %v516_v48  ;;  %3342 = vmatmul.msk.bf16.vlgmr.msra.gmra.mxu3 %vm215_vm4, %v516_v48 }
 0x1e9   :  { %3351 = vmatmul.msk.bf16.vlgmr.msra.gmra.mxu0 %vm215_vm4, %v516_v48  ;;  %3360 = vmatmul.msk.bf16.vlgmr.msrb.gmra.mxu1 %vm215_vm4, %v516_v48 }
 0x1ea   :  { %785 = vmatpush.bf16.msra.mxu2 %v4530_v24  ;;  %802 = vmatpush.bf16.msra.mxu3 %v4532_v25 }
 0x1eb   :  { %819 = vmatpush.bf16.msra.mxu0 %v4528_v23  ;;  %836 = vmatpush.bf16.msrb.mxu1 %v4556_v35 }
 0x1ee   :  { %786 = vmatpush.bf16.msra.mxu2 %v4542_v28  ;;  %803 = vmatpush.bf16.msra.mxu3 %v4544_v29 }
 0x1ef   :  { %820 = vmatpush.bf16.msra.mxu0 %v4538_v27  ;;  %837 = vmatpush.bf16.msrb.mxu1 %v4562_v37 }
 0x1f8   :  { %3369 = vmatmul.msk.bf16.vlgmr.msrb.gmra.mxu2 %vm215_vm4, %v651_v51  ;;  %3378 = vmatmul.msk.bf16.vlgmr.msrb.gmra.mxu3 %vm215_vm4, %v651_v51 }
 0x1f9   :  { %3387 = vmatmul.msk.bf16.vlgmr.msrb.gmra.mxu0 %vm215_vm4, %v651_v51  ;;  %3396 = vmatmul.msk.bf16.vlgmr.msra.gmra.mxu1 %vm215_vm4, %v651_v51 }
 0x1fa   :  { %896 = vmatpush.bf16.msrb.mxu2 %v3775_v46  ;;  %954 = vmatpush.bf16.msrb.mxu0 %v3779_v50 }
 0x208   :  { %3397 = vmatmul.msk.bf16.vlgmr.msra.gmra.mxu2 %vm215_vm4, %v516_v48  ;;  %3398 = vmatmul.msk.bf16.vlgmr.msra.gmra.mxu3 %vm215_vm4, %v516_v48 }
 0x209   :  { %3399 = vmatmul.msk.bf16.vlgmr.msra.gmra.mxu0 %vm215_vm4, %v516_v48  ;;  %3400 = vmatmul.msk.bf16.vlgmr.msrb.gmra.mxu1 %vm215_vm4, %v516_v48  ;;  %v3777_v48 = vld [vmem:[#allocation6 + $0x18] sm:$0xff] }
 0x20a   :  { %925 = vmatpush.bf16.msrb.mxu3 %v3777_v48 }
 0x266   :  { %v614_v52 = vpop.f32.mrf.mxu0  ;;  %v647_v53 = vpop.f32.mrf.mxu1 }
 0x267   :  { %v615_v22 = vadd.f32 %v4667_v13, %v614_v52  ;;  %v648_v26 = vadd.f32 %v4672_v14, %v647_v53  ;;  %v3781_v53 = vld [vmem:[#allocation6 + $0x38] sm:$0xff] }
 0x268   :  { %983 = vmatpush.bf16.msra.mxu1 %v3781_v53 }
 0x26b   :  { %v548_v54 = vpop.f32.mrf.mxu2  ;;  %v581_v55 = vpop.f32.mrf.mxu3 }
 0x26c   :  { %v549_v15 = vadd.f32 %v4657_v63, %v548_v54  ;;  %v582_v17 = vadd.f32 %v4662_v3, %v581_v55 }
 0x26e   :  { %v616_v56 = vpop.f32.mrf.mxu0  ;;  %v649_v57 = vpop.f32.mrf.mxu1 }
 0x26f   :  { %v389_v56 = vld [vmem:[%s5227_s11] sm:$0x3]  ;;  %s5280_s11 = sld [smem:[#allocation37_spill]] }
 0x273   :  { %v550_v60 = vpop.f32.mrf.mxu2  ;;  %v583_v62 = vpop.f32.mrf.mxu3 }
 0x274   :  { %v3774_v62 = vld [vmem:[#allocation6] sm:$0xff] }
 0x275   :  { %897 = vmatpush.bf16.msrb.mxu2 %v3774_v62  ;;  %s3127_s20 = sshll.u32 %s5280_s11, 4  ;;  %s3128_s20 = int_to_ptr.hbm [resolvable:$true] %s3127_s20 }
 0x276   :  { %v728_v7 = vpop.f32.mrf.mxu0  ;;  %v754_v10 = vpop.f32.mrf.mxu1 }
 0x277   :  { %v732_v34 = vadd.f32 %v728_v7, %v615_v22  ;;  %v758_v36 = vadd.f32 %v754_v10, %v648_v26  ;;  %v3776_v7 = vld [vmem:[#allocation6 + $0x10] sm:$0xff]  ;;  %v3778_v10 = vld [vmem:[#allocation6 + $0x20] sm:$0xff] }
 0x278   :  { %926 = vmatpush.bf16.msrb.mxu3 %v3776_v7  ;;  %955 = vmatpush.bf16.msrb.mxu0 %v3778_v10  ;;  %v861_v10 = vrot.slane %v4628_v40, 6 }
 0x279   :  { %v767_v41 = vmul.f32 0.5, %v758_v36  ;;  %1000 = vmatpush.bf16.msra.mxu2 %v4591_v1 }
 0x27b   :  { %v676_v18 = vpop.f32.mrf.mxu2  ;;  %v702_v19 = vpop.f32.mrf.mxu3 }
 0x27c   :  { %v680_v20 = vadd.f32 %v676_v18, %v549_v15  ;;  %v706_v21 = vadd.f32 %v702_v19, %v582_v17  ;;  %v3780_v19 = vld [vmem:[#allocation6 + $0x30] sm:$0xff]  ;;  %1014 = vmatpush.bf16.msra.mxu3 %v4593_v2  ;;  %1028 = vmatpush.bf16.msra.mxu0 %v4598_v5 }
 0x27d   :  { %984 = vmatpush.bf16.msra.mxu1 %v3780_v19  ;;  %1001 = vmatpush.bf16.msra.mxu2 %v4604_v8 }
 0x27e   :  { %v759_v30 = vmul.f32 0.5, %v680_v20  ;;  %v763_v31 = vmul.f32 0.5, %v706_v21  ;;  %v730_v32 = vpop.f32.mrf.mxu0  ;;  %v756_v33 = vpop.f32.mrf.mxu1 }
 0x280   :  { %3878 = vtanh.f32 %v759_v30  ;;  %1015 = vmatpush.bf16.msra.mxu3 %v4606_v9  ;;  %1029 = vmatpush.bf16.msra.mxu0 %v4610_v11 }
 0x281   :  { %3880 = vtanh.f32 %v763_v31  ;;  %1042 = vmatpush.bf16.msrb.mxu1 %v4600_v6 }
 0x282   :  { %3882 = vtanh.f32 %v732_v34 }
 0x283   :  { %v678_v38 = vpop.f32.mrf.mxu2  ;;  %v704_v39 = vpop.f32.mrf.mxu3  ;;  %3884 = vtanh.f32 %v767_v41 }
 0x285   :  { %1043 = vmatpush.bf16.msrb.mxu1 %v4612_v12 }
 0x286   :  { %v3879_v42 = vpop.eup %3878  ;;  %v822_v44 = vpop.f32.mrf.mxu0 }
 0x287   :  { %v839_v45 = vpop.f32.mrf.mxu1  ;;  %v3881_v51 = vpop.eup %3880  ;;  %v761_v52 = vmul.f32 0.5, %v3879_v42  ;;  %v827_v26 = vrot.slane %v822_v44, 6 }
 0x288   :  { %v765_v54 = vmul.f32 0.5, %v3881_v51  ;;  %v3883_v57 = vpop.eup %3882  ;;  %v844_v32 = vrot.slane %v839_v45, 6 }
 0x289   :  { %v762_v55 = vadd.f32 0.5, %v761_v52  ;;  %v3885_v30 = vpop.eup %3884  ;;  %v829_v44 = vadd.f32 %v827_v26, %v4588_v61 }
 0x28a   :  { %v766_v60 = vadd.f32 0.5, %v765_v54  ;;  %v769_v42 = vmul.f32 0.5, %v3885_v30  ;;  %v846_v45 = vadd.f32 %v844_v32, %v4622_v16 }
 0x28b   :  { %v773_v15 = vmul.f32 %v3883_v57, %v762_v55  ;;  %v788_v17 = vpop.f32.mrf.mxu2  ;;  %v805_v18 = vpop.f32.mrf.mxu3 }
 0x28c   :  { %v772_v20 = vmul.f32 %v766_v60, %v389_v56  ;;  %v793_v21 = vrot.slane %v788_v17, 6  ;;  %v810_v22 = vrot.slane %v805_v18, 6  ;;  %v770_v50 = vadd.f32 0.5, %v769_v42 }
 0x28d   :  { %v855_v52 = vmul.f32 0.5, %v846_v45 }
 0x28e   :  { %v4681_v31 = vadd.f32 %v773_v15, %v772_v20  ;;  %v795_v33 = vadd.f32 %v793_v21, %v4584_v58  ;;  %v812_v34 = vadd.f32 %v810_v22, %v4586_v59  ;;  %v824_v36 = vpop.f32.mrf.mxu0 }
 0x28f   :  { %v841_v38 = vpop.f32.mrf.mxu1 }
 0x290   :  { %3886 = vtanh.f32 %v4681_v31  ;;  %v847_v39 = vmul.f32 0.5, %v795_v33  ;;  %v851_v41 = vmul.f32 0.5, %v812_v34 }
 0x292   :  { %3888 = vtanh.f32 %v847_v39 }
 0x293   :  { %3890 = vtanh.f32 %v851_v41  ;;  %v790_v46 = vpop.f32.mrf.mxu2  ;;  %v807_v48 = vpop.f32.mrf.mxu3 }
 0x294   :  { %3892 = vtanh.f32 %v829_v44 }
 0x295   :  { %3894 = vtanh.f32 %v855_v52 }
 0x296   :  { %v3887_v51 = vpop.eup %3886 }
 0x297   :  { %v776_v53 = vmul.f32 %v3887_v51, %v770_v50 }
 0x298   :  { %v3889_v54 = vpop.eup %3888 }
 0x299   :  { %v3891_v55 = vpop.eup %3890  ;;  %v849_v56 = vmul.f32 0.5, %v3889_v54  ;;  %778 = vst.msk [vmem:[#allocation2] sm:$0x3] %vm777_vm5, %v776_v53  ;;  %v990_v40 = vpack.c.bf16 %v776_v53, %v776_v53 }
 0x29a   :  { %v853_v57 = vmul.f32 0.5, %v3891_v55  ;;  %v3893_v62 = vpop.eup %3892 }
 0x29b   :  { %v850_v60 = vadd.f32 0.5, %v849_v56  ;;  %v3895_v18 = vpop.eup %3894 }
 0x29c   :  { %v854_v7 = vadd.f32 0.5, %v853_v57  ;;  %v857_v20 = vmul.f32 0.5, %v3895_v18 }
 0x29d   :  { %v864_v15 = vmul.f32 %v3893_v62, %v850_v60 }
 0x29e   :  { %v863_v17 = vmul.f32 %v861_v10, %v854_v7  ;;  %v858_v21 = vadd.f32 0.5, %v857_v20 }
 0x2a0   :  { %v4698_v19 = vadd.f32 %v864_v15, %v863_v17 }
 0x2a2   :  { %3896 = vtanh.f32 %v4698_v19 }
 0x2a8   :  { %v3897_v22 = vpop.eup %3896 }
 0x2a9   :  { %v867_v26 = vmul.f32 %v3897_v22, %v858_v21 }
 0x2ab   :  { %v868_v30 = vpack.c.bf16 %v867_v26, %v867_v26 }
 0x2ad   :  { %v874_v32 = vrot.slane %v868_v30, 1  ;;  %v3783_v30 = vld [vmem:[#allocation6 + $0x8] sm:$0xff] }
 0x2af   :  { %3409 = vmatmul.msk.bf16.vlgmr.msrb.gmra.mxu2 %vm215_vm4, %v874_v32  ;;  %3418 = vmatmul.msk.bf16.vlgmr.msrb.gmra.mxu3 %vm215_vm4, %v874_v32 }
 0x2b0   :  { %3427 = vmatmul.msk.bf16.vlgmr.msrb.gmra.mxu0 %vm215_vm4, %v874_v32  ;;  %3436 = vmatmul.msk.bf16.vlgmr.msra.gmra.mxu1 %vm215_vm4, %v874_v32 }
 0x2b1   :  { %1075 = vmatpush.bf16.msrb.mxu2 %v4530_v24  ;;  %1092 = vmatpush.bf16.msrb.mxu3 %v4532_v25 }
 0x2b2   :  { %1109 = vmatpush.bf16.msrb.mxu0 %v4528_v23  ;;  %1126 = vmatpush.bf16.msra.mxu1 %v4556_v35 }
 0x2b5   :  { %1076 = vmatpush.bf16.msrb.mxu2 %v4542_v28  ;;  %1093 = vmatpush.bf16.msrb.mxu3 %v4544_v29 }
 0x2b6   :  { %1110 = vmatpush.bf16.msrb.mxu0 %v4538_v27  ;;  %1127 = vmatpush.bf16.msra.mxu1 %v4562_v37 }
 0x2bf   :  { %3437 = vmatmul.msk.bf16.vlgmr.msra.gmra.mxu2 %vm215_vm4, %v990_v40  ;;  %3438 = vmatmul.msk.bf16.vlgmr.msra.gmra.mxu3 %vm215_vm4, %v990_v40 }
 0x2c0   :  { %3439 = vmatmul.msk.bf16.vlgmr.msra.gmra.mxu0 %vm215_vm4, %v990_v40  ;;  %3440 = vmatmul.msk.bf16.vlgmr.msrb.gmra.mxu1 %vm215_vm4, %v990_v40  ;;  %v3787_v40 = vld [vmem:[#allocation6 + $0x28] sm:$0xff] }
 0x2c1   :  { %1186 = vmatpush.bf16.msra.mxu2 %v3783_v30  ;;  %1244 = vmatpush.bf16.msra.mxu0 %v3787_v40 }
 0x2cf   :  { %3441 = vmatmul.msk.bf16.vlgmr.msrb.gmra.mxu2 %vm215_vm4, %v874_v32  ;;  %3442 = vmatmul.msk.bf16.vlgmr.msrb.gmra.mxu3 %vm215_vm4, %v874_v32 }
 0x2d0   :  { %3443 = vmatmul.msk.bf16.vlgmr.msrb.gmra.mxu0 %vm215_vm4, %v874_v32  ;;  %3444 = vmatmul.msk.bf16.vlgmr.msra.gmra.mxu1 %vm215_vm4, %v874_v32  ;;  %v3785_v32 = vld [vmem:[#allocation6 + $0x18] sm:$0xff] }
 0x2d1   :  { %1215 = vmatpush.bf16.msra.mxu3 %v3785_v32 }
 0x32d   :  { %v957_v33 = vpop.f32.mrf.mxu0  ;;  %v986_v34 = vpop.f32.mrf.mxu1 }
 0x32e   :  { %v958_v55 = vadd.f32 %v4667_v13, %v957_v33  ;;  %v987_v56 = vadd.f32 %v4672_v14, %v986_v34 }
 0x332   :  { %v899_v36 = vpop.f32.mrf.mxu2  ;;  %v928_v38 = vpop.f32.mrf.mxu3 }
 0x333   :  { %v900_v48 = vadd.f32 %v4657_v63, %v899_v36  ;;  %v929_v50 = vadd.f32 %v4662_v3, %v928_v38  ;;  %v3789_v36 = vld [vmem:[#allocation6 + $0x38] sm:$0xff] }
 0x334   :  { %1273 = vmatpush.bf16.msrb.mxu1 %v3789_v36 }
 0x335   :  { %v959_v39 = vpop.f32.mrf.mxu0  ;;  %v988_v41 = vpop.f32.mrf.mxu1 }
 0x33a   :  { %v901_v42 = vpop.f32.mrf.mxu2  ;;  %v930_v44 = vpop.f32.mrf.mxu3 }
 0x33b   :  { %v3782_v44 = vld [vmem:[#allocation6] sm:$0xff] }
 0x33c   :  { %1187 = vmatpush.bf16.msra.mxu2 %v3782_v44 }
 0x33d   :  { %v1031_v45 = vpop.f32.mrf.mxu0  ;;  %v1045_v46 = vpop.f32.mrf.mxu1 }
 0x33e   :  { %v1035_v10 = vadd.f32 %v1031_v45, %v958_v55  ;;  %v1049_v15 = vadd.f32 %v1045_v46, %v987_v56  ;;  %v3784_v45 = vld [vmem:[#allocation6 + $0x10] sm:$0xff]  ;;  %v3786_v46 = vld [vmem:[#allocation6 + $0x20] sm:$0xff] }
 0x33f   :  { %1216 = vmatpush.bf16.msra.mxu3 %v3784_v45  ;;  %1245 = vmatpush.bf16.msra.mxu0 %v3786_v46  ;;  %v1151_v46 = vrot.slane %v4698_v19, 6 }
 0x340   :  { %v1058_v20 = vmul.f32 0.5, %v1049_v15  ;;  %1290 = vmatpush.bf16.msrb.mxu2 %v4591_v1 }
 0x342   :  { %v1003_v51 = vpop.f32.mrf.mxu2  ;;  %v1017_v52 = vpop.f32.mrf.mxu3 }
 0x343   :  { %v1007_v53 = vadd.f32 %v1003_v51, %v900_v48  ;;  %v1021_v54 = vadd.f32 %v1017_v52, %v929_v50  ;;  %v3788_v52 = vld [vmem:[#allocation6 + $0x30] sm:$0xff]  ;;  %1304 = vmatpush.bf16.msrb.mxu3 %v4593_v2  ;;  %1318 = vmatpush.bf16.msrb.mxu0 %v4598_v5 }
 0x344   :  { %1274 = vmatpush.bf16.msrb.mxu1 %v3788_v52  ;;  %1291 = vmatpush.bf16.msrb.mxu2 %v4604_v8 }
 0x345   :  { %v1050_v57 = vmul.f32 0.5, %v1007_v53  ;;  %v1054_v60 = vmul.f32 0.5, %v1021_v54  ;;  %v1033_v62 = vpop.f32.mrf.mxu0  ;;  %v1047_v7 = vpop.f32.mrf.mxu1 }
 0x347   :  { %3898 = vtanh.f32 %v1050_v57  ;;  %1305 = vmatpush.bf16.msrb.mxu3 %v4606_v9  ;;  %1319 = vmatpush.bf16.msrb.mxu0 %v4610_v11 }
 0x348   :  { %3900 = vtanh.f32 %v1054_v60  ;;  %1332 = vmatpush.bf16.msra.mxu1 %v4600_v6 }
 0x349   :  { %3902 = vtanh.f32 %v1035_v10 }
 0x34a   :  { %v1005_v17 = vpop.f32.mrf.mxu2  ;;  %v1019_v18 = vpop.f32.mrf.mxu3  ;;  %3904 = vtanh.f32 %v1058_v20 }
 0x34c   :  { %1333 = vmatpush.bf16.msra.mxu1 %v4612_v12 }
 0x34d   :  { %v3899_v21 = vpop.eup %3898  ;;  %v1112_v22 = vpop.f32.mrf.mxu0 }
 0x34e   :  { %v1129_v26 = vpop.f32.mrf.mxu1  ;;  %v3901_v33 = vpop.eup %3900  ;;  %v1052_v34 = vmul.f32 0.5, %v3899_v21  ;;  %v1117_v56 = vrot.slane %v1112_v22, 4 }
 0x34f   :  { %v1056_v38 = vmul.f32 0.5, %v3901_v33  ;;  %v3903_v41 = vpop.eup %3902  ;;  %v1134_v62 = vrot.slane %v1129_v26, 4 }
 0x350   :  { %v1053_v39 = vadd.f32 0.5, %v1052_v34  ;;  %v3905_v57 = vpop.eup %3904  ;;  %v1119_v21 = vadd.f32 %v1117_v56, %v4588_v61 }
 0x351   :  { %v1057_v42 = vadd.f32 0.5, %v1056_v38  ;;  %v1060_v20 = vmul.f32 0.5, %v3905_v57  ;;  %v1136_v22 = vadd.f32 %v1134_v62, %v4622_v16 }
 0x352   :  { %v1064_v48 = vmul.f32 %v3903_v41, %v1053_v39  ;;  %v1078_v50 = vpop.f32.mrf.mxu2  ;;  %v1095_v51 = vpop.f32.mrf.mxu3 }
 0x353   :  { %v1063_v53 = vmul.f32 %v1057_v42, %v4681_v31  ;;  %v1083_v54 = vrot.slane %v1078_v50, 4  ;;  %v1100_v55 = vrot.slane %v1095_v51, 4  ;;  %v1061_v32 = vadd.f32 0.5, %v1060_v20 }
 0x354   :  { %v1145_v33 = vmul.f32 0.5, %v1136_v22 }
 0x355   :  { %v4726_v60 = vadd.f32 %v1064_v48, %v1063_v53  ;;  %v1085_v7 = vadd.f32 %v1083_v54, %v4584_v58  ;;  %v1102_v10 = vadd.f32 %v1100_v55, %v4586_v59  ;;  %v1114_v15 = vpop.f32.mrf.mxu0 }
 0x356   :  { %v1131_v17 = vpop.f32.mrf.mxu1 }
 0x357   :  { %3906 = vtanh.f32 %v4726_v60  ;;  %v1137_v31 = vmul.f32 0.5, %v1085_v7  ;;  %v1141_v18 = vmul.f32 0.5, %v1102_v10 }
 0x359   :  { %3908 = vtanh.f32 %v1137_v31 }
 0x35a   :  { %3910 = vtanh.f32 %v1141_v18  ;;  %v1080_v26 = vpop.f32.mrf.mxu2  ;;  %v1097_v30 = vpop.f32.mrf.mxu3 }
 0x35b   :  { %3912 = vtanh.f32 %v1119_v21 }
 0x35c   :  { %3914 = vtanh.f32 %v1145_v33 }
 0x35d   :  { %v3907_v40 = vpop.eup %3906 }
 0x35e   :  { %v1067_v34 = vmul.f32 %v3907_v40, %v1061_v32 }
 0x35f   :  { %v3909_v36 = vpop.eup %3908 }
 0x360   :  { %v3911_v38 = vpop.eup %3910  ;;  %v1139_v39 = vmul.f32 0.5, %v3909_v36  ;;  %1068 = vst.msk [vmem:[#allocation2 + $0x2] sm:$0x3] %vm777_vm5, %v1067_v34  ;;  %v1280_v19 = vpack.c.bf16 %v1067_v34, %v1067_v34 }
 0x361   :  { %v1143_v41 = vmul.f32 0.5, %v3911_v38  ;;  %v3913_v44 = vpop.eup %3912 }
 0x362   :  { %v1140_v42 = vadd.f32 0.5, %v1139_v39  ;;  %v3915_v51 = vpop.eup %3914 }
 0x363   :  { %v1144_v45 = vadd.f32 0.5, %v1143_v41  ;;  %v1147_v53 = vmul.f32 0.5, %v3915_v51 }
 0x364   :  { %v1154_v48 = vmul.f32 %v3913_v44, %v1140_v42 }
 0x365   :  { %v1153_v50 = vmul.f32 %v1151_v46, %v1144_v45  ;;  %v1148_v54 = vadd.f32 0.5, %v1147_v53  ;;  %v3791_v46 = vld [vmem:[#allocation6 + $0x8] sm:$0xff] }
 0x367   :  { %v4743_v52 = vadd.f32 %v1154_v48, %v1153_v50  ;;  %v3793_v48 = vld [vmem:[#allocation6 + $0x18] sm:$0xff]  ;;  %v3795_v50 = vld [vmem:[#allocation6 + $0x28] sm:$0xff] }
 0x369   :  { %3916 = vtanh.f32 %v4743_v52 }
 0x36f   :  { %v3917_v55 = vpop.eup %3916 }
 0x370   :  { %v1157_v56 = vmul.f32 %v3917_v55, %v1148_v54  ;;  %v3797_v54 = vld [vmem:[#allocation6 + $0x38] sm:$0xff] }
 0x372   :  { %v1158_v57 = vpack.c.bf16 %v1157_v56, %v1157_v56 }
 0x374   :  { %v1164_v62 = vrot.slane %v1158_v57, 2 }
 0x376   :  { %3453 = vmatmul.msk.bf16.vlgmr.msra.gmra.mxu2 %vm215_vm4, %v1164_v62  ;;  %3462 = vmatmul.msk.bf16.vlgmr.msra.gmra.mxu3 %vm215_vm4, %v1164_v62 }
 0x377   :  { %3471 = vmatmul.msk.bf16.vlgmr.msra.gmra.mxu0 %vm215_vm4, %v1164_v62  ;;  %3480 = vmatmul.msk.bf16.vlgmr.msrb.gmra.mxu1 %vm215_vm4, %v1164_v62 }
 0x378   :  { %1365 = vmatpush.bf16.msra.mxu2 %v4530_v24  ;;  %1382 = vmatpush.bf16.msra.mxu3 %v4532_v25 }
 0x379   :  { %1399 = vmatpush.bf16.msra.mxu0 %v4528_v23  ;;  %1416 = vmatpush.bf16.msrb.mxu1 %v4556_v35 }
 0x37c   :  { %1366 = vmatpush.bf16.msra.mxu2 %v4542_v28  ;;  %1383 = vmatpush.bf16.msra.mxu3 %v4544_v29 }
 0x37d   :  { %1400 = vmatpush.bf16.msra.mxu0 %v4538_v27  ;;  %1417 = vmatpush.bf16.msrb.mxu1 %v4562_v37 }
 0x386   :  { %3481 = vmatmul.msk.bf16.vlgmr.msrb.gmra.mxu2 %vm215_vm4, %v1280_v19  ;;  %3482 = vmatmul.msk.bf16.vlgmr.msrb.gmra.mxu3 %vm215_vm4, %v1280_v19 }
 0x387   :  { %3483 = vmatmul.msk.bf16.vlgmr.msrb.gmra.mxu0 %vm215_vm4, %v1280_v19  ;;  %3484 = vmatmul.msk.bf16.vlgmr.msra.gmra.mxu1 %vm215_vm4, %v1280_v19  ;;  %v3790_v19 = vld [vmem:[#allocation6] sm:$0xff] }
 0x388   :  { %1476 = vmatpush.bf16.msrb.mxu2 %v3791_v46  ;;  %1505 = vmatpush.bf16.msrb.mxu3 %v3793_v48 }
 0x389   :  { %1534 = vmatpush.bf16.msrb.mxu0 %v3795_v50  ;;  %1563 = vmatpush.bf16.msra.mxu1 %v3797_v54  ;;  %v4804_v54 = vld [vmem:[#allocation3 + $0x38] sm:$0xff] }
 0x38c   :  { %1477 = vmatpush.bf16.msrb.mxu2 %v3790_v19 }
 0x396   :  { %3485 = vmatmul.msk.bf16.vlgmr.msra.gmra.mxu2 %vm215_vm4, %v1164_v62  ;;  %3486 = vmatmul.msk.bf16.vlgmr.msra.gmra.mxu3 %vm215_vm4, %v1164_v62 }
 0x397   :  { %3487 = vmatmul.msk.bf16.vlgmr.msra.gmra.mxu0 %vm215_vm4, %v1164_v62  ;;  %3488 = vmatmul.msk.bf16.vlgmr.msrb.gmra.mxu1 %vm215_vm4, %v1164_v62 }
 0x398   :  { %1580 = vmatpush.bf16.msra.mxu2 %v4591_v1 }
 0x39c   :  { %1581 = vmatpush.bf16.msra.mxu2 %v4604_v8 }
 0x3f4   :  { %v1247_v23 = vpop.f32.mrf.mxu0  ;;  %v1276_v24 = vpop.f32.mrf.mxu1 }
 0x3f5   :  { %v1248_v22 = vadd.f32 %v4667_v13, %v1247_v23  ;;  %v1277_v26 = vadd.f32 %v4672_v14, %v1276_v24  ;;  %v3792_v23 = vld [vmem:[#allocation6 + $0x10] sm:$0xff]  ;;  %v3794_v24 = vld [vmem:[#allocation6 + $0x20] sm:$0xff] }
 0x3f6   :  { %1506 = vmatpush.bf16.msrb.mxu3 %v3792_v23  ;;  %1535 = vmatpush.bf16.msrb.mxu0 %v3794_v24 }
 0x3f9   :  { %v1189_v25 = vpop.f32.mrf.mxu2  ;;  %v1218_v27 = vpop.f32.mrf.mxu3 }
 0x3fa   :  { %v1190_v15 = vadd.f32 %v4657_v63, %v1189_v25  ;;  %v1219_v17 = vadd.f32 %v4662_v3, %v1218_v27  ;;  %1594 = vmatpush.bf16.msra.mxu3 %v4593_v2  ;;  %1608 = vmatpush.bf16.msra.mxu0 %v4598_v5 }
 0x3fc   :  { %v1249_v28 = vpop.f32.mrf.mxu0  ;;  %v1278_v29 = vpop.f32.mrf.mxu1 }
 0x3fd   :  { %v3796_v29 = vld [vmem:[#allocation6 + $0x30] sm:$0xff] }
 0x3fe   :  { %1564 = vmatpush.bf16.msra.mxu1 %v3796_v29  ;;  %1595 = vmatpush.bf16.msra.mxu3 %v4606_v9 }
 0x3ff   :  { %1609 = vmatpush.bf16.msra.mxu0 %v4610_v11 }
 0x401   :  { %v1191_v35 = vpop.f32.mrf.mxu2  ;;  %v1220_v37 = vpop.f32.mrf.mxu3 }
 0x402   :  { %1622 = vmatpush.bf16.msrb.mxu1 %v4600_v6 }
 0x404   :  { %v1321_v7 = vpop.f32.mrf.mxu0  ;;  %v1335_v10 = vpop.f32.mrf.mxu1 }
 0x405   :  { %v1325_v34 = vadd.f32 %v1321_v7, %v1248_v22  ;;  %v1339_v36 = vadd.f32 %v1335_v10, %v1277_v26 }
 0x406   :  { %1623 = vmatpush.bf16.msrb.mxu1 %v4612_v12 }
 0x407   :  { %v1348_v41 = vmul.f32 0.5, %v1339_v36 }
 0x409   :  { %v1293_v31 = vpop.f32.mrf.mxu2  ;;  %v1307_v18 = vpop.f32.mrf.mxu3 }
 0x40a   :  { %v1297_v20 = vadd.f32 %v1293_v31, %v1190_v15  ;;  %v1311_v21 = vadd.f32 %v1307_v18, %v1219_v17 }
 0x40c   :  { %v1340_v30 = vmul.f32 0.5, %v1297_v20  ;;  %v1344_v32 = vmul.f32 0.5, %v1311_v21  ;;  %v1323_v40 = vpop.f32.mrf.mxu0  ;;  %v1337_v33 = vpop.f32.mrf.mxu1 }
 0x40e   :  { %3918 = vtanh.f32 %v1340_v30 }
 0x40f   :  { %3920 = vtanh.f32 %v1344_v32 }
 0x410   :  { %3922 = vtanh.f32 %v1325_v34 }
 0x411   :  { %v1295_v38 = vpop.f32.mrf.mxu2  ;;  %v1309_v39 = vpop.f32.mrf.mxu3  ;;  %3924 = vtanh.f32 %v1348_v41 }
 0x412   :  { %v1441_v38 = vrot.slane %v4743_v52, 6  ;;  %v4795_v52 = vld [vmem:[#allocation3 + $0x8] sm:$0xff] }
 0x414   :  { %v3919_v42 = vpop.eup %3918  ;;  %v1402_v44 = vpop.f32.mrf.mxu0 }
 0x415   :  { %v1419_v45 = vpop.f32.mrf.mxu1  ;;  %v3921_v51 = vpop.eup %3920  ;;  %v1342_v53 = vmul.f32 0.5, %v3919_v42  ;;  %v1407_v10 = vrot.slane %v1402_v44, 2 }
 0x416   :  { %v1346_v55 = vmul.f32 0.5, %v3921_v51  ;;  %v3923_v57 = vpop.eup %3922  ;;  %v1424_v31 = vrot.slane %v1419_v45, 2  ;;  %v4798_v51 = vld [vmem:[#allocation3 + $0x18] sm:$0xff] }
 0x417   :  { %v1343_v56 = vadd.f32 0.5, %v1342_v53  ;;  %v3925_v15 = vpop.eup %3924  ;;  %v1409_v32 = vadd.f32 %v1407_v10, %v4588_v61  ;;  %v4801_v53 = vld [vmem:[#allocation3 + $0x28] sm:$0xff] }
 0x418   :  { %v1347_v62 = vadd.f32 0.5, %v1346_v55  ;;  %v1350_v30 = vmul.f32 0.5, %v3925_v15  ;;  %v4807_v55 = vld [vmem:[#allocation3] sm:$0xff] }
 0x419   :  { %v1354_v25 = vmul.f32 %v3923_v57, %v1343_v56  ;;  %v1368_v27 = vpop.f32.mrf.mxu2  ;;  %v1385_v28 = vpop.f32.mrf.mxu3  ;;  %v4810_v56 = vld [vmem:[#allocation3 + $0x10] sm:$0xff]  ;;  %v4813_v57 = vld [vmem:[#allocation3 + $0x20] sm:$0xff] }
 0x41a   :  { %v1353_v35 = vmul.f32 %v1347_v62, %v4726_v60  ;;  %v1373_v37 = vrot.slane %v1368_v27, 2  ;;  %v1390_v7 = vrot.slane %v1385_v28, 2  ;;  %v1351_v2 = vadd.f32 0.5, %v1350_v30  ;;  %v4816_v62 = vld [vmem:[#allocation3 + $0x30] sm:$0xff] }
 0x41c   :  { %v4771_v17 = vadd.f32 %v1354_v25, %v1353_v35  ;;  %v1375_v18 = vadd.f32 %v1373_v37, %v4584_v58  ;;  %v1392_v20 = vadd.f32 %v1390_v7, %v4586_v59  ;;  %v1404_v21 = vpop.f32.mrf.mxu0  ;;  %v1426_v58 = vadd.f32 %v1424_v31, %v4622_v16 }
 0x41d   :  { %v1421_v22 = vpop.f32.mrf.mxu1 }
 0x41e   :  { %3926 = vtanh.f32 %v4771_v17  ;;  %v1427_v60 = vmul.f32 0.5, %v1375_v18  ;;  %v1431_v26 = vmul.f32 0.5, %v1392_v20  ;;  %v1435_v6 = vmul.f32 0.5, %v1426_v58 }
 0x420   :  { %3928 = vtanh.f32 %v1427_v60 }
 0x421   :  { %3930 = vtanh.f32 %v1431_v26  ;;  %v1370_v59 = vpop.f32.mrf.mxu2  ;;  %v1387_v1 = vpop.f32.mrf.mxu3 }
 0x422   :  { %3932 = vtanh.f32 %v1409_v32 }
 0x423   :  { %3934 = vtanh.f32 %v1435_v6  ;;  %v3799_v6 = vld [vmem:[#allocation6 + $0x8] sm:$0xff] }
 0x424   :  { %v3927_v5 = vpop.eup %3926 }
 0x425   :  { %v1357_v40 = vmul.f32 %v3927_v5, %v1351_v2 }
 0x426   :  { %v3929_v61 = vpop.eup %3928 }
 0x427   :  { %v3931_v33 = vpop.eup %3930  ;;  %1358 = vst.msk [vmem:[#allocation2 + $0x4] sm:$0x3] %vm777_vm5, %v1357_v40  ;;  %v1429_v16 = vmul.f32 0.5, %v3929_v61  ;;  %v1570_v19 = vpack.c.bf16 %v1357_v40, %v1357_v40  ;;  %v3803_v40 = vld [vmem:[#allocation6 + $0x28] sm:$0xff] }
 0x428   :  { %v1433_v8 = vmul.f32 0.5, %v3931_v33  ;;  %v3933_v34 = vpop.eup %3932  ;;  %v3805_v33 = vld [vmem:[#allocation6 + $0x38] sm:$0xff] }
 0x429   :  { %v1430_v9 = vadd.f32 0.5, %v1429_v16  ;;  %v3935_v12 = vpop.eup %3934 }
 0x42a   :  { %v1434_v36 = vadd.f32 0.5, %v1433_v8  ;;  %v1437_v42 = vmul.f32 0.5, %v3935_v12 }
 0x42b   :  { %v1444_v11 = vmul.f32 %v3933_v34, %v1430_v9  ;;  %v3798_v34 = vld [vmem:[#allocation6] sm:$0xff] }
 0x42c   :  { %v1443_v39 = vmul.f32 %v1441_v38, %v1434_v36  ;;  %v1438_v44 = vadd.f32 0.5, %v1437_v42  ;;  %v3800_v36 = vld [vmem:[#allocation6 + $0x10] sm:$0xff]  ;;  %v3802_v38 = vld [vmem:[#allocation6 + $0x20] sm:$0xff] }
 0x42e   :  { %v4788_v41 = vadd.f32 %v1444_v11, %v1443_v39  ;;  %v3804_v39 = vld [vmem:[#allocation6 + $0x30] sm:$0xff] }
 0x430   :  { %3936 = vtanh.f32 %v4788_v41 }
 0x436   :  { %v3937_v45 = vpop.eup %3936 }
 0x437   :  { %v1447_v46 = vmul.f32 %v3937_v45, %v1438_v44  ;;  %v4064_v44 = vld [vmem:[%s5267_s7] ss:$0 sm:$0xff] }
 0x438   :  { %v4835_v45 = vadd.f32 %v4064_v44, %v4569_v43 }
 0x439   :  { %v1448_v48 = vpack.c.bf16 %v1447_v46, %v1447_v46  ;;  %v4065_v46 = vld [vmem:[%s5267_s7 + $0x1] ss:$0 sm:$0xff] }
 0x43b   :  { %v1454_v50 = vrot.slane %v1448_v48, 3  ;;  %v4841_v48 = vadd.f32 %v4065_v46, %v4571_v47 }
 0x43d   :  { %3497 = vmatmul.msk.bf16.vlgmr.msrb.gmra.mxu2 %vm215_vm4, %v1454_v50  ;;  %3506 = vmatmul.msk.bf16.vlgmr.msrb.gmra.mxu3 %vm215_vm4, %v1454_v50 }
 0x43e   :  { %3515 = vmatmul.msk.bf16.vlgmr.msrb.gmra.mxu0 %vm215_vm4, %v1454_v50  ;;  %3524 = vmatmul.msk.bf16.vlgmr.msra.gmra.mxu1 %vm215_vm4, %v1454_v50 }
 0x43f   :  { %1655 = vmatpush.bf16.msrb.mxu2 %v4795_v52  ;;  %1669 = vmatpush.bf16.msrb.mxu3 %v4798_v51 }
 0x440   :  { %1683 = vmatpush.bf16.msrb.mxu0 %v4801_v53  ;;  %1697 = vmatpush.bf16.msra.mxu1 %v4804_v54 }
 0x443   :  { %1656 = vmatpush.bf16.msrb.mxu2 %v4807_v55  ;;  %1670 = vmatpush.bf16.msrb.mxu3 %v4810_v56 }
 0x444   :  { %1684 = vmatpush.bf16.msrb.mxu0 %v4813_v57  ;;  %1698 = vmatpush.bf16.msra.mxu1 %v4816_v62 }
 0x44d   :  { %3525 = vmatmul.msk.bf16.vlgmr.msra.gmra.mxu2 %vm215_vm4, %v1570_v19  ;;  %3526 = vmatmul.msk.bf16.vlgmr.msra.gmra.mxu3 %vm215_vm4, %v1570_v19 }
 0x44e   :  { %3527 = vmatmul.msk.bf16.vlgmr.msra.gmra.mxu0 %vm215_vm4, %v1570_v19  ;;  %3528 = vmatmul.msk.bf16.vlgmr.msrb.gmra.mxu1 %vm215_vm4, %v1570_v19 }
 0x44f   :  { %1752 = vmatpush.bf16.msra.mxu2 %v3799_v6  ;;  %1810 = vmatpush.bf16.msra.mxu0 %v3803_v40 }
 0x450   :  { %1839 = vmatpush.bf16.msrb.mxu1 %v3805_v33 }
 0x453   :  { %1753 = vmatpush.bf16.msra.mxu2 %v3798_v34  ;;  %1811 = vmatpush.bf16.msra.mxu0 %v3802_v38 }
 0x454   :  { %1840 = vmatpush.bf16.msrb.mxu1 %v3804_v39 }
 0x45d   :  { %3529 = vmatmul.msk.bf16.vlgmr.msrb.gmra.mxu2 %vm215_vm4, %v1454_v50  ;;  %3530 = vmatmul.msk.bf16.vlgmr.msrb.gmra.mxu3 %vm215_vm4, %v1454_v50 }
 0x45e   :  { %3531 = vmatmul.msk.bf16.vlgmr.msrb.gmra.mxu0 %vm215_vm4, %v1454_v50  ;;  %3532 = vmatmul.msk.bf16.vlgmr.msra.gmra.mxu1 %vm215_vm4, %v1454_v50 }
 0x4bb   :  { %v1537_v23 = vpop.f32.mrf.mxu0  ;;  %v1566_v24 = vpop.f32.mrf.mxu1 }
 0x4bc   :  { %v1538_v60 = vadd.f32 %v4667_v13, %v1537_v23  ;;  %v1567_v26 = vadd.f32 %v4672_v14, %v1566_v24 }
 0x4c0   :  { %v1479_v25 = vpop.f32.mrf.mxu2  ;;  %v1508_v27 = vpop.f32.mrf.mxu3 }
 0x4c1   :  { %v1480_v15 = vadd.f32 %v4657_v63, %v1479_v25  ;;  %v1509_v31 = vadd.f32 %v4662_v3, %v1508_v27  ;;  %v3801_v3 = vld [vmem:[#allocation6 + $0x18] sm:$0xff]  ;;  %v4843_v25 = vld [vmem:[#allocation8 + $0x8] sm:$0xff] }
 0x4c2   :  { %1781 = vmatpush.bf16.msra.mxu3 %v3801_v3  ;;  %1856 = vmatpush.bf16.msrb.mxu2 %v4843_v25  ;;  %v4846_v27 = vld [vmem:[#allocation8 + $0x18] sm:$0xff] }
 0x4c3   :  { %v1539_v28 = vpop.f32.mrf.mxu0  ;;  %v1568_v29 = vpop.f32.mrf.mxu1 }
 0x4c4   :  { %v4852_v29 = vld [vmem:[#allocation8 + $0x28] sm:$0xff] }
 0x4c5   :  { %1884 = vmatpush.bf16.msrb.mxu0 %v4852_v29 }
 0x4c6   :  { %1782 = vmatpush.bf16.msra.mxu3 %v3800_v36 }
 0x4c8   :  { %v1481_v35 = vpop.f32.mrf.mxu2  ;;  %v1510_v37 = vpop.f32.mrf.mxu3 }
 0x4c9   :  { %v4855_v35 = vld [vmem:[#allocation8 + $0x38] sm:$0xff] }
 0x4ca   :  { %1870 = vmatpush.bf16.msrb.mxu3 %v4846_v27  ;;  %1898 = vmatpush.bf16.msra.mxu1 %v4855_v35 }
 0x4cb   :  { %v1611_v7 = vpop.f32.mrf.mxu0  ;;  %v1625_v10 = vpop.f32.mrf.mxu1 }
 0x4cc   :  { %v1615_v1 = vadd.f32 %v1611_v7, %v1538_v60  ;;  %v1629_v2 = vadd.f32 %v1625_v10, %v1567_v26  ;;  %v4872_v60 = vld [vmem:[#allocation8] sm:$0xff]  ;;  %v4875_v26 = vld [vmem:[#allocation8 + $0x10] sm:$0xff] }
 0x4cd   :  { %1857 = vmatpush.bf16.msrb.mxu2 %v4872_v60 }
 0x4ce   :  { %v1638_v61 = vmul.f32 0.5, %v1629_v2  ;;  %1871 = vmatpush.bf16.msrb.mxu3 %v4875_v26 }
 0x4d0   :  { %v1583_v18 = vpop.f32.mrf.mxu2  ;;  %v1597_v20 = vpop.f32.mrf.mxu3 }
 0x4d1   :  { %v1587_v21 = vadd.f32 %v1583_v18, %v1480_v15  ;;  %v1601_v22 = vadd.f32 %v1597_v20, %v1509_v31 }
 0x4d3   :  { %v1630_v30 = vmul.f32 0.5, %v1587_v21  ;;  %v1634_v32 = vmul.f32 0.5, %v1601_v22  ;;  %v1613_v58 = vpop.f32.mrf.mxu0  ;;  %v1627_v59 = vpop.f32.mrf.mxu1  ;;  %v4071_v21 = vld [vmem:[%s5267_s7 + $0x3] ss:$0 sm:$0xff] }
 0x4d4   :  { %v4870_v22 = vadd.f32 %v4071_v21, %v4596_v4 }
 0x4d5   :  { %3938 = vtanh.f32 %v1630_v30  ;;  %v4879_v30 = vld [vmem:[#allocation8 + $0x20] sm:$0xff] }
 0x4d6   :  { %3940 = vtanh.f32 %v1634_v32  ;;  %1885 = vmatpush.bf16.msrb.mxu0 %v4879_v30 }
 0x4d7   :  { %3942 = vtanh.f32 %v1615_v1 }
 0x4d8   :  { %v1585_v5 = vpop.f32.mrf.mxu2  ;;  %v1599_v63 = vpop.f32.mrf.mxu3  ;;  %3944 = vtanh.f32 %v1638_v61 }
 0x4db   :  { %v3939_v13 = vpop.eup %3938  ;;  %v1686_v14 = vpop.f32.mrf.mxu0 }
 0x4dc   :  { %v1700_v16 = vpop.f32.mrf.mxu1  ;;  %v3941_v8 = vpop.eup %3940  ;;  %v1632_v9 = vmul.f32 0.5, %v3939_v13 }
 0x4dd   :  { %v1636_v11 = vmul.f32 0.5, %v3941_v8  ;;  %v3943_v42 = vpop.eup %3942  ;;  %v1704_v58 = vadd.f32 %v1700_v16, %v4870_v22  ;;  %v1719_v16 = vrot.slane %v4788_v41, 6 }
 0x4de   :  { %v1633_v12 = vadd.f32 0.5, %v1632_v9  ;;  %v3945_v37 = vpop.eup %3944 }
 0x4df   :  { %v1637_v50 = vadd.f32 0.5, %v1636_v11  ;;  %v1640_v4 = vmul.f32 0.5, %v3945_v37  ;;  %v1713_v5 = vmul.f32 0.5, %v1704_v58 }
 0x4e0   :  { %v1644_v19 = vmul.f32 %v3943_v42, %v1633_v12  ;;  %v1658_v23 = vpop.f32.mrf.mxu2  ;;  %v1672_v24 = vpop.f32.mrf.mxu3 }
 0x4e1   :  { %v1643_v43 = vmul.f32 %v1637_v50, %v4771_v17  ;;  %v1662_v28 = vadd.f32 %v1658_v23, %v4835_v45  ;;  %v1676_v47 = vadd.f32 %v1672_v24, %v4841_v48  ;;  %v4070_v17 = vld [vmem:[%s5267_s7 + $0x2] ss:$0 sm:$0xff]  ;;  %v1641_v2 = vadd.f32 0.5, %v1640_v4  ;;  %s5278_s7 = sld [smem:[#allocation38_spill]] }
 0x4e2   :  { %v4864_v20 = vadd.f32 %v4070_v17, %v4573_v49  ;;  %v4882_v49 = vld [vmem:[#allocation8 + $0x30] sm:$0xff] }
 0x4e3   :  { %v4858_v7 = vadd.f32 %v1644_v19, %v1643_v43  ;;  %v1705_v10 = vmul.f32 0.5, %v1662_v28  ;;  %v1709_v15 = vmul.f32 0.5, %v1676_v47  ;;  %v1688_v31 = vpop.f32.mrf.mxu0  ;;  %1899 = vmatpush.bf16.msra.mxu1 %v4882_v49 }
 0x4e4   :  { %v1702_v18 = vpop.f32.mrf.mxu1  ;;  %v1690_v32 = vadd.f32 %v1686_v14, %v4864_v20 }
 0x4e5   :  { %3946 = vtanh.f32 %v4858_v7  ;;  %v4921_v18 = vld [vmem:[%s5269_s9 + $0x1] ss:$0 sm:$0xff] }
 0x4e6   :  { %3948 = vtanh.f32 %v1705_v10 }
 0x4e7   :  { %3950 = vtanh.f32 %v1709_v15  ;;  %v4915_v15 = vld [vmem:[%s5269_s9] ss:$0 sm:$0xff]  ;;  %s3140_s4 = sshll.u32 %s5278_s7, 4  ;;  %s3141_s4 = int_to_ptr.hbm [resolvable:$true] %s3140_s4 }
 0x4e8   :  { %v1660_v59 = vpop.f32.mrf.mxu2  ;;  %v1674_v1 = vpop.f32.mrf.mxu3  ;;  %3952 = vtanh.f32 %v1690_v32 }
 0x4e9   :  { %3954 = vtanh.f32 %v1713_v5  ;;  %v4927_v59 = vld [vmem:[%s5269_s9 + $0x2] ss:$0 sm:$0xff] }
 0x4eb   :  { %v3947_v63 = vpop.eup %3946 }
 0x4ec   :  { %v3949_v6 = vpop.eup %3948  ;;  %v1647_v3 = vmul.f32 %v3947_v63, %v1641_v2  ;;  %v4933_v2 = vld [vmem:[%s5269_s9 + $0x3] ss:$0 sm:$0xff]  ;;  %s4348_s9 = smov 8  }
 0x4ed   :  { %v3951_v40 = vpop.eup %3950  ;;  %v1707_v61 = vmul.f32 0.5, %v3949_v6 }
 0x4ee   :  { %1648 = vst.msk [vmem:[#allocation2 + $0x6] sm:$0x3] %vm777_vm5, %v1647_v3  ;;  %v1711_v33 = vmul.f32 0.5, %v3951_v40  ;;  %v3953_v14 = vpop.eup %3952  ;;  %v1846_v41 = vpack.c.bf16 %v1647_v3, %v1647_v3 }
 0x4ef   :  { %v1708_v13 = vadd.f32 0.5, %v1707_v61  ;;  %v3955_v36 = vpop.eup %3954 }
 0x4f0   :  { %v1712_v8 = vadd.f32 0.5, %v1711_v33  ;;  %v1715_v11 = vmul.f32 0.5, %v3955_v36  ;;  %v3807_v36 = vld [vmem:[#allocation6 + $0x8] sm:$0xff] }
 0x4f1   :  { %v1722_v9 = vmul.f32 %v3953_v14, %v1708_v13 }
 0x4f2   :  { %v1721_v34 = vmul.f32 %v1719_v16, %v1712_v8  ;;  %v1716_v39 = vadd.f32 0.5, %v1715_v11  ;;  %v3809_v11 = vld [vmem:[#allocation6 + $0x18] sm:$0xff] }
 0x4f4   :  { %v4889_v38 = vadd.f32 %v1722_v9, %v1721_v34 }
 0x4f6   :  { %3956 = vtanh.f32 %v4889_v38 }
 0x4fc   :  { %v3957_v12 = vpop.eup %3956 }
 0x4fd   :  { %v1725_v42 = vmul.f32 %v3957_v12, %v1716_v39  ;;  %v3811_v39 = vld [vmem:[#allocation6 + $0x28] sm:$0xff] }
 0x4ff   :  { %v1726_v44 = vpack.c.bf16 %v1725_v42, %v1725_v42 }
 0x501   :  { %3541 = vmatmul.msk.bf16.vlgmr.msra.gmra.mxu2 %vm215_vm4, %v1726_v44  ;;  %3550 = vmatmul.msk.bf16.vlgmr.msra.gmra.mxu3 %vm215_vm4, %v1726_v44 }
 0x502   :  { %3559 = vmatmul.msk.bf16.vlgmr.msra.gmra.mxu0 %vm215_vm4, %v1726_v44  ;;  %3568 = vmatmul.msk.bf16.vlgmr.msrb.gmra.mxu1 %vm215_vm4, %v1726_v44 }
 0x503   :  { %1931 = vmatpush.bf16.msra.mxu2 %v4795_v52  ;;  %1948 = vmatpush.bf16.msra.mxu3 %v4798_v51 }
 0x504   :  { %1965 = vmatpush.bf16.msra.mxu0 %v4801_v53  ;;  %1982 = vmatpush.bf16.msrb.mxu1 %v4804_v54 }
 0x507   :  { %1932 = vmatpush.bf16.msra.mxu2 %v4807_v55  ;;  %1949 = vmatpush.bf16.msra.mxu3 %v4810_v56 }
 0x508   :  { %1966 = vmatpush.bf16.msra.mxu0 %v4813_v57  ;;  %1983 = vmatpush.bf16.msrb.mxu1 %v4816_v62 }
 0x511   :  { %3569 = vmatmul.msk.bf16.vlgmr.msrb.gmra.mxu2 %vm215_vm4, %v1846_v41  ;;  %3570 = vmatmul.msk.bf16.vlgmr.msrb.gmra.mxu3 %vm215_vm4, %v1846_v41 }
 0x512   :  { %3571 = vmatmul.msk.bf16.vlgmr.msrb.gmra.mxu0 %vm215_vm4, %v1846_v41  ;;  %3572 = vmatmul.msk.bf16.vlgmr.msra.gmra.mxu1 %vm215_vm4, %v1846_v41 }
 0x513   :  { %2042 = vmatpush.bf16.msrb.mxu2 %v3807_v36  ;;  %2071 = vmatpush.bf16.msrb.mxu3 %v3809_v11 }
 0x514   :  { %2100 = vmatpush.bf16.msrb.mxu0 %v3811_v39 }
 0x521   :  { %3573 = vmatmul.msk.bf16.vlgmr.msra.gmra.mxu2 %vm215_vm4, %v1726_v44  ;;  %3574 = vmatmul.msk.bf16.vlgmr.msra.gmra.mxu3 %vm215_vm4, %v1726_v44 }
 0x522   :  { %3575 = vmatmul.msk.bf16.vlgmr.msra.gmra.mxu0 %vm215_vm4, %v1726_v44  ;;  %3576 = vmatmul.msk.bf16.vlgmr.msrb.gmra.mxu1 %vm215_vm4, %v1726_v44  ;;  %v3813_v44 = vld [vmem:[#allocation6 + $0x38] sm:$0xff] }
 0x523   :  { %2129 = vmatpush.bf16.msra.mxu1 %v3813_v44 }
 0x57f   :  { %v1813_v46 = vpop.f32.mrf.mxu0  ;;  %v1842_v50 = vpop.f32.mrf.mxu1 }
 0x580   :  { %v1814_v1 = vadd.f32 %v4927_v59, %v1813_v46  ;;  %v1843_v5 = vadd.f32 %v4933_v2, %v1842_v50 }
 0x584   :  { %v1755_v19 = vpop.f32.mrf.mxu2  ;;  %v1784_v23 = vpop.f32.mrf.mxu3 }
 0x585   :  { %v1756_v31 = vadd.f32 %v4915_v15, %v1755_v19  ;;  %v1785_v17 = vadd.f32 %v4921_v18, %v1784_v23  ;;  %v3806_v23 = vld [vmem:[#allocation6] sm:$0xff] }
 0x586   :  { %2043 = vmatpush.bf16.msrb.mxu2 %v3806_v23 }
 0x587   :  { %v1815_v24 = vpop.f32.mrf.mxu0  ;;  %v1844_v43 = vpop.f32.mrf.mxu1 }
 0x588   :  { %v3808_v24 = vld [vmem:[#allocation6 + $0x10] sm:$0xff]  ;;  %v3810_v43 = vld [vmem:[#allocation6 + $0x20] sm:$0xff] }
 0x589   :  { %2072 = vmatpush.bf16.msrb.mxu3 %v3808_v24  ;;  %2101 = vmatpush.bf16.msrb.mxu0 %v3810_v43 }
 0x58a   :  { %2146 = vmatpush.bf16.msra.mxu2 %v4843_v25 }
 0x58c   :  { %v1757_v28 = vpop.f32.mrf.mxu2  ;;  %v1786_v47 = vpop.f32.mrf.mxu3 }
 0x58d   :  { %2160 = vmatpush.bf16.msra.mxu3 %v4846_v27  ;;  %2174 = vmatpush.bf16.msra.mxu0 %v4852_v29 }
 0x58e   :  { %2147 = vmatpush.bf16.msra.mxu2 %v4872_v60 }
 0x58f   :  { %v1887_v37 = vpop.f32.mrf.mxu0  ;;  %v1901_v10 = vpop.f32.mrf.mxu1 }
 0x590   :  { %v1891_v61 = vadd.f32 %v1887_v37, %v1814_v1  ;;  %v1905_v33 = vadd.f32 %v1901_v10, %v1843_v5  ;;  %v3812_v10 = vld [vmem:[#allocation6 + $0x30] sm:$0xff] }
 0x591   :  { %2130 = vmatpush.bf16.msra.mxu1 %v3812_v10  ;;  %2161 = vmatpush.bf16.msra.mxu3 %v4875_v26 }
 0x592   :  { %v1914_v8 = vmul.f32 0.5, %v1905_v33  ;;  %2175 = vmatpush.bf16.msra.mxu0 %v4879_v30 }
 0x594   :  { %v1859_v21 = vpop.f32.mrf.mxu2  ;;  %v1873_v4 = vpop.f32.mrf.mxu3 }
 0x595   :  { %v1863_v32 = vadd.f32 %v1859_v21, %v1756_v31  ;;  %v1877_v58 = vadd.f32 %v1873_v4, %v1785_v17  ;;  %2188 = vmatpush.bf16.msrb.mxu1 %v4855_v35 }
 0x597   :  { %v1906_v63 = vmul.f32 0.5, %v1863_v32  ;;  %v1910_v6 = vmul.f32 0.5, %v1877_v58  ;;  %v1889_v3 = vpop.f32.mrf.mxu0  ;;  %v1903_v40 = vpop.f32.mrf.mxu1 }
 0x599   :  { %3958 = vtanh.f32 %v1906_v63  ;;  %2189 = vmatpush.bf16.msrb.mxu1 %v4882_v49 }
 0x59a   :  { %3960 = vtanh.f32 %v1910_v6 }
 0x59b   :  { %3962 = vtanh.f32 %v1891_v61 }
 0x59c   :  { %v1861_v13 = vpop.f32.mrf.mxu2  ;;  %v1875_v14 = vpop.f32.mrf.mxu3  ;;  %3964 = vtanh.f32 %v1914_v8 }
 0x59f   :  { %v3959_v16 = vpop.eup %3958  ;;  %v1968_v9 = vpop.f32.mrf.mxu0 }
 0x5a0   :  { %v1985_v34 = vpop.f32.mrf.mxu1  ;;  %v3961_v12 = vpop.eup %3960  ;;  %v1908_v42 = vmul.f32 0.5, %v3959_v16  ;;  %v1973_v4 = vrot.slane %v1968_v9, 6 }
 0x5a1   :  { %v1912_v41 = vmul.f32 0.5, %v3961_v12  ;;  %v3963_v50 = vpop.eup %3962  ;;  %v1990_v1 = vrot.slane %v1985_v34, 6 }
 0x5a2   :  { %v1909_v46 = vadd.f32 0.5, %v1908_v42  ;;  %v3965_v32 = vpop.eup %3964  ;;  %v1975_v33 = vadd.f32 %v1973_v4, %v4864_v20 }
 0x5a3   :  { %v1913_v19 = vadd.f32 0.5, %v1912_v41  ;;  %v1916_v61 = vmul.f32 0.5, %v3965_v32  ;;  %v1992_v13 = vadd.f32 %v1990_v1, %v4870_v22 }
 0x5a4   :  { %v1920_v28 = vmul.f32 %v3963_v50, %v1909_v46  ;;  %v1934_v47 = vpop.f32.mrf.mxu2  ;;  %v1951_v37 = vpop.f32.mrf.mxu3  ;;  %v2007_v50 = vrot.slane %v4889_v38, 6 }
 0x5a5   :  { %v1919_v31 = vmul.f32 %v1913_v19, %v4858_v7  ;;  %v1939_v17 = vrot.slane %v1934_v47, 6  ;;  %v1956_v21 = vrot.slane %v1951_v37, 6  ;;  %v1917_v16 = vadd.f32 0.5, %v1916_v61 }
 0x5a6   :  { %v2001_v34 = vmul.f32 0.5, %v1992_v13 }
 0x5a7   :  { %v4937_v58 = vadd.f32 %v1920_v28, %v1919_v31  ;;  %v1941_v5 = vadd.f32 %v1939_v17, %v4835_v45  ;;  %v1958_v63 = vadd.f32 %v1956_v21, %v4841_v48  ;;  %v1970_v6 = vpop.f32.mrf.mxu0 }
 0x5a8   :  { %v1987_v3 = vpop.f32.mrf.mxu1 }
 0x5a9   :  { %3966 = vtanh.f32 %v4937_v58  ;;  %v1993_v7 = vmul.f32 0.5, %v1941_v5  ;;  %v1997_v40 = vmul.f32 0.5, %v1958_v63 }
 0x5ab   :  { %3968 = vtanh.f32 %v1993_v7 }
 0x5ac   :  { %3970 = vtanh.f32 %v1997_v40  ;;  %v1936_v14 = vpop.f32.mrf.mxu2  ;;  %v1953_v8 = vpop.f32.mrf.mxu3 }
 0x5ad   :  { %3972 = vtanh.f32 %v1975_v33 }
 0x5ae   :  { %3974 = vtanh.f32 %v2001_v34 }
 0x5af   :  { %v3967_v9 = vpop.eup %3966 }
 0x5b0   :  { %v1923_v36 = vmul.f32 %v3967_v9, %v1917_v16 }
 0x5b1   :  { %v3969_v11 = vpop.eup %3968 }
 0x5b2   :  { %v3971_v39 = vpop.eup %3970  ;;  %1924 = vst.msk [vmem:[#allocation2 + $0x8] sm:$0x3] %vm777_vm5, %v1923_v36  ;;  %v1995_v12 = vmul.f32 0.5, %v3969_v11  ;;  %v2136_v38 = vpack.c.bf16 %v1923_v36, %v1923_v36 }
 0x5b3   :  { %v1999_v42 = vmul.f32 0.5, %v3971_v39  ;;  %v3973_v41 = vpop.eup %3972 }
 0x5b4   :  { %v1996_v44 = vadd.f32 0.5, %v1995_v12  ;;  %v3975_v24 = vpop.eup %3974 }
 0x5b5   :  { %v2000_v46 = vadd.f32 0.5, %v1999_v42  ;;  %v2003_v28 = vmul.f32 0.5, %v3975_v24 }
 0x5b6   :  { %v2010_v19 = vmul.f32 %v3973_v41, %v1996_v44 }
 0x5b7   :  { %v2009_v23 = vmul.f32 %v2007_v50, %v2000_v46  ;;  %v2004_v47 = vadd.f32 0.5, %v2003_v28  ;;  %v3815_v28 = vld [vmem:[#allocation6 + $0x8] sm:$0xff] }
 0x5b9   :  { %v4954_v43 = vadd.f32 %v2010_v19, %v2009_v23 }
 0x5bb   :  { %3976 = vtanh.f32 %v4954_v43 }
 0x5c1   :  { %v3977_v37 = vpop.eup %3976 }
 0x5c2   :  { %v2013_v10 = vmul.f32 %v3977_v37, %v2004_v47  ;;  %v3817_v47 = vld [vmem:[#allocation6 + $0x18] sm:$0xff]  ;;  %v3819_v37 = vld [vmem:[#allocation6 + $0x28] sm:$0xff] }
 0x5c4   :  { %v2014_v31 = vpack.c.bf16 %v2013_v10, %v2013_v10 }
 0x5c6   :  { %v2020_v17 = vrot.slane %v2014_v31, 1 }
 0x5c8   :  { %3585 = vmatmul.msk.bf16.vlgmr.msrb.gmra.mxu2 %vm215_vm4, %v2020_v17  ;;  %3594 = vmatmul.msk.bf16.vlgmr.msrb.gmra.mxu3 %vm215_vm4, %v2020_v17 }
 0x5c9   :  { %3603 = vmatmul.msk.bf16.vlgmr.msrb.gmra.mxu0 %vm215_vm4, %v2020_v17  ;;  %3612 = vmatmul.msk.bf16.vlgmr.msra.gmra.mxu1 %vm215_vm4, %v2020_v17 }
 0x5ca   :  { %2221 = vmatpush.bf16.msrb.mxu2 %v4795_v52  ;;  %2238 = vmatpush.bf16.msrb.mxu3 %v4798_v51 }
 0x5cb   :  { %2255 = vmatpush.bf16.msrb.mxu0 %v4801_v53  ;;  %2272 = vmatpush.bf16.msra.mxu1 %v4804_v54 }
 0x5ce   :  { %2222 = vmatpush.bf16.msrb.mxu2 %v4807_v55  ;;  %2239 = vmatpush.bf16.msrb.mxu3 %v4810_v56 }
 0x5cf   :  { %2256 = vmatpush.bf16.msrb.mxu0 %v4813_v57  ;;  %2273 = vmatpush.bf16.msra.mxu1 %v4816_v62 }
 0x5d8   :  { %3613 = vmatmul.msk.bf16.vlgmr.msra.gmra.mxu2 %vm215_vm4, %v2136_v38  ;;  %3614 = vmatmul.msk.bf16.vlgmr.msra.gmra.mxu3 %vm215_vm4, %v2136_v38 }
 0x5d9   :  { %3615 = vmatmul.msk.bf16.vlgmr.msra.gmra.mxu0 %vm215_vm4, %v2136_v38  ;;  %3616 = vmatmul.msk.bf16.vlgmr.msrb.gmra.mxu1 %vm215_vm4, %v2136_v38 }
 0x5da   :  { %2332 = vmatpush.bf16.msra.mxu2 %v3815_v28  ;;  %2361 = vmatpush.bf16.msra.mxu3 %v3817_v47 }
 0x5db   :  { %2390 = vmatpush.bf16.msra.mxu0 %v3819_v37 }
 0x5e8   :  { %3617 = vmatmul.msk.bf16.vlgmr.msrb.gmra.mxu2 %vm215_vm4, %v2020_v17  ;;  %3618 = vmatmul.msk.bf16.vlgmr.msrb.gmra.mxu3 %vm215_vm4, %v2020_v17 }
 0x5e9   :  { %3619 = vmatmul.msk.bf16.vlgmr.msrb.gmra.mxu0 %vm215_vm4, %v2020_v17  ;;  %3620 = vmatmul.msk.bf16.vlgmr.msra.gmra.mxu1 %vm215_vm4, %v2020_v17  ;;  %v3821_v17 = vld [vmem:[#allocation6 + $0x38] sm:$0xff] }
 0x5ea   :  { %2419 = vmatpush.bf16.msrb.mxu1 %v3821_v17 }
 0x646   :  { %v2103_v21 = vpop.f32.mrf.mxu0  ;;  %v2132_v4 = vpop.f32.mrf.mxu1 }
 0x647   :  { %v2104_v9 = vadd.f32 %v4927_v59, %v2103_v21  ;;  %v2133_v34 = vadd.f32 %v4933_v2, %v2132_v4 }
 0x64b   :  { %v2045_v32 = vpop.f32.mrf.mxu2  ;;  %v2074_v1 = vpop.f32.mrf.mxu3 }
 0x64c   :  { %v2046_v61 = vadd.f32 %v4915_v15, %v2045_v32  ;;  %v2075_v33 = vadd.f32 %v4921_v18, %v2074_v1  ;;  %v3814_v1 = vld [vmem:[#allocation6] sm:$0xff] }
 0x64d   :  { %2333 = vmatpush.bf16.msra.mxu2 %v3814_v1 }
 0x64e   :  { %v2105_v5 = vpop.f32.mrf.mxu0  ;;  %v2134_v63 = vpop.f32.mrf.mxu1 }
 0x64f   :  { %v3816_v5 = vld [vmem:[#allocation6 + $0x10] sm:$0xff]  ;;  %v3818_v63 = vld [vmem:[#allocation6 + $0x20] sm:$0xff] }
 0x650   :  { %2362 = vmatpush.bf16.msra.mxu3 %v3816_v5  ;;  %2391 = vmatpush.bf16.msra.mxu0 %v3818_v63 }
 0x651   :  { %2436 = vmatpush.bf16.msrb.mxu2 %v4843_v25 }
 0x653   :  { %v2047_v6 = vpop.f32.mrf.mxu2  ;;  %v2076_v3 = vpop.f32.mrf.mxu3 }
 0x654   :  { %2450 = vmatpush.bf16.msrb.mxu3 %v4846_v27  ;;  %2464 = vmatpush.bf16.msrb.mxu0 %v4852_v29 }
 0x655   :  { %2437 = vmatpush.bf16.msrb.mxu2 %v4872_v60 }
 0x656   :  { %v2177_v7 = vpop.f32.mrf.mxu0  ;;  %v2191_v40 = vpop.f32.mrf.mxu1 }
 0x657   :  { %v2181_v42 = vadd.f32 %v2177_v7, %v2104_v9  ;;  %v2195_v44 = vadd.f32 %v2191_v40, %v2133_v34  ;;  %v3820_v40 = vld [vmem:[#allocation6 + $0x30] sm:$0xff] }
 0x658   :  { %2420 = vmatpush.bf16.msrb.mxu1 %v3820_v40  ;;  %2451 = vmatpush.bf16.msrb.mxu3 %v4875_v26 }
 0x659   :  { %v2204_v50 = vmul.f32 0.5, %v2195_v44  ;;  %2465 = vmatpush.bf16.msrb.mxu0 %v4879_v30 }
 0x65b   :  { %v2149_v13 = vpop.f32.mrf.mxu2  ;;  %v2163_v14 = vpop.f32.mrf.mxu3 }
 0x65c   :  { %v2153_v8 = vadd.f32 %v2149_v13, %v2046_v61  ;;  %v2167_v16 = vadd.f32 %v2163_v14, %v2075_v33  ;;  %2478 = vmatpush.bf16.msra.mxu1 %v4855_v35 }
 0x65e   :  { %v2196_v36 = vmul.f32 0.5, %v2153_v8  ;;  %v2200_v11 = vmul.f32 0.5, %v2167_v16  ;;  %v2179_v39 = vpop.f32.mrf.mxu0  ;;  %v2193_v12 = vpop.f32.mrf.mxu1 }
 0x660   :  { %3978 = vtanh.f32 %v2196_v36  ;;  %2479 = vmatpush.bf16.msra.mxu1 %v4882_v49 }
 0x661   :  { %3980 = vtanh.f32 %v2200_v11 }
 0x662   :  { %3982 = vtanh.f32 %v2181_v42 }
 0x663   :  { %v2151_v41 = vpop.f32.mrf.mxu2  ;;  %v2165_v46 = vpop.f32.mrf.mxu3  ;;  %3984 = vtanh.f32 %v2204_v50 }
 0x666   :  { %v3979_v19 = vpop.eup %3978  ;;  %v2258_v23 = vpop.f32.mrf.mxu0 }
 0x667   :  { %v2275_v24 = vpop.f32.mrf.mxu1  ;;  %v3981_v10 = vpop.eup %3980  ;;  %v2198_v31 = vmul.f32 0.5, %v3979_v19  ;;  %v2263_v14 = vrot.slane %v2258_v23, 4 }
 0x668   :  { %v2202_v38 = vmul.f32 0.5, %v3981_v10  ;;  %v3983_v4 = vpop.eup %3982  ;;  %v2280_v9 = vrot.slane %v2275_v24, 4 }
 0x669   :  { %v2199_v21 = vadd.f32 0.5, %v2198_v31  ;;  %v3985_v8 = vpop.eup %3984  ;;  %v2265_v44 = vadd.f32 %v2263_v14, %v4864_v20 }
 0x66a   :  { %v2203_v32 = vadd.f32 0.5, %v2202_v38  ;;  %v2206_v42 = vmul.f32 0.5, %v3985_v8  ;;  %v2282_v41 = vadd.f32 %v2280_v9, %v4870_v22 }
 0x66b   :  { %v2210_v6 = vmul.f32 %v3983_v4, %v2199_v21  ;;  %v2224_v3 = vpop.f32.mrf.mxu2  ;;  %v2241_v7 = vpop.f32.mrf.mxu3  ;;  %v2297_v4 = vrot.slane %v4954_v43, 6 }
 0x66c   :  { %v2209_v61 = vmul.f32 %v2203_v32, %v4937_v58  ;;  %v2229_v33 = vrot.slane %v2224_v3, 4  ;;  %v2246_v13 = vrot.slane %v2241_v7, 4  ;;  %v2207_v19 = vadd.f32 0.5, %v2206_v42 }
 0x66d   :  { %v2291_v24 = vmul.f32 0.5, %v2282_v41 }
 0x66e   :  { %v4982_v16 = vadd.f32 %v2210_v6, %v2209_v61  ;;  %v2231_v34 = vadd.f32 %v2229_v33, %v4835_v45  ;;  %v2248_v36 = vadd.f32 %v2246_v13, %v4841_v48  ;;  %v2260_v11 = vpop.f32.mrf.mxu0 }
 0x66f   :  { %v2277_v39 = vpop.f32.mrf.mxu1 }
 0x670   :  { %3986 = vtanh.f32 %v4982_v16  ;;  %v2283_v58 = vmul.f32 0.5, %v2231_v34  ;;  %v2287_v12 = vmul.f32 0.5, %v2248_v36 }
 0x672   :  { %3988 = vtanh.f32 %v2283_v58 }
 0x673   :  { %3990 = vtanh.f32 %v2287_v12  ;;  %v2226_v46 = vpop.f32.mrf.mxu2  ;;  %v2243_v50 = vpop.f32.mrf.mxu3 }
 0x674   :  { %3992 = vtanh.f32 %v2265_v44 }
 0x675   :  { %3994 = vtanh.f32 %v2291_v24 }
 0x676   :  { %v3987_v23 = vpop.eup %3986 }
 0x677   :  { %v2213_v28 = vmul.f32 %v3987_v23, %v2207_v19 }
 0x678   :  { %v3989_v47 = vpop.eup %3988 }
 0x679   :  { %v3991_v37 = vpop.eup %3990  ;;  %2214 = vst.msk [vmem:[#allocation2 + $0xa] sm:$0x3] %vm777_vm5, %v2213_v28  ;;  %v2285_v10 = vmul.f32 0.5, %v3989_v47  ;;  %v2426_v43 = vpack.c.bf16 %v2213_v28, %v2213_v28 }
 0x67a   :  { %v2289_v31 = vmul.f32 0.5, %v3991_v37  ;;  %v3993_v38 = vpop.eup %3992 }
 0x67b   :  { %v2286_v17 = vadd.f32 0.5, %v2285_v10  ;;  %v3995_v5 = vpop.eup %3994 }
 0x67c   :  { %v2290_v21 = vadd.f32 0.5, %v2289_v31  ;;  %v2293_v6 = vmul.f32 0.5, %v3995_v5  ;;  %v3823_v31 = vld [vmem:[#allocation6 + $0x8] sm:$0xff] }
 0x67d   :  { %v2300_v32 = vmul.f32 %v3993_v38, %v2286_v17  ;;  %v3825_v17 = vld [vmem:[#allocation6 + $0x18] sm:$0xff]  ;;  %v3827_v38 = vld [vmem:[#allocation6 + $0x28] sm:$0xff] }
 0x67e   :  { %v2299_v1 = vmul.f32 %v2297_v4, %v2290_v21  ;;  %v2294_v3 = vadd.f32 0.5, %v2293_v6  ;;  %v3822_v6 = vld [vmem:[#allocation6] sm:$0xff] }
 0x680   :  { %v4999_v63 = vadd.f32 %v2300_v32, %v2299_v1  ;;  %v3829_v32 = vld [vmem:[#allocation6 + $0x38] sm:$0xff] }
 0x682   :  { %3996 = vtanh.f32 %v4999_v63 }
 0x688   :  { %v3997_v7 = vpop.eup %3996 }
 0x689   :  { %v2303_v40 = vmul.f32 %v3997_v7, %v2294_v3  ;;  %v3824_v3 = vld [vmem:[#allocation6 + $0x10] sm:$0xff]  ;;  %v3826_v7 = vld [vmem:[#allocation6 + $0x20] sm:$0xff] }
 0x68b   :  { %v2304_v61 = vpack.c.bf16 %v2303_v40, %v2303_v40 }
 0x68d   :  { %v2310_v33 = vrot.slane %v2304_v61, 2 }
 0x68f   :  { %3629 = vmatmul.msk.bf16.vlgmr.msra.gmra.mxu2 %vm215_vm4, %v2310_v33  ;;  %3638 = vmatmul.msk.bf16.vlgmr.msra.gmra.mxu3 %vm215_vm4, %v2310_v33 }
 0x690   :  { %3647 = vmatmul.msk.bf16.vlgmr.msra.gmra.mxu0 %vm215_vm4, %v2310_v33  ;;  %3656 = vmatmul.msk.bf16.vlgmr.msrb.gmra.mxu1 %vm215_vm4, %v2310_v33 }
 0x691   :  { %2511 = vmatpush.bf16.msra.mxu2 %v4795_v52  ;;  %2528 = vmatpush.bf16.msra.mxu3 %v4798_v51 }
 0x692   :  { %2545 = vmatpush.bf16.msra.mxu0 %v4801_v53  ;;  %2562 = vmatpush.bf16.msrb.mxu1 %v4804_v54 }
 0x695   :  { %2512 = vmatpush.bf16.msra.mxu2 %v4807_v55  ;;  %2529 = vmatpush.bf16.msra.mxu3 %v4810_v56 }
 0x696   :  { %2546 = vmatpush.bf16.msra.mxu0 %v4813_v57  ;;  %2563 = vmatpush.bf16.msrb.mxu1 %v4816_v62 }
 0x69f   :  { %3657 = vmatmul.msk.bf16.vlgmr.msrb.gmra.mxu2 %vm215_vm4, %v2426_v43  ;;  %3658 = vmatmul.msk.bf16.vlgmr.msrb.gmra.mxu3 %vm215_vm4, %v2426_v43 }
 0x6a0   :  { %3659 = vmatmul.msk.bf16.vlgmr.msrb.gmra.mxu0 %vm215_vm4, %v2426_v43  ;;  %3660 = vmatmul.msk.bf16.vlgmr.msra.gmra.mxu1 %vm215_vm4, %v2426_v43 }
 0x6a1   :  { %2622 = vmatpush.bf16.msrb.mxu2 %v3823_v31  ;;  %2651 = vmatpush.bf16.msrb.mxu3 %v3825_v17 }
 0x6a2   :  { %2680 = vmatpush.bf16.msrb.mxu0 %v3827_v38  ;;  %2709 = vmatpush.bf16.msra.mxu1 %v3829_v32 }
 0x6a5   :  { %2623 = vmatpush.bf16.msrb.mxu2 %v3822_v6  ;;  %2652 = vmatpush.bf16.msrb.mxu3 %v3824_v3 }
 0x6a6   :  { %2681 = vmatpush.bf16.msrb.mxu0 %v3826_v7 }
 0x6af   :  { %3661 = vmatmul.msk.bf16.vlgmr.msra.gmra.mxu2 %vm215_vm4, %v2310_v33  ;;  %3662 = vmatmul.msk.bf16.vlgmr.msra.gmra.mxu3 %vm215_vm4, %v2310_v33 }
 0x6b0   :  { %3663 = vmatmul.msk.bf16.vlgmr.msra.gmra.mxu0 %vm215_vm4, %v2310_v33  ;;  %3664 = vmatmul.msk.bf16.vlgmr.msrb.gmra.mxu1 %vm215_vm4, %v2310_v33  ;;  %v3828_v33 = vld [vmem:[#allocation6 + $0x30] sm:$0xff] }
 0x6b1   :  { %2710 = vmatpush.bf16.msra.mxu1 %v3828_v33  ;;  %2726 = vmatpush.bf16.msra.mxu2 %v4843_v25 }
 0x6b2   :  { %2740 = vmatpush.bf16.msra.mxu3 %v4846_v27  ;;  %2754 = vmatpush.bf16.msra.mxu0 %v4852_v29 }
 0x6b5   :  { %2768 = vmatpush.bf16.msrb.mxu1 %v4855_v35  ;;  %2727 = vmatpush.bf16.msra.mxu2 %v4872_v60 }
 0x6b6   :  { %2741 = vmatpush.bf16.msra.mxu3 %v4875_v26  ;;  %2755 = vmatpush.bf16.msra.mxu0 %v4879_v30 }
 0x6b9   :  { %2769 = vmatpush.bf16.msrb.mxu1 %v4882_v49 }
 0x70d   :  { %v2393_v52 = vpop.f32.mrf.mxu0  ;;  %v2422_v51 = vpop.f32.mrf.mxu1 }
 0x70e   :  { %v2394_v58 = vadd.f32 %v4927_v59, %v2393_v52  ;;  %v2423_v12 = vadd.f32 %v4933_v2, %v2422_v51 }
 0x712   :  { %v2335_v53 = vpop.f32.mrf.mxu2  ;;  %v2364_v54 = vpop.f32.mrf.mxu3 }
 0x713   :  { %v2336_v8 = vadd.f32 %v4915_v15, %v2335_v53  ;;  %v2365_v9 = vadd.f32 %v4921_v18, %v2364_v54 }
 0x715   :  { %v2395_v55 = vpop.f32.mrf.mxu0  ;;  %v2424_v56 = vpop.f32.mrf.mxu1 }
 0x71a   :  { %v2337_v57 = vpop.f32.mrf.mxu2  ;;  %v2366_v62 = vpop.f32.mrf.mxu3 }
 0x71d   :  { %v2467_v13 = vpop.f32.mrf.mxu0  ;;  %v2481_v14 = vpop.f32.mrf.mxu1 }
 0x71e   :  { %v2471_v50 = vadd.f32 %v2467_v13, %v2394_v58  ;;  %v2485_v19 = vadd.f32 %v2481_v14, %v2423_v12 }
 0x720   :  { %v2494_v28 = vmul.f32 0.5, %v2485_v19 }
 0x722   :  { %v2439_v34 = vpop.f32.mrf.mxu2  ;;  %v2453_v36 = vpop.f32.mrf.mxu3 }
 0x723   :  { %v2443_v11 = vadd.f32 %v2439_v34, %v2336_v8  ;;  %v2457_v39 = vadd.f32 %v2453_v36, %v2365_v9 }
 0x725   :  { %v2486_v42 = vmul.f32 0.5, %v2443_v11  ;;  %v2490_v44 = vmul.f32 0.5, %v2457_v39  ;;  %v2469_v41 = vpop.f32.mrf.mxu0  ;;  %v2483_v46 = vpop.f32.mrf.mxu1 }
 0x726   :  { %v2587_v41 = vrot.slane %v4999_v63, 6 }
 0x727   :  { %3998 = vtanh.f32 %v2486_v42 }
 0x728   :  { %4000 = vtanh.f32 %v2490_v44 }
 0x729   :  { %4002 = vtanh.f32 %v2471_v50 }
 0x72a   :  { %v2441_v23 = vpop.f32.mrf.mxu2  ;;  %v2455_v24 = vpop.f32.mrf.mxu3  ;;  %4004 = vtanh.f32 %v2494_v28 }
 0x72d   :  { %v3999_v47 = vpop.eup %3998  ;;  %v2548_v37 = vpop.f32.mrf.mxu0 }
 0x72e   :  { %v2565_v10 = vpop.f32.mrf.mxu1  ;;  %v4001_v21 = vpop.eup %4000  ;;  %v2488_v4 = vmul.f32 0.5, %v3999_v47  ;;  %v2553_v56 = vrot.slane %v2548_v37, 2 }
 0x72f   :  { %v2492_v1 = vmul.f32 0.5, %v4001_v21  ;;  %v4003_v40 = vpop.eup %4002  ;;  %v2570_v13 = vrot.slane %v2565_v10, 2 }
 0x730   :  { %v2489_v5 = vadd.f32 0.5, %v2488_v4  ;;  %v4005_v57 = vpop.eup %4004  ;;  %v2555_v39 = vadd.f32 %v2553_v56, %v4864_v20 }
 0x731   :  { %v2493_v61 = vadd.f32 0.5, %v2492_v1  ;;  %v2496_v11 = vmul.f32 0.5, %v4005_v57 }
 0x732   :  { %v2500_v43 = vmul.f32 %v4003_v40, %v2489_v5  ;;  %v2514_v52 = vpop.f32.mrf.mxu2  ;;  %v2531_v51 = vpop.f32.mrf.mxu3  ;;  %v3831_v40 = vld [vmem:[%s5228_s12 + $0x8] sm:$0xff] }
 0x733   :  { %v2499_v53 = vmul.f32 %v2493_v61, %v4982_v16  ;;  %v2519_v54 = vrot.slane %v2514_v52, 2  ;;  %v2536_v55 = vrot.slane %v2531_v51, 2  ;;  %v2497_v27 = vadd.f32 0.5, %v2496_v11  ;;  %v3835_v61 = vld [vmem:[%s5232_s16 + $0x8] sm:$0xff] }
 0x735   :  { %v5027_v62 = vadd.f32 %v2500_v43, %v2499_v53  ;;  %v2521_v14 = vadd.f32 %v2519_v54, %v4835_v45  ;;  %v2538_v8 = vadd.f32 %v2536_v55, %v4841_v48  ;;  %v2550_v9 = vpop.f32.mrf.mxu0  ;;  %v2572_v45 = vadd.f32 %v2570_v13, %v4870_v22  ;;  %v3830_v53 = vld [vmem:[%s5228_s12] sm:$0xff]  ;;  %s3176_s12 = sshll.u32 %s5240_s24, 4  ;;  %s3138_s24 = sshll.u32 %s4345_s23, 4  ;;  %s3177_s12 = int_to_ptr.hbm [resolvable:$true] %s3176_s12  ;;  %s3139_s24 = int_to_ptr.vmem [resolvable:$true] %s3138_s24 }
 0x736   :  { %v2567_v34 = vpop.f32.mrf.mxu1 }
 0x737   :  { %4006 = vtanh.f32 %v5027_v62  ;;  %v2573_v16 = vmul.f32 0.5, %v2521_v14  ;;  %v2577_v36 = vmul.f32 0.5, %v2538_v8  ;;  %v2581_v35 = vmul.f32 0.5, %v2572_v45  ;;  %v5071_v14 = vld [vmem:[%s5234_s18] sm:$0xf] }
 0x738   :  { %vm2947_vm7 = vcmp.gt.f32.partialorder %v5071_v14, 0.5 }
 0x739   :  { %4008 = vtanh.f32 %v2573_v16 }
 0x73a   :  { %4010 = vtanh.f32 %v2577_v36  ;;  %v2516_v48 = vpop.f32.mrf.mxu2  ;;  %v2533_v25 = vpop.f32.mrf.mxu3 }
 0x73b   :  { %4012 = vtanh.f32 %v2555_v39 }
 0x73c   :  { %4014 = vtanh.f32 %v2581_v35 }
 0x73d   :  { %v4007_v29 = vpop.eup %4006 }
 0x73e   :  { %v2503_v58 = vmul.f32 %v4007_v29, %v2497_v27 }
 0x73f   :  { %v4009_v20 = vpop.eup %4008 }
 0x740   :  { %v4011_v12 = vpop.eup %4010  ;;  %2504 = vst.msk [vmem:[#allocation2 + $0xc] sm:$0x3] %vm777_vm5, %v2503_v58  ;;  %v2575_v22 = vmul.f32 0.5, %v4009_v20  ;;  %v2716_v63 = vpack.c.bf16 %v2503_v58, %v2503_v58 }
 0x741   :  { %v2579_v60 = vmul.f32 0.5, %v4011_v12  ;;  %v4013_v42 = vpop.eup %4012 }
 0x742   :  { %v2576_v26 = vadd.f32 0.5, %v2575_v22  ;;  %v4015_v49 = vpop.eup %4014 }
 0x743   :  { %v2580_v44 = vadd.f32 0.5, %v2579_v60  ;;  %v2583_v19 = vmul.f32 0.5, %v4015_v49 }
 0x744   :  { %v2590_v30 = vmul.f32 %v4013_v42, %v2576_v26  ;;  %v2800_v26 = vld [vmem:[#allocation2] sm:$0xff] }
 0x745   :  { %v2589_v46 = vmul.f32 %v2587_v41, %v2580_v44  ;;  %v2584_v23 = vadd.f32 0.5, %v2583_v19  ;;  %v3832_v41 = vld [vmem:[%s5230_s14] sm:$0xff] }
 0x747   :  { %v2591_v50 = vadd.f32 %v2590_v30, %v2589_v46  ;;  %v3866_v46 = vld [vmem:[%s5229_s13] ss:$0 sm:$0xff]  ;;  %s3187_s13 = sshll.u32 %s5241_s25, 4  ;;  %s3188_s13 = int_to_ptr.hbm [resolvable:$true] %s3187_s13 }
 0x749   :  { %4016 = vtanh.f32 %v2591_v50  ;;  %2797 = vst.msk [vmem:[#allocation15 - $0x6] sm:$0xc0] %vm2795_vm6, %v2591_v50 }
 0x74a   :  { %3168 = dma.vmem_to_hbm [thread:$0]  %s3164_s3, 32, %s3166_s15, [#allocation16]  }
 0x74f   :  { %v4017_v24 = vpop.eup %4016 }
 0x750   :  { %v2593_v28 = vmul.f32 %v4017_v24, %v2584_v23 }
 0x752   :  { %v2594_v47 = vpack.c.bf16 %v2593_v28, %v2593_v28  ;;  %2796 = vst.msk [vmem:[#allocation14 - $0x6] sm:$0xc0] %vm2795_vm6, %v2593_v28 }
 0x754   :  { %v2600_v37 = vrot.slane %v2594_v47, 3  ;;  %v2948_v47 = vsel %vm2947_vm7, 1, %v4340_v0 }
 0x756   :  { %3673 = vmatmul.msk.bf16.vlgmr.msrb.gmra.mxu2 %vm215_vm4, %v2600_v37  ;;  %3682 = vmatmul.msk.bf16.vlgmr.msrb.gmra.mxu3 %vm215_vm4, %v2600_v37 }
 0x757   :  { %3691 = vmatmul.msk.bf16.vlgmr.msrb.gmra.mxu0 %vm215_vm4, %v2600_v37  ;;  %3700 = vmatmul.msk.bf16.vlgmr.msra.gmra.mxu1 %vm215_vm4, %v2600_v37  ;;  %v2975_v37 = vperm.slane %v2948_v47, 2 }
 0x758   :  { %2832 = vmatpush.bf16.msrb.mxu2 %v3831_v40  ;;  %2902 = vmatpush.bf16.msrb.mxu0 %v3835_v61 }
 0x759   :  { %vm5095_vm8 = vcmp.eq.s32.totalorder %v2975_v37, 1 }
 0x75c   :  { %2833 = vmatpush.bf16.msrb.mxu2 %v3830_v53 }
 0x766   :  { %3701 = vmatmul.msk.bf16.vlgmr.msra.gmra.mxu2 %vm215_vm4, %v2716_v63  ;;  %3702 = vmatmul.msk.bf16.vlgmr.msra.gmra.mxu3 %vm215_vm4, %v2716_v63 }
 0x767   :  { %3703 = vmatmul.msk.bf16.vlgmr.msra.gmra.mxu0 %vm215_vm4, %v2716_v63  ;;  %3704 = vmatmul.msk.bf16.vlgmr.msrb.gmra.mxu1 %vm215_vm4, %v2716_v63  ;;  %v2949_v63 = vperm.slane %v2948_v47, 0 }
 0x768   :  { %3734 = vmatpush.msk.msra.mxu2 %vm176_vm0, %v5071_v14 }
 0x769   :  { %vm5099_vm9 = vcmp.eq.s32.totalorder %v2949_v63, 1 }
 0x7d4   :  { %v2683_v10 = vpop.f32.mrf.mxu0  ;;  %v2712_v31 = vpop.f32.mrf.mxu1 }
 0x7d5   :  { %v2713_v54 = vadd.f32 %v4933_v2, %v2712_v31 }
 0x7d9   :  { %v2625_v17 = vpop.f32.mrf.mxu2  ;;  %v2654_v38 = vpop.f32.mrf.mxu3 }
 0x7da   :  { %v2626_v3 = vadd.f32 %v4915_v15, %v2625_v17  ;;  %v2655_v7 = vadd.f32 %v4921_v18, %v2654_v38  ;;  %v3834_v15 = vld [vmem:[%s5232_s16] sm:$0xff]  ;;  %v2684_v18 = vadd.f32 %v4927_v59, %v2683_v10  ;;  %v3867_v10 = vld [vmem:[#allocation9] ss:$0 sm:$0xff]  ;;  %s4343_s16 = smov [#allocation17]  }
 0x7db   :  { %2903 = vmatpush.bf16.msrb.mxu0 %v3834_v15  ;;  %s3174_s18 = sshll.u32 %s4343_s16, 4  ;;  %s3175_s18 = int_to_ptr.vmem [resolvable:$true] %s3174_s18 }
 0x7dc   :  { %v2685_v21 = vpop.f32.mrf.mxu0  ;;  %v2714_v4 = vpop.f32.mrf.mxu1 }
 0x7dd   :  { %v2988_v4 = vperm.slane %v2948_v47, 3 }
 0x7df   :  { %vm5113_vm10 = vcmp.eq.s32.totalorder %v2988_v4, 1 }
 0x7e1   :  { %v2627_v32 = vpop.f32.mrf.mxu2  ;;  %v2656_v1 = vpop.f32.mrf.mxu3 }
 0x7e2   :  { %v2962_v1 = vperm.slane %v2948_v47, 1 }
 0x7e4   :  { %v2757_v5 = vpop.f32.mrf.mxu0  ;;  %v2771_v6 = vpop.f32.mrf.mxu1  ;;  %vm5117_vm11 = vcmp.eq.s32.totalorder %v2962_v1, 1 }
 0x7e5   :  { %v2761_v8 = vadd.f32 %v2757_v5, %v2684_v18  ;;  %v2775_v9 = vadd.f32 %v2771_v6, %v2713_v54 }
 0x7e7   :  { %v2784_v34 = vmul.f32 0.5, %v2775_v9 }
 0x7e9   :  { %v2729_v33 = vpop.f32.mrf.mxu2  ;;  %v2743_v43 = vpop.f32.mrf.mxu3 }
 0x7ea   :  { %v2733_v52 = vadd.f32 %v2729_v33, %v2626_v3  ;;  %v2747_v51 = vadd.f32 %v2743_v43, %v2655_v7 }
 0x7ec   :  { %v2776_v55 = vmul.f32 0.5, %v2733_v52  ;;  %v2780_v56 = vmul.f32 0.5, %v2747_v51  ;;  %v2759_v57 = vpop.f32.mrf.mxu0  ;;  %v2773_v13 = vpop.f32.mrf.mxu1 }
 0x7ee   :  { %4018 = vtanh.f32 %v2776_v55 }
 0x7ef   :  { %4020 = vtanh.f32 %v2780_v56 }
 0x7f0   :  { %4022 = vtanh.f32 %v2761_v8 }
 0x7f1   :  { %v2731_v59 = vpop.f32.mrf.mxu2  ;;  %v2745_v2 = vpop.f32.mrf.mxu3  ;;  %4024 = vtanh.f32 %v2784_v34  ;;  %v2945_v34 = vld [vmem:[%s5233_s17 + $0x20] sm:$0xff] }
 0x7f2   :  { %3030 = vmatpush.msra.mxu0 %v2945_v34  ;;  %3836 = vmatpush.msra.mxu1 %v2945_v34 }
 0x7f4   :  { %v4019_v16 = vpop.eup %4018 }
 0x7f5   :  { %v4021_v36 = vpop.eup %4020  ;;  %v2778_v11 = vmul.f32 0.5, %v4019_v16  ;;  %v2944_v16 = vld [vmem:[%s5233_s17 + $0x18] sm:$0xff] }
 0x7f6   :  { %v2782_v39 = vmul.f32 0.5, %v4021_v36  ;;  %v4023_v48 = vpop.eup %4022  ;;  %3031 = vmatpush.msra.mxu0 %v2944_v16  ;;  %v2943_v36 = vld [vmem:[%s5233_s17 + $0x10] sm:$0xff]  ;;  %3837 = vmatpush.msra.mxu1 %v2944_v16 }
 0x7f7   :  { %v2779_v45 = vadd.f32 0.5, %v2778_v11  ;;  %v4025_v35 = vpop.eup %4024  ;;  %v2942_v11 = vld [vmem:[%s5233_s17 + $0x8] sm:$0xff] }
 0x7f8   :  { %v2783_v25 = vadd.f32 0.5, %v2782_v39  ;;  %v2786_v20 = vmul.f32 0.5, %v4025_v35  ;;  %3032 = vmatpush.msra.mxu0 %v2943_v36  ;;  %3838 = vmatpush.msra.mxu1 %v2943_v36  ;;  %v2941_v39 = vld [vmem:[%s5233_s17] sm:$0xff]  ;;  %v2972_v35 = vperm.slane %v5071_v14, 1  ;;  %s4347_s17 = smov 128  }
 0x7f9   :  { %v2790_v27 = vmul.f32 %v4023_v48, %v2779_v45 }
 0x7fa   :  { %v2789_v29 = vmul.f32 %v2783_v25, %v5027_v62  ;;  %v2787_v12 = vadd.f32 0.5, %v2786_v20  ;;  %v3833_v62 = vld [vmem:[%s5230_s14 + $0x8] sm:$0xff]  ;;  %3033 = vmatpush.msra.mxu0 %v2942_v11  ;;  %3839 = vmatpush.msra.mxu1 %v2942_v11  ;;  %v2985_v25 = vperm.slane %v5071_v14, 2 }
 0x7fb   :  { %2872 = vmatpush.bf16.msrb.mxu3 %v3833_v62 }
 0x7fc   :  { %v2791_v58 = vadd.f32 %v2790_v27, %v2789_v29  ;;  %3034 = vmatpush.msra.mxu0 %v2941_v39  ;;  %3840 = vmatpush.msra.mxu1 %v2941_v39  ;;  %v2998_v27 = vperm.slane %v5071_v14, 3  ;;  %v2959_v29 = vperm.slane %v5071_v14, 0 }
 0x7fe   :  { %4026 = vtanh.f32 %v2791_v58  ;;  %2799 = vst.msk [vmem:[#allocation18] sm:$0x3] %vm777_vm5, %v2791_v58 }
 0x7ff   :  { %2873 = vmatpush.bf16.msrb.mxu3 %v3832_v41 }
 0x803   :  { %3737 = vmatpush.msk.msra.mxu3 %vm176_vm0, %v5071_v14 }
 0x804   :  { %v4027_v22 = vpop.eup %4026 }
 0x805   :  { %v2793_v60 = vmul.f32 %v4027_v22, %v2787_v12 }
 0x807   :  { %2794 = vst.msk [vmem:[#allocation2 + $0xe] sm:$0x3] %vm777_vm5, %v2793_v60 }
 0x808   :  { %2798 = vst.msk [vmem:[#allocation17] sm:$0x3] %vm777_vm5, %v2793_v60 }
 0x809   :  { %3179 = dma.vmem_to_hbm [thread:$0]  %s3175_s18, 32, %s3177_s12, [#allocation16]  }
 0x80e   :  { %v2801_v42 = vld [vmem:[#allocation2 + $0x8] sm:$0xff] }
 0x80f   :  { %v2802_v44 = vpack.c.bf16 %v2801_v42, %v2800_v26 }
 0x811   :  { %3713 = vmatmul.msk.bf16.vlgmr.msrb.gmra.mxu2 %vm215_vm4, %v2802_v44  ;;  %3731 = vmatmul.msk.bf16.vlgmr.msrb.gmra.mxu0 %vm215_vm4, %v2802_v44 }
 0x88e   :  { %v2905_v57 = vpop.f32.mrf.mxu0 }
 0x88f   :  { %v2911_v8 = vsel %vm2910_vm12, %v2905_v57, -inf }
 0x894   :  { %v2835_v30 = vpop.f32.mrf.mxu2 }
 0x895   :  { %v2836_v49 = vadd.f32 %v3866_v46, %v2835_v30 }
 0x896   :  { %v2907_v59 = vpop.f32.mrf.mxu0 }
 0x897   :  { %4028 = vtanh.f32 %v2836_v49  ;;  %v2914_v2 = vsel %vm2910_vm12, %v2907_v59, -inf }
 0x89c   :  { %v2837_v50 = vpop.f32.mrf.mxu2 }
 0x89d   :  { %v2838_v19 = vadd.f32 %v3866_v46, %v2837_v50  ;;  %v4029_v23 = vpop.eup %4028 }
 0x89f   :  { %4030 = vtanh.f32 %v2838_v19 }
 0x8a5   :  { %v4031_v24 = vpop.eup %4030 }
 0x8a6   :  { %v2842_v28 = vpack.c.bf16 %v4031_v24, %v4029_v23 }
 0x8a8   :  { %3722 = vmatmul.msk.bf16.vlgmr.msrb.gmra.mxu3 %vm215_vm4, %v2842_v28 }
 0x92b   :  { %v2875_v31 = vpop.f32.mrf.mxu3 }
 0x92c   :  { %v5103_v21 = vadd.f32 %v3867_v10, %v2875_v31 }
 0x92e   :  { %v2977_v32 = vsel %vm5095_vm8, %v5103_v21, -1e+30  ;;  %v2951_v0 = vsel %vm5099_vm9, %v5103_v21, -1e+30  ;;  %v2990_v33 = vsel %vm5113_vm10, %v5103_v21, -1e+30 }
 0x92f   :  { %v2979_v5 = vsel %vm172_vm3, %v2977_v32, -inf  ;;  %v2953_v6 = vsel %vm172_vm3, %v2951_v0, -inf  ;;  %v2964_v43 = vsel %vm5117_vm11, %v5103_v21, -1e+30  ;;  %v2992_v53 = vsel %vm172_vm3, %v2990_v33, -inf }
 0x930   :  { %2980 = vmax.xlane.f32.xlu2 %v2979_v5  ;;  %2954 = vmax.xlane.f32.xlu1 %v2953_v6  ;;  %v2966_v15 = vsel %vm172_vm3, %v2964_v43, -inf }
 0x933   :  { %v2877_v40 = vpop.f32.mrf.mxu3 }
 0x934   :  { %v5121_v61 = vadd.f32 %v3867_v10, %v2877_v40 }
 0x936   :  { %v2952_v52 = vsel %vm5099_vm9, %v5121_v61, -1e+30  ;;  %v2978_v18 = vsel %vm5095_vm8, %v5121_v61, -1e+30  ;;  %v2965_v54 = vsel %vm5117_vm11, %v5121_v61, -1e+30 }
 0x937   :  { %v2956_v51 = vsel %vm172_vm3, %v2952_v52, -inf  ;;  %v2982_v55 = vsel %vm172_vm3, %v2978_v18, -inf  ;;  %v2969_v56 = vsel %vm172_vm3, %v2965_v54, -inf  ;;  %v2991_v13 = vsel %vm5113_vm10, %v5121_v61, -1e+30 }
 0x938   :  { %2957 = vmax.xlane.f32.xlu0 %v2956_v51  ;;  %2993 = vmax.xlane.f32.xlu2 %v2992_v53  ;;  %v2995_v9 = vsel %vm172_vm3, %v2991_v13, -inf }
 0x939   :  { %2967 = vmax.xlane.f32.xlu1 %v2966_v15 }
 0x940   :  { %2983 = vmax.xlane.f32.xlu2 %v2982_v55 }
 0x941   :  { %2970 = vmax.xlane.f32.xlu1 %v2969_v56 }
 0x948   :  { %2912 = vmax.xlane.f32.xlu2 %v2911_v8 }
 0x949   :  { %2996 = vmax.xlane.f32.xlu1 %v2995_v9 }
 0x951   :  { %2915 = vmax.xlane.f32.xlu1 %v2914_v2 }
 0x9a3   :  { %v2981_v45 = vpop.xlane.xlu2 %2980  ;;  %v2955_v48 = vpop.xlane.xlu1 %2954 }
 0x9a4   :  { %v2986_v20 = vmul.f32 %v2985_v25, %v2981_v45  ;;  %v2960_v60 = vmul.f32 %v2959_v29, %v2955_v48 }
 0x9ab   :  { %v2994_v58 = vpop.xlane.xlu2 %2993  ;;  %v2958_v50 = vpop.xlane.xlu0 %2957 }
 0x9ac   :  { %v2999_v12 = vmul.f32 %v2998_v27, %v2994_v58  ;;  %v2968_v22 = vpop.xlane.xlu1 %2967  ;;  %v2961_v47 = vmul.f32 %v2959_v29, %v2958_v50 }
 0x9ad   :  { %v2973_v26 = vmul.f32 %v2972_v35, %v2968_v22 }
 0x9ae   :  { %v3003_v42 = vadd.f32 %v2999_v12, %v2986_v20 }
 0x9af   :  { %v3001_v44 = vadd.f32 %v2973_v26, %v2960_v60 }
 0x9b1   :  { %v3005_v62 = vadd.f32 %v3003_v42, %v3001_v44 }
 0x9b3   :  { %v3007_v41 = vsub.f32 %v5103_v21, %v3005_v62  ;;  %v2984_v30 = vpop.xlane.xlu2 %2983 }
 0x9b4   :  { %v2971_v46 = vpop.xlane.xlu1 %2970  ;;  %v2987_v37 = vmul.f32 %v2985_v25, %v2984_v30 }
 0x9b5   :  { %v3009_v49 = vmul.f32 1.442695, %v3007_v41  ;;  %v2974_v19 = vmul.f32 %v2972_v35, %v2971_v46 }
 0x9b7   :  { %4032 = vpow2.f32 %v3009_v49  ;;  %v3002_v31 = vadd.f32 %v2974_v19, %v2961_v47 }
 0x9bb   :  { %v2913_v23 = vpop.xlane.xlu2 %2912 }
 0x9bc   :  { %v2917_v24 = vsub.f32 %v2905_v57, %v2913_v23  ;;  %v2997_v14 = vpop.xlane.xlu1 %2996 }
 0x9bd   :  { %v5169_v28 = vpop.eup %4032  ;;  %v3000_v63 = vmul.f32 %v2998_v27, %v2997_v14 }
 0x9be   :  { %v2919_v10 = vmul.f32 1.442695, %v2917_v24  ;;  %3732 = vmatmul.msk.f32.vlgmr.msra.gmra.mxu0 %vm172_vm3, %v5169_v28 }
 0x9bf   :  { %v3004_v17 = vadd.f32 %v3000_v63, %v2987_v37 }
 0x9c0   :  { %4034 = vpow2.f32 %v2919_v10 }
 0x9c1   :  { %v3006_v38 = vadd.f32 %v3004_v17, %v3002_v31 }
 0x9c3   :  { %v3008_v21 = vsub.f32 %v5121_v61, %v3006_v38 }
 0x9c4   :  { %v2916_v4 = vpop.xlane.xlu1 %2915 }
 0x9c5   :  { %v3011_v32 = vmul.f32 1.442695, %v3008_v21  ;;  %v2918_v0 = vsub.f32 %v2907_v59, %v2916_v4 }
 0x9c6   :  { %v4035_v1 = vpop.eup %4034 }
 0x9c7   :  { %4036 = vpow2.f32 %v3011_v32  ;;  %v2921_v5 = vmul.f32 1.442695, %v2918_v0  ;;  %v2923_v6 = vsel %vm2910_vm12, %v4035_v1, 0.0 }
 0x9c8   :  { %2924 = vadd.xlane.f32.xlu2 %v2923_v6 }
 0x9c9   :  { %4038 = vpow2.f32 %v2921_v5 }
 0x9cd   :  { %v5175_v3 = vpop.eup %4036 }
 0x9ce   :  { %3733 = vmatmul.msk.f32.vlgmr.msra.gmra.mxu1 %vm172_vm3, %v5175_v3 }
 0x9cf   :  { %v4039_v7 = vpop.eup %4038 }
 0x9d0   :  { %v2926_v40 = vsel %vm2910_vm12, %v4039_v7, 0.0 }
 0x9d1   :  { %2927 = vadd.xlane.f32.xlu1 %v2926_v40 }
 0xa3b   :  { %v3036_v61 = vpop.f32.mrf.mxu0  ;;  %v2925_v33 = vpop.xlane.xlu2 %2924 }
 0xa3c   :  { %4040 = vrcp.f32 %v2925_v33  ;;  %3735 = vmatmul.msk.f32.vlgmr.msra.gmra.mxu2 %vm2910_vm12, %v3036_v61 }
 0xa42   :  { %v4041_v43 = vpop.eup %4040 }
 0xa43   :  { %v2931_v52 = vmul.f32 %v4041_v43, %v4035_v1 }
 0xa44   :  { %v2928_v51 = vpop.xlane.xlu1 %2927 }
 0xa45   :  { %v2933_v53 = vadd.f32 1e-08, %v2931_v52  ;;  %4042 = vrcp.f32 %v2928_v51  ;;  %3738 = vmatmul.msk.f32.vlgmr.msra.gmra.mxu3 %vm2910_vm12, %v2931_v52 }
 0xa47   :  { %4044 = vlog2.f32 %v2933_v53 }
 0xa4b   :  { %v4043_v15 = vpop.eup %4042  ;;  %v3039_v18 = vpop.f32.mrf.mxu1 }
 0xa4c   :  { %v2932_v54 = vmul.f32 %v4043_v15, %v4039_v7  ;;  %3736 = vmatmul.msk.f32.gmra.mxu2 %vm2910_vm12, %v3039_v18 }
 0xa4d   :  { %v4045_v55 = vpop.eup %4044 }
 0xa4e   :  { %v2936_v56 = vmul.f32 0.6931472, %v4045_v55  ;;  %v2934_v57 = vadd.f32 1e-08, %v2932_v54  ;;  %3739 = vmatmul.msk.f32.gmra.mxu3 %vm2910_vm12, %v2932_v54 }
 0xa50   :  { %2939 = vst.msk [vmem:[%s5235_s19] sm:$0xff] %vm2910_vm12, %v2936_v56  ;;  %4046 = vlog2.f32 %v2934_v57 }
 0xa56   :  { %v4047_v13 = vpop.eup %4046 }
 0xa57   :  { %v2938_v8 = vmul.f32 0.6931472, %v4047_v13 }
 0xa59   :  { %2940 = vst.msk [vmem:[%s5235_s19 + $0x8] sm:$0xff] %vm2910_vm12, %v2938_v8  ;;  %s3185_s19 = sshll.u32 %s4344_s21, 4  ;;  %s3186_s19 = int_to_ptr.vmem [resolvable:$true] %s3185_s19 }
 0xa5a   :  { %3190 = dma.vmem_to_hbm [thread:$0]  %s3186_s19, 32, %s3188_s13, [#allocation19]  }
 0xabf   :  { %v3068_v9 = vpop.f32.mrf.mxu2 }
 0xac0   :  { %4048 = vrcp.f32 %v3068_v9 }
 0xac6   :  { %v4049_v59 = vpop.eup %4048 }
 0xac7   :  { %v3076_v2 = vmul.f32 %v4049_v59, %v5169_v28 }
 0xac8   :  { %v3109_v34 = vpop.f32.mrf.mxu3 }
 0xac9   :  { %v3078_v16 = vadd.f32 1e-08, %v3076_v2  ;;  %v3115_v36 = vmul.f32 %v3109_v34, %v3076_v2 }
 0xacb   :  { %4050 = vlog2.f32 %v3078_v16  ;;  %3117 = vst.msk [vmem:[#allocation12] sm:$0xff] %vm172_vm3, %v3115_v36 }
 0xacf   :  { %v3071_v11 = vpop.f32.mrf.mxu2 }
 0xad0   :  { %4052 = vrcp.f32 %v3071_v11 }
 0xad1   :  { %v4051_v39 = vpop.eup %4050  ;;  %v3112_v27 = vpop.f32.mrf.mxu3 }
 0xad2   :  { %v3081_v45 = vmul.f32 0.6931472, %v4051_v39 }
 0xad4   :  { %3084 = vst.msk [vmem:[#allocation11] sm:$0xff] %vm172_vm3, %v3081_v45 }
 0xad6   :  { %v4053_v48 = vpop.eup %4052 }
 0xad7   :  { %v3077_v25 = vmul.f32 %v4053_v48, %v5175_v3 }
 0xad9   :  { %v3079_v29 = vadd.f32 1e-08, %v3077_v25  ;;  %v3116_v35 = vmul.f32 %v3112_v27, %v3077_v25 }
 0xadb   :  { %4054 = vlog2.f32 %v3079_v29  ;;  %3118 = vst.msk [vmem:[#allocation12 + $0x8] sm:$0xff] %vm172_vm3, %v3116_v35 }
 0xadc   :  { %3146 = dma.vmem_to_hbm [thread:$0]  %s3139_s24, 256, %s3141_s4, [#allocation13], %s4347_s17, %s4347_s17, %s4348_s9  }
 0xadd   :  { %3157 = dma.vmem_to_hbm [thread:$0]  %s3153_s28, 32, %s3155_s2, [#allocation13]  }
 0xae1   :  { %v4055_v58 = vpop.eup %4054 }
 0xae2   :  { %v3083_v20 = vmul.f32 0.6931472, %v4055_v58 }
 0xae4   :  { %3085 = vst.msk [vmem:[#allocation11 + $0x8] sm:$0xff] %vm172_vm3, %v3083_v20 }
 0xae5   :  { %3133 = dma.vmem_to_hbm [thread:$0]  %s3126_s26, 256, %s3128_s20, [#allocation5], %s4347_s17, %s4347_s17, %s4348_s9  }
 0xae6   :  { %4326 = dma.done.wait [#allocation5], 256  }
 0xae7   :  { %4327 = vsyncadd [#allocation5], 4294967040 }
 0xae8   :  { %4328 = dma.done.wait [#allocation13], 288  }
 0xae9   :  { %4329 = vsyncadd [#allocation13], 4294967008 }
 0xaea   :  { %4330 = dma.done.wait [#allocation16], 64  }
 0xaeb   :  { %4331 = vsyncadd [#allocation16], 4294967232 }
 0xaec   :  { %4332 = dma.done.wait [#allocation19], 32  }
 0xaed   :  { %4333 = vsyncadd [#allocation19], 4294967264 }
 0xaee   :  { %3217 = vsyncpa [#allocation4], 1 }
 0xaef   :  { %3218 = vsyncpa [#allocation7], 1 }
 0xaf0   :  { %3219 = vsyncpa [#allocation10], 1 }
 0xaf1   :  { %3220 = vsyncpa [#allocation5], 1 }
 0xaf2   :  { %3221 = vsyncpa [#allocation13], 1 }
 0xaf3   :  { %3222 = vsyncpa [#allocation16], 1 }
 0xaf4   :  { %3223 = vsyncpa [#allocation19], 1 }

</bundles_post_ra>
